<compile_context>
chip_gen: v7x
topology: tpu7x:2x2x1
jax: 0.10.0
libtpu: 0.0.40
codegen_flags: <defaults>
</compile_context>

<pallas_src>
import functools

import jax
import jax.numpy as jnp
from jax.experimental import pallas as pl
from jax.experimental.pallas import tpu as pltpu

_EPS = 1e-5                       # torch BatchNorm default eps
_SQRT_2_OVER_PI = 0.7978845608028654


def _gelu(x):
    # tanh-approximation GELU: the transcendental lands on the EUP (free VLIW
    # slot); max abs deviation from torch's exact erf-GELU is ~3e-4.
    return 0.5 * x * (1.0 + jnp.tanh(_SQRT_2_OVER_PI * (x + 0.044715 * (x * x * x))))


def _param_layout(Cin, Ch, Cs):
    """Static column offsets of every parameter inside the packed (Ch, NCOL) slab."""
    off = {}
    c = 0
    for name, width in (("bn0_g", 1), ("bn0_b", 1),
                        ("w1", Cin),
                        ("bn1_g", 1), ("bn1_b", 1),
                        ("dw", 9),
                        ("bn2_g", 1), ("bn2_b", 1),
                        ("fc1", Cs), ("fc2", Cs),
                        ("w3", Ch),
                        ("bn3_g", 1), ("bn3_b", 1)):
        off[name] = c
        c += width
    return off, c


# --------------------------------- the kernel ---------------------------------

def mbconv_kernel(x_ref, p_ref, o_ref, *, B, Cin, Ch, Cs, Cout, H, W):
    P = H * W
    BP = B * P
    n = float(BP)
    off, _ = _param_layout(Cin, Ch, Cs)

    pm = p_ref[...]                                     # (Ch, NCOL) packed params

    def pcol(name, rows, j=0):
        c = off[name] + j
        return pm[0:rows, c:c + 1]                      # (rows, 1), static slice

    def bn_train(t, g, b):
        # Training-mode BatchNorm2d on a (C, B*H*W) slab: one lane-reduce per
        # statistic, one-pass biased variance (matches torch batch statistics).
        # TODO(synk): one-pass E[x^2]-E[x]^2 can cancel at production magnitudes;
        # switch to a two-pass (stats then apply) BN when tiling for real sizes.
        s = jnp.sum(t, axis=1, keepdims=True)
        ss = jnp.sum(t * t, axis=1, keepdims=True)
        mean = s / n
        var = jnp.maximum(ss / n - mean * mean, 0.0)
        scale = g * jax.lax.rsqrt(var + _EPS)           # (C, 1)
        shift = b - mean * scale                        # (C, 1)
        return t * scale + shift

    # ---- PreNorm BN0 statistics (folded into the 1x1 expand conv below) -------
    x = x_ref[...]                                      # (Cin, BP)
    s0 = jnp.sum(x, axis=1, keepdims=True)
    ss0 = jnp.sum(x * x, axis=1, keepdims=True)
    mean0 = s0 / n
    var0 = jnp.maximum(ss0 / n - mean0 * mean0, 0.0)
    scale0 = pcol("bn0_g", Cin) * jax.lax.rsqrt(var0 + _EPS)   # (Cin, 1)
    shift0 = pcol("bn0_b", Cin) - mean0 * scale0               # (Cin, 1)

    # ---- 1x1 expand conv: Cin VPU broadcast-FMAs, BN0 folded, 2 acc chains ----
    acc = [None, None]
    bias = [None, None]
    for c in range(Cin):
        wc = pcol("w1", Ch, c)                          # (Ch, 1) weight column
        term = x[c:c + 1, :] * (wc * scale0[c:c + 1, :])       # (Ch, BP)
        bterm = wc * shift0[c:c + 1, :]                        # (Ch, 1)
        j = c & 1
        acc[j] = term if acc[j] is None else acc[j] + term
        bias[j] = bterm if bias[j] is None else bias[j] + bterm
    h = acc[0] if acc[1] is None else acc[0] + acc[1]
    hb = bias[0] if bias[1] is None else bias[0] + bias[1]
    h = h + hb                                          # (Ch, BP)

    # ---- BN1 + GELU ------------------------------------------------------------
    h = _gelu(bn_train(h, pcol("bn1_g", Ch), pcol("bn1_b", Ch)))

    # ---- depthwise 3x3 (stride 1, pad 1): lane rolls + (1, BP) boundary masks --
    # Masks are computed once at (1, BP) and broadcast in the select.  No int
    # div/mod: power-of-two bit ops, float-floor fallback otherwise.
    pos = jax.lax.broadcasted_iota(jnp.int32, (1, BP), 1)
    if (P & (P - 1)) == 0:
        p_loc = jnp.bitwise_and(pos, P - 1)
    else:
        imgf = jnp.floor((pos.astype(jnp.float32) + 0.5) * (1.0 / P))
        p_loc = pos - (imgf * P).astype(jnp.int32)
    if (W & (W - 1)) == 0:
        colv = jnp.bitwise_and(p_loc, W - 1)
        rowv = jnp.right_shift(p_loc, W.bit_length() - 1)
    else:
        rowf = jnp.floor((p_loc.astype(jnp.float32) + 0.5) * (1.0 / W))
        rowv = rowf.astype(jnp.int32)
        colv = p_loc - (rowf * W).astype(jnp.int32)
    row_ok = {-1: rowv >= 1, 1: rowv <= H - 2}
    col_ok = {-1: colv >= 1, 1: colv <= W - 2}

    dwc = [pcol("dw", Ch, t) for t in range(9)]         # hoisted (Ch, 1) columns
    d_acc = [h * dwc[4], None]                          # centre tap (0, 0)
    k = 0
    for di in (-1, 0, 1):
        for dj in (-1, 0, 1):
            if di == 0 and dj == 0:
                continue
            tap = (di + 1) * 3 + (dj + 1)
            # out[q] = h[q + di*W + dj]; any roll that crosses an image boundary
            # lands only at positions where row/col leave the 3x3 window -> masked.
            sh = pltpu.roll(h, (-(di * W + dj)) % BP, 1)
            if di != 0 and dj != 0:
                mask = row_ok[di] & col_ok[dj]
            elif di != 0:
                mask = row_ok[di]
            else:
                mask = col_ok[dj]
            term = jnp.where(mask, sh, 0.0) * dwc[tap]
            j = k & 1
            d_acc[j] = term if d_acc[j] is None else d_acc[j] + term
            k += 1
    hdw = d_acc[0] + d_acc[1]

    # ---- BN2 + GELU ------------------------------------------------------------
    h = _gelu(bn_train(hdw, pcol("bn2_g", Ch), pcol("bn2_b", Ch)))   # (Ch, BP)

    # ---- SE: per-image avg-pool -> fc -> GELU -> fc -> sigmoid -> scale --------
    # Entirely in column space (channels on sublanes); contractions (Ch=16, Cs=1)
    # are far too small for the MXU.  P is a multiple of 128 here, so the static
    # per-image lane slices are aligned.
    fc1c = [pcol("fc1", Ch, s) for s in range(Cs)]
    fc2c = [pcol("fc2", Ch, s) for s in range(Cs)]
    inv_p = 1.0 / float(P)
    parts = []
    for b in range(B):
        hb_img = h[:, b * P:(b + 1) * P]                # (Ch, P)
        yp = jnp.sum(hb_img, axis=1, keepdims=True) * inv_p     # (Ch, 1)
        gate = None
        for s in range(Cs):
            z = jnp.sum(yp * fc1c[s], axis=0, keepdims=True)    # (1, 1)
            z = _gelu(z)
            g_term = z * fc2c[s]                                # (Ch, 1)
            gate = g_term if gate is None else gate + g_term
        gate = jax.nn.sigmoid(gate)                             # (Ch, 1)
        parts.append(hb_img * gate)
    h = parts[0] if B == 1 else jnp.concatenate(parts, axis=1)  # (Ch, BP)

    # ---- 1x1 project conv: Ch VPU broadcast-FMAs, 2 accumulator chains ---------
    p_acc = [None, None]
    for kk in range(Ch):
        w3c = pcol("w3", Cout, kk)                      # (Cout, 1)
        term = h[kk:kk + 1, :] * w3c                    # (Cout, BP)
        j = kk & 1
        p_acc[j] = term if p_acc[j] is None else p_acc[j] + term
    out = p_acc[0] if p_acc[1] is None else p_acc[0] + p_acc[1]

    # ---- BN3 + residual (lane-dense store, last dim = B*H*W) -------------------
    out = bn_train(out, pcol("bn3_g", Cout), pcol("bn3_b", Cout))
    o_ref[...] = x_ref[...] + out


# --------------------------------- wrapper ------------------------------------

def _pack_params(params, Cin, Ch, Cs, Cout):
    """Pack all small parameters into one (Ch, NCOL) f32 slab (single DMA)."""
    off, ncol = _param_layout(Cin, Ch, Cs)
    pm = jnp.zeros((Ch, ncol), jnp.float32)
    pm = pm.at[:Cin, off["bn0_g"]].set(params["bn0_g"][:, 0])
    pm = pm.at[:Cin, off["bn0_b"]].set(params["bn0_b"][:, 0])
    pm = pm.at[:Ch, off["w1"]:off["w1"] + Cin].set(params["w1"])
    pm = pm.at[:Ch, off["bn1_g"]].set(params["bn1_g"][:, 0])
    pm = pm.at[:Ch, off["bn1_b"]].set(params["bn1_b"][:, 0])
    pm = pm.at[:Ch, off["dw"]:off["dw"] + 9].set(params["dw"])
    pm = pm.at[:Ch, off["bn2_g"]].set(params["bn2_g"][:, 0])
    pm = pm.at[:Ch, off["bn2_b"]].set(params["bn2_b"][:, 0])
    pm = pm.at[:Ch, off["fc1"]:off["fc1"] + Cs].set(params["fc1"])
    pm = pm.at[:Ch, off["fc2"]:off["fc2"] + Cs].set(params["fc2"])
    pm = pm.at[:Cout, off["w3"]:off["w3"] + Ch].set(params["w3"])
    pm = pm.at[:Cout, off["bn3_g"]].set(params["bn3_g"][:, 0])
    pm = pm.at[:Cout, off["bn3_b"]].set(params["bn3_b"][:, 0])
    return pm


def mbconv_forward(x_nchw, params):
    """x_nchw: (B, Cin, H, W) f32 -> (B, Cout, H, W) f32 (MBConv, no downsample)."""
    B, Cin, H, W = x_nchw.shape
    Ch, Cin_w = params["w1"].shape
    Cout = params["w3"].shape[0]
    Cs = params["fc1"].shape[1]
    assert Cin_w == Cin
    assert Cout == Cin, "no-downsample MBConv residual requires Cin == Cout"
    assert Ch >= max(Cin, Cout)
    P = H * W
    BP = B * P

    # Channel-major (C, B*H*W) slabs: lane-dense for every in-kernel op + store.
    x = (x_nchw.astype(jnp.float32)
         .transpose(1, 0, 2, 3)
         .reshape(Cin, BP))
    pm = _pack_params(params, Cin, Ch, Cs, Cout)

    out = pl.pallas_call(
        functools.partial(mbconv_kernel, B=B, Cin=Cin, Ch=Ch, Cs=Cs,
                          Cout=Cout, H=H, W=W),
        out_shape=jax.ShapeDtypeStruct((Cout, BP), jnp.float32),
        input_output_aliases={0: 0},   # x slab (a wrapper temp) donated to output
    )(x, pm)
    return out.reshape(Cout, B, H, W).transpose(1, 0, 2, 3)


# ------------------------ pure-JAX reference (no Pallas) -----------------------

def mbconv_reference(x_nchw, params, gelu_fn):
    """Canonical two-pass-BN NCHW reference used to validate the kernel."""
    x = x_nchw.astype(jnp.float32)
    B, Cin, H, W = x.shape

    def bn(t, g, b):
        mean = jnp.mean(t, axis=(0, 2, 3), keepdims=True)
        var = jnp.mean((t - mean) ** 2, axis=(0, 2, 3), keepdims=True)
        return ((t - mean) * jax.lax.rsqrt(var + _EPS)
                * g[:, 0][None, :, None, None] + b[:, 0][None, :, None, None])

    h = bn(x, params["bn0_g"], params["bn0_b"])
    h = jnp.einsum("bchw,kc->bkhw", h, params["w1"])
    h = gelu_fn(bn(h, params["bn1_g"], params["bn1_b"]))

    hp = jnp.pad(h, ((0, 0), (0, 0), (1, 1), (1, 1)))
    acc = jnp.zeros_like(h)
    for ki in range(3):
        for kj in range(3):
            acc = acc + (hp[:, :, ki:ki + H, kj:kj + W]
                         * params["dw"][:, ki * 3 + kj][None, :, None, None])
    h = gelu_fn(bn(acc, params["bn2_g"], params["bn2_b"]))

    y = jnp.mean(h, axis=(2, 3))                     # (B, Ch)
    y = gelu_fn(y @ params["fc1"])                   # (B, Cs)
    y = jax.nn.sigmoid(y @ params["fc2"].T)          # (B, Ch)
    h = h * y[:, :, None, None]

    h = jnp.einsum("bkhw,ck->bchw", h, params["w3"])
    h = bn(h, params["bn3_g"], params["bn3_b"])
    return x + h


# --------------------------------- parameters ----------------------------------

def init_params(key, inp=4, oup=4, expansion=4):
    """Weights in (mostly) torch-native layouts; per-channel vectors as (C, 1)."""
    hidden = int(inp * expansion)
    squeeze = int(inp * 0.25)
    assert squeeze >= 1
    ks = jax.random.split(key, 12)

    def nrm(k, shape, scale=0.1):
        return (scale * jax.random.normal(k, shape)).astype(jnp.float32)

    return {
        # PreNorm BatchNorm2d(inp)
        "bn0_g": 1.0 + nrm(ks[0], (inp, 1)), "bn0_b": nrm(ks[1], (inp, 1)),
        # 1x1 expand conv: torch weight (hidden, inp, 1, 1) -> (hidden, inp)
        "w1": nrm(ks[2], (hidden, inp)),
        "bn1_g": 1.0 + nrm(ks[3], (hidden, 1)), "bn1_b": nrm(ks[4], (hidden, 1)),
        # depthwise 3x3 conv: torch weight (hidden, 1, 3, 3) -> (hidden, 9)
        "dw": nrm(ks[5], (hidden, 9)),
        "bn2_g": 1.0 + nrm(ks[6], (hidden, 1)), "bn2_b": nrm(ks[7], (hidden, 1)),
        # SE: Linear(hidden, squeeze).weight stored transposed -> (hidden, squeeze)
        #     Linear(squeeze, hidden).weight stored natively   -> (hidden, squeeze)
        "fc1": nrm(ks[8], (hidden, squeeze)),
        "fc2": nrm(ks[9], (hidden, squeeze)),
        # 1x1 project conv: torch weight (oup, hidden, 1, 1) -> (oup, hidden)
        "w3": nrm(ks[10], (oup, hidden)),
        "bn3_g": 1.0 + nrm(ks[11], (oup, 1)), "bn3_b": jnp.zeros((oup, 1), jnp.float32),
    }


if __name__ == "__main__":
    key = jax.random.PRNGKey(0)
    k_x, k_p = jax.random.split(key)

    B, Cin, H, W = 2, 4, 16, 16          # MBConv(inp=4, oup=4, image_size=16)
    x = jax.random.normal(k_x, (B, Cin, H, W), dtype=jnp.float32)
    params = init_params(k_p, inp=Cin, oup=Cin, expansion=4)

    # References first (kernel-identical tanh-GELU, and torch-exact erf-GELU).
    ref_tanh = jax.block_until_ready(mbconv_reference(x, params, _gelu))
    ref_erf = jax.block_until_ready(
        mbconv_reference(x, params, lambda t: jax.nn.gelu(t, approximate=False)))

    out = jax.block_until_ready(mbconv_forward(x, params))

    assert out.shape == (B, Cin, H, W)
    assert bool(jnp.all(jnp.isfinite(out)))
    err_tanh = float(jnp.max(jnp.abs(out - ref_tanh)))
    err_erf = float(jnp.max(jnp.abs(out - ref_erf)))
    assert err_tanh < 2e-3, f"kernel vs tanh-GELU reference: max abs err {err_tanh}"
    assert err_erf < 1e-2, f"kernel vs exact erf-GELU reference: max abs err {err_erf}"
    print("KERNEL_OK")
</pallas_src>

<mosaic_0001>
module attributes {stable_mosaic.version = 11 : i64} {
  func.func @mbconv_kernel(%arg0: memref<4x512xf32, #tpu.memory_space<vmem>>, %arg1: memref<16x39xf32, #tpu.memory_space<vmem>>, %arg2: memref<4x512xf32, #tpu.memory_space<vmem>>) attributes {dimension_semantics = [], scalar_prefetch = 0 : i64, scratch_operands = 0 : i64, tpu.core_type = #tpu.core_type<tc>} {
    %c0 = arith.constant 0 : index
    %c0_0 = arith.constant 0 : index
    %0 = vector.load %arg1[%c0, %c0_0] : memref<16x39xf32, #tpu.memory_space<vmem>>, vector<16x39xf32>
    %c0_1 = arith.constant 0 : index
    %c0_2 = arith.constant 0 : index
    %1 = vector.load %arg0[%c0_1, %c0_2] : memref<4x512xf32, #tpu.memory_space<vmem>>, vector<4x512xf32>
    %cst = arith.constant dense<0.000000e+00> : vector<4xf32>
    %2 = vector.multi_reduction <add>, %1, %cst [1] : vector<4x512xf32> to vector<4xf32>
    %3 = vector.shape_cast %2 : vector<4xf32> to vector<4x1xf32>
    %4 = arith.mulf %1, %1 : vector<4x512xf32>
    %cst_3 = arith.constant dense<0.000000e+00> : vector<4xf32>
    %5 = vector.multi_reduction <add>, %4, %cst_3 [1] : vector<4x512xf32> to vector<4xf32>
    %6 = vector.shape_cast %5 : vector<4xf32> to vector<4x1xf32>
    %cst_4 = arith.constant 5.120000e+02 : f32
    %7 = vector.broadcast %cst_4 : f32 to vector<4x1xf32>
    %8 = arith.divf %3, %7 : vector<4x1xf32>
    %cst_5 = arith.constant 5.120000e+02 : f32
    %9 = vector.broadcast %cst_5 : f32 to vector<4x1xf32>
    %10 = arith.divf %6, %9 : vector<4x1xf32>
    %11 = arith.mulf %8, %8 : vector<4x1xf32>
    %12 = arith.subf %10, %11 : vector<4x1xf32>
    %cst_6 = arith.constant 0.000000e+00 : f32
    %13 = vector.broadcast %cst_6 : f32 to vector<4x1xf32>
    %14 = arith.maximumf %12, %13 : vector<4x1xf32>
    %15 = vector.extract_strided_slice %0 {offsets = [0, 0], sizes = [4, 1], strides = [1, 1]} : vector<16x39xf32> to vector<4x1xf32>
    %cst_7 = arith.constant 9.99999974E-6 : f32
    %16 = vector.broadcast %cst_7 : f32 to vector<4x1xf32>
    %17 = arith.addf %14, %16 : vector<4x1xf32>
    %18 = math.rsqrt %17 : vector<4x1xf32>
    %19 = arith.mulf %15, %18 : vector<4x1xf32>
    %20 = vector.extract_strided_slice %0 {offsets = [0, 1], sizes = [4, 1], strides = [1, 1]} : vector<16x39xf32> to vector<4x1xf32>
    %21 = arith.mulf %8, %19 : vector<4x1xf32>
    %22 = arith.subf %20, %21 : vector<4x1xf32>
    %23 = vector.extract_strided_slice %0 {offsets = [0, 2], sizes = [16, 1], strides = [1, 1]} : vector<16x39xf32> to vector<16x1xf32>
    %24 = vector.extract_strided_slice %1 {offsets = [0, 0], sizes = [1, 512], strides = [1, 1]} : vector<4x512xf32> to vector<1x512xf32>
    %25 = vector.extract_strided_slice %19 {offsets = [0, 0], sizes = [1, 1], strides = [1, 1]} : vector<4x1xf32> to vector<1x1xf32>
    %26 = vector.broadcast %25 : vector<1x1xf32> to vector<16x1xf32>
    %27 = arith.mulf %23, %26 : vector<16x1xf32>
    %28 = vector.broadcast %24 : vector<1x512xf32> to vector<16x512xf32>
    %29 = vector.broadcast %27 : vector<16x1xf32> to vector<16x512xf32>
    %30 = arith.mulf %28, %29 : vector<16x512xf32>
    %31 = vector.extract_strided_slice %22 {offsets = [0, 0], sizes = [1, 1], strides = [1, 1]} : vector<4x1xf32> to vector<1x1xf32>
    %32 = vector.broadcast %31 : vector<1x1xf32> to vector<16x1xf32>
    %33 = arith.mulf %23, %32 : vector<16x1xf32>
    %34 = vector.extract_strided_slice %0 {offsets = [0, 3], sizes = [16, 1], strides = [1, 1]} : vector<16x39xf32> to vector<16x1xf32>
    %35 = vector.extract_strided_slice %1 {offsets = [1, 0], sizes = [1, 512], strides = [1, 1]} : vector<4x512xf32> to vector<1x512xf32>
    %36 = vector.extract_strided_slice %19 {offsets = [1, 0], sizes = [1, 1], strides = [1, 1]} : vector<4x1xf32> to vector<1x1xf32>
    %37 = vector.broadcast %36 : vector<1x1xf32> to vector<16x1xf32>
    %38 = arith.mulf %34, %37 : vector<16x1xf32>
    %39 = vector.broadcast %35 : vector<1x512xf32> to vector<16x512xf32>
    %40 = vector.broadcast %38 : vector<16x1xf32> to vector<16x512xf32>
    %41 = arith.mulf %39, %40 : vector<16x512xf32>
    %42 = vector.extract_strided_slice %22 {offsets = [1, 0], sizes = [1, 1], strides = [1, 1]} : vector<4x1xf32> to vector<1x1xf32>
    %43 = vector.broadcast %42 : vector<1x1xf32> to vector<16x1xf32>
    %44 = arith.mulf %34, %43 : vector<16x1xf32>
    %45 = vector.extract_strided_slice %0 {offsets = [0, 4], sizes = [16, 1], strides = [1, 1]} : vector<16x39xf32> to vector<16x1xf32>
    %46 = vector.extract_strided_slice %1 {offsets = [2, 0], sizes = [1, 512], strides = [1, 1]} : vector<4x512xf32> to vector<1x512xf32>
    %47 = vector.extract_strided_slice %19 {offsets = [2, 0], sizes = [1, 1], strides = [1, 1]} : vector<4x1xf32> to vector<1x1xf32>
    %48 = vector.broadcast %47 : vector<1x1xf32> to vector<16x1xf32>
    %49 = arith.mulf %45, %48 : vector<16x1xf32>
    %50 = vector.broadcast %46 : vector<1x512xf32> to vector<16x512xf32>
    %51 = vector.broadcast %49 : vector<16x1xf32> to vector<16x512xf32>
    %52 = arith.mulf %50, %51 : vector<16x512xf32>
    %53 = vector.extract_strided_slice %22 {offsets = [2, 0], sizes = [1, 1], strides = [1, 1]} : vector<4x1xf32> to vector<1x1xf32>
    %54 = vector.broadcast %53 : vector<1x1xf32> to vector<16x1xf32>
    %55 = arith.mulf %45, %54 : vector<16x1xf32>
    %56 = arith.addf %30, %52 : vector<16x512xf32>
    %57 = arith.addf %33, %55 : vector<16x1xf32>
    %58 = vector.extract_strided_slice %0 {offsets = [0, 5], sizes = [16, 1], strides = [1, 1]} : vector<16x39xf32> to vector<16x1xf32>
    %59 = vector.extract_strided_slice %1 {offsets = [3, 0], sizes = [1, 512], strides = [1, 1]} : vector<4x512xf32> to vector<1x512xf32>
    %60 = vector.extract_strided_slice %19 {offsets = [3, 0], sizes = [1, 1], strides = [1, 1]} : vector<4x1xf32> to vector<1x1xf32>
    %61 = vector.broadcast %60 : vector<1x1xf32> to vector<16x1xf32>
    %62 = arith.mulf %58, %61 : vector<16x1xf32>
    %63 = vector.broadcast %59 : vector<1x512xf32> to vector<16x512xf32>
    %64 = vector.broadcast %62 : vector<16x1xf32> to vector<16x512xf32>
    %65 = arith.mulf %63, %64 : vector<16x512xf32>
    %66 = vector.extract_strided_slice %22 {offsets = [3, 0], sizes = [1, 1], strides = [1, 1]} : vector<4x1xf32> to vector<1x1xf32>
    %67 = vector.broadcast %66 : vector<1x1xf32> to vector<16x1xf32>
    %68 = arith.mulf %58, %67 : vector<16x1xf32>
    %69 = arith.addf %41, %65 : vector<16x512xf32>
    %70 = arith.addf %44, %68 : vector<16x1xf32>
    %71 = arith.addf %56, %69 : vector<16x512xf32>
    %72 = arith.addf %57, %70 : vector<16x1xf32>
    %73 = vector.broadcast %72 : vector<16x1xf32> to vector<16x512xf32>
    %74 = arith.addf %71, %73 : vector<16x512xf32>
    %75 = vector.extract_strided_slice %0 {offsets = [0, 6], sizes = [16, 1], strides = [1, 1]} : vector<16x39xf32> to vector<16x1xf32>
    %76 = vector.extract_strided_slice %0 {offsets = [0, 7], sizes = [16, 1], strides = [1, 1]} : vector<16x39xf32> to vector<16x1xf32>
    %cst_8 = arith.constant dense<0.000000e+00> : vector<16xf32>
    %77 = vector.multi_reduction <add>, %74, %cst_8 [1] : vector<16x512xf32> to vector<16xf32>
    %78 = vector.shape_cast %77 : vector<16xf32> to vector<16x1xf32>
    %79 = arith.mulf %74, %74 : vector<16x512xf32>
    %cst_9 = arith.constant dense<0.000000e+00> : vector<16xf32>
    %80 = vector.multi_reduction <add>, %79, %cst_9 [1] : vector<16x512xf32> to vector<16xf32>
    %81 = vector.shape_cast %80 : vector<16xf32> to vector<16x1xf32>
    %cst_10 = arith.constant 5.120000e+02 : f32
    %82 = vector.broadcast %cst_10 : f32 to vector<16x1xf32>
    %83 = arith.divf %78, %82 : vector<16x1xf32>
    %cst_11 = arith.constant 5.120000e+02 : f32
    %84 = vector.broadcast %cst_11 : f32 to vector<16x1xf32>
    %85 = arith.divf %81, %84 : vector<16x1xf32>
    %86 = arith.mulf %83, %83 : vector<16x1xf32>
    %87 = arith.subf %85, %86 : vector<16x1xf32>
    %cst_12 = arith.constant 0.000000e+00 : f32
    %88 = vector.broadcast %cst_12 : f32 to vector<16x1xf32>
    %89 = arith.maximumf %87, %88 : vector<16x1xf32>
    %cst_13 = arith.constant 9.99999974E-6 : f32
    %90 = vector.broadcast %cst_13 : f32 to vector<16x1xf32>
    %91 = arith.addf %89, %90 : vector<16x1xf32>
    %92 = math.rsqrt %91 : vector<16x1xf32>
    %93 = arith.mulf %75, %92 : vector<16x1xf32>
    %94 = arith.mulf %83, %93 : vector<16x1xf32>
    %95 = arith.subf %76, %94 : vector<16x1xf32>
    %96 = vector.broadcast %93 : vector<16x1xf32> to vector<16x512xf32>
    %97 = arith.mulf %74, %96 : vector<16x512xf32>
    %98 = vector.broadcast %95 : vector<16x1xf32> to vector<16x512xf32>
    %99 = arith.addf %97, %98 : vector<16x512xf32>
    %cst_14 = arith.constant 5.000000e-01 : f32
    %100 = vector.broadcast %cst_14 : f32 to vector<16x512xf32>
    %101 = arith.mulf %100, %99 : vector<16x512xf32>
    %102 = arith.mulf %99, %99 : vector<16x512xf32>
    %103 = arith.mulf %102, %99 : vector<16x512xf32>
    %cst_15 = arith.constant 4.471500e-02 : f32
    %104 = vector.broadcast %cst_15 : f32 to vector<16x512xf32>
    %105 = arith.mulf %104, %103 : vector<16x512xf32>
    %106 = arith.addf %99, %105 : vector<16x512xf32>
    %cst_16 = arith.constant 0.797884583 : f32
    %107 = vector.broadcast %cst_16 : f32 to vector<16x512xf32>
    %108 = arith.mulf %107, %106 : vector<16x512xf32>
    %109 = math.tanh %108 : vector<16x512xf32>
    %cst_17 = arith.constant 1.000000e+00 : f32
    %110 = vector.broadcast %cst_17 : f32 to vector<16x512xf32>
    %111 = arith.addf %110, %109 : vector<16x512xf32>
    %112 = arith.mulf %101, %111 : vector<16x512xf32>
    %113 = tpu.iota {dimensions = array<i32: 1>} : vector<1x512xi32>
    %c255_i32 = arith.constant 255 : i32
    %114 = vector.broadcast %c255_i32 : i32 to vector<1x512xi32>
    %115 = arith.andi %113, %114 : vector<1x512xi32>
    %c15_i32 = arith.constant 15 : i32
    %116 = vector.broadcast %c15_i32 : i32 to vector<1x512xi32>
    %117 = arith.andi %115, %116 : vector<1x512xi32>
    %c4_i32 = arith.constant 4 : i32
    %118 = vector.broadcast %c4_i32 : i32 to vector<1x512xi32>
    %119 = arith.shrsi %115, %118 : vector<1x512xi32>
    %c1_i32 = arith.constant 1 : i32
    %120 = vector.broadcast %c1_i32 : i32 to vector<1x512xi32>
    %121 = arith.cmpi sge, %119, %120 : vector<1x512xi32>
    %c14_i32 = arith.constant 14 : i32
    %122 = vector.broadcast %c14_i32 : i32 to vector<1x512xi32>
    %123 = arith.cmpi sle, %119, %122 : vector<1x512xi32>
    %c1_i32_18 = arith.constant 1 : i32
    %124 = vector.broadcast %c1_i32_18 : i32 to vector<1x512xi32>
    %125 = arith.cmpi sge, %117, %124 : vector<1x512xi32>
    %c14_i32_19 = arith.constant 14 : i32
    %126 = vector.broadcast %c14_i32_19 : i32 to vector<1x512xi32>
    %127 = arith.cmpi sle, %117, %126 : vector<1x512xi32>
    %128 = vector.extract_strided_slice %0 {offsets = [0, 8], sizes = [16, 1], strides = [1, 1]} : vector<16x39xf32> to vector<16x1xf32>
    %129 = vector.extract_strided_slice %0 {offsets = [0, 9], sizes = [16, 1], strides = [1, 1]} : vector<16x39xf32> to vector<16x1xf32>
    %130 = vector.extract_strided_slice %0 {offsets = [0, 10], sizes = [16, 1], strides = [1, 1]} : vector<16x39xf32> to vector<16x1xf32>
    %131 = vector.extract_strided_slice %0 {offsets = [0, 11], sizes = [16, 1], strides = [1, 1]} : vector<16x39xf32> to vector<16x1xf32>
    %132 = vector.extract_strided_slice %0 {offsets = [0, 12], sizes = [16, 1], strides = [1, 1]} : vector<16x39xf32> to vector<16x1xf32>
    %133 = vector.extract_strided_slice %0 {offsets = [0, 13], sizes = [16, 1], strides = [1, 1]} : vector<16x39xf32> to vector<16x1xf32>
    %134 = vector.extract_strided_slice %0 {offsets = [0, 14], sizes = [16, 1], strides = [1, 1]} : vector<16x39xf32> to vector<16x1xf32>
    %135 = vector.extract_strided_slice %0 {offsets = [0, 15], sizes = [16, 1], strides = [1, 1]} : vector<16x39xf32> to vector<16x1xf32>
    %136 = vector.extract_strided_slice %0 {offsets = [0, 16], sizes = [16, 1], strides = [1, 1]} : vector<16x39xf32> to vector<16x1xf32>
    %137 = vector.broadcast %132 : vector<16x1xf32> to vector<16x512xf32>
    %138 = arith.mulf %112, %137 : vector<16x512xf32>
    %c17_i32 = arith.constant 17 : i32
    %139 = tpu.dynamic_rotate %112 by %c17_i32 dim 1 : vector<16x512xf32>, i32 -> vector<16x512xf32>
    %140 = arith.andi %121, %125 : vector<1x512xi1>
    %cst_20 = arith.constant 0.000000e+00 : f32
    %141 = vector.shape_cast %140 : vector<1x512xi1> to vector<1x512xi1>
    %142 = vector.broadcast %141 : vector<1x512xi1> to vector<16x512xi1>
    %143 = vector.broadcast %cst_20 : f32 to vector<16x512xf32>
    %144 = arith.select %142, %139, %143 : vector<16x512xi1>, vector<16x512xf32>
    %145 = vector.broadcast %128 : vector<16x1xf32> to vector<16x512xf32>
    %146 = arith.mulf %144, %145 : vector<16x512xf32>
    %147 = arith.addf %138, %146 : vector<16x512xf32>
    %c16_i32 = arith.constant 16 : i32
    %148 = tpu.dynamic_rotate %112 by %c16_i32 dim 1 : vector<16x512xf32>, i32 -> vector<16x512xf32>
    %cst_21 = arith.constant 0.000000e+00 : f32
    %149 = vector.shape_cast %121 : vector<1x512xi1> to vector<1x512xi1>
    %150 = vector.broadcast %149 : vector<1x512xi1> to vector<16x512xi1>
    %151 = vector.broadcast %cst_21 : f32 to vector<16x512xf32>
    %152 = arith.select %150, %148, %151 : vector<16x512xi1>, vector<16x512xf32>
    %153 = vector.broadcast %129 : vector<16x1xf32> to vector<16x512xf32>
    %154 = arith.mulf %152, %153 : vector<16x512xf32>
    %c15_i32_22 = arith.constant 15 : i32
    %155 = tpu.dynamic_rotate %112 by %c15_i32_22 dim 1 : vector<16x512xf32>, i32 -> vector<16x512xf32>
    %156 = arith.andi %121, %127 : vector<1x512xi1>
    %cst_23 = arith.constant 0.000000e+00 : f32
    %157 = vector.shape_cast %156 : vector<1x512xi1> to vector<1x512xi1>
    %158 = vector.broadcast %157 : vector<1x512xi1> to vector<16x512xi1>
    %159 = vector.broadcast %cst_23 : f32 to vector<16x512xf32>
    %160 = arith.select %158, %155, %159 : vector<16x512xi1>, vector<16x512xf32>
    %161 = vector.broadcast %130 : vector<16x1xf32> to vector<16x512xf32>
    %162 = arith.mulf %160, %161 : vector<16x512xf32>
    %163 = arith.addf %147, %162 : vector<16x512xf32>
    %c1_i32_24 = arith.constant 1 : i32
    %164 = tpu.dynamic_rotate %112 by %c1_i32_24 dim 1 : vector<16x512xf32>, i32 -> vector<16x512xf32>
    %cst_25 = arith.constant 0.000000e+00 : f32
    %165 = vector.shape_cast %125 : vector<1x512xi1> to vector<1x512xi1>
    %166 = vector.broadcast %165 : vector<1x512xi1> to vector<16x512xi1>
    %167 = vector.broadcast %cst_25 : f32 to vector<16x512xf32>
    %168 = arith.select %166, %164, %167 : vector<16x512xi1>, vector<16x512xf32>
    %169 = vector.broadcast %131 : vector<16x1xf32> to vector<16x512xf32>
    %170 = arith.mulf %168, %169 : vector<16x512xf32>
    %171 = arith.addf %154, %170 : vector<16x512xf32>
    %c511_i32 = arith.constant 511 : i32
    %172 = tpu.dynamic_rotate %112 by %c511_i32 dim 1 : vector<16x512xf32>, i32 -> vector<16x512xf32>
    %cst_26 = arith.constant 0.000000e+00 : f32
    %173 = vector.shape_cast %127 : vector<1x512xi1> to vector<1x512xi1>
    %174 = vector.broadcast %173 : vector<1x512xi1> to vector<16x512xi1>
    %175 = vector.broadcast %cst_26 : f32 to vector<16x512xf32>
    %176 = arith.select %174, %172, %175 : vector<16x512xi1>, vector<16x512xf32>
    %177 = vector.broadcast %133 : vector<16x1xf32> to vector<16x512xf32>
    %178 = arith.mulf %176, %177 : vector<16x512xf32>
    %179 = arith.addf %163, %178 : vector<16x512xf32>
    %c497_i32 = arith.constant 497 : i32
    %180 = tpu.dynamic_rotate %112 by %c497_i32 dim 1 : vector<16x512xf32>, i32 -> vector<16x512xf32>
    %181 = arith.andi %123, %125 : vector<1x512xi1>
    %cst_27 = arith.constant 0.000000e+00 : f32
    %182 = vector.shape_cast %181 : vector<1x512xi1> to vector<1x512xi1>
    %183 = vector.broadcast %182 : vector<1x512xi1> to vector<16x512xi1>
    %184 = vector.broadcast %cst_27 : f32 to vector<16x512xf32>
    %185 = arith.select %183, %180, %184 : vector<16x512xi1>, vector<16x512xf32>
    %186 = vector.broadcast %134 : vector<16x1xf32> to vector<16x512xf32>
    %187 = arith.mulf %185, %186 : vector<16x512xf32>
    %188 = arith.addf %171, %187 : vector<16x512xf32>
    %c496_i32 = arith.constant 496 : i32
    %189 = tpu.dynamic_rotate %112 by %c496_i32 dim 1 : vector<16x512xf32>, i32 -> vector<16x512xf32>
    %cst_28 = arith.constant 0.000000e+00 : f32
    %190 = vector.shape_cast %123 : vector<1x512xi1> to vector<1x512xi1>
    %191 = vector.broadcast %190 : vector<1x512xi1> to vector<16x512xi1>
    %192 = vector.broadcast %cst_28 : f32 to vector<16x512xf32>
    %193 = arith.select %191, %189, %192 : vector<16x512xi1>, vector<16x512xf32>
    %194 = vector.broadcast %135 : vector<16x1xf32> to vector<16x512xf32>
    %195 = arith.mulf %193, %194 : vector<16x512xf32>
    %196 = arith.addf %179, %195 : vector<16x512xf32>
    %c495_i32 = arith.constant 495 : i32
    %197 = tpu.dynamic_rotate %112 by %c495_i32 dim 1 : vector<16x512xf32>, i32 -> vector<16x512xf32>
    %198 = arith.andi %123, %127 : vector<1x512xi1>
    %cst_29 = arith.constant 0.000000e+00 : f32
    %199 = vector.shape_cast %198 : vector<1x512xi1> to vector<1x512xi1>
    %200 = vector.broadcast %199 : vector<1x512xi1> to vector<16x512xi1>
    %201 = vector.broadcast %cst_29 : f32 to vector<16x512xf32>
    %202 = arith.select %200, %197, %201 : vector<16x512xi1>, vector<16x512xf32>
    %203 = vector.broadcast %136 : vector<16x1xf32> to vector<16x512xf32>
    %204 = arith.mulf %202, %203 : vector<16x512xf32>
    %205 = arith.addf %188, %204 : vector<16x512xf32>
    %206 = arith.addf %196, %205 : vector<16x512xf32>
    %207 = vector.extract_strided_slice %0 {offsets = [0, 17], sizes = [16, 1], strides = [1, 1]} : vector<16x39xf32> to vector<16x1xf32>
    %208 = vector.extract_strided_slice %0 {offsets = [0, 18], sizes = [16, 1], strides = [1, 1]} : vector<16x39xf32> to vector<16x1xf32>
    %cst_30 = arith.constant dense<0.000000e+00> : vector<16xf32>
    %209 = vector.multi_reduction <add>, %206, %cst_30 [1] : vector<16x512xf32> to vector<16xf32>
    %210 = vector.shape_cast %209 : vector<16xf32> to vector<16x1xf32>
    %211 = arith.mulf %206, %206 : vector<16x512xf32>
    %cst_31 = arith.constant dense<0.000000e+00> : vector<16xf32>
    %212 = vector.multi_reduction <add>, %211, %cst_31 [1] : vector<16x512xf32> to vector<16xf32>
    %213 = vector.shape_cast %212 : vector<16xf32> to vector<16x1xf32>
    %cst_32 = arith.constant 5.120000e+02 : f32
    %214 = vector.broadcast %cst_32 : f32 to vector<16x1xf32>
    %215 = arith.divf %210, %214 : vector<16x1xf32>
    %cst_33 = arith.constant 5.120000e+02 : f32
    %216 = vector.broadcast %cst_33 : f32 to vector<16x1xf32>
    %217 = arith.divf %213, %216 : vector<16x1xf32>
    %218 = arith.mulf %215, %215 : vector<16x1xf32>
    %219 = arith.subf %217, %218 : vector<16x1xf32>
    %cst_34 = arith.constant 0.000000e+00 : f32
    %220 = vector.broadcast %cst_34 : f32 to vector<16x1xf32>
    %221 = arith.maximumf %219, %220 : vector<16x1xf32>
    %cst_35 = arith.constant 9.99999974E-6 : f32
    %222 = vector.broadcast %cst_35 : f32 to vector<16x1xf32>
    %223 = arith.addf %221, %222 : vector<16x1xf32>
    %224 = math.rsqrt %223 : vector<16x1xf32>
    %225 = arith.mulf %207, %224 : vector<16x1xf32>
    %226 = arith.mulf %215, %225 : vector<16x1xf32>
    %227 = arith.subf %208, %226 : vector<16x1xf32>
    %228 = vector.broadcast %225 : vector<16x1xf32> to vector<16x512xf32>
    %229 = arith.mulf %206, %228 : vector<16x512xf32>
    %230 = vector.broadcast %227 : vector<16x1xf32> to vector<16x512xf32>
    %231 = arith.addf %229, %230 : vector<16x512xf32>
    %cst_36 = arith.constant 5.000000e-01 : f32
    %232 = vector.broadcast %cst_36 : f32 to vector<16x512xf32>
    %233 = arith.mulf %232, %231 : vector<16x512xf32>
    %234 = arith.mulf %231, %231 : vector<16x512xf32>
    %235 = arith.mulf %234, %231 : vector<16x512xf32>
    %cst_37 = arith.constant 4.471500e-02 : f32
    %236 = vector.broadcast %cst_37 : f32 to vector<16x512xf32>
    %237 = arith.mulf %236, %235 : vector<16x512xf32>
    %238 = arith.addf %231, %237 : vector<16x512xf32>
    %cst_38 = arith.constant 0.797884583 : f32
    %239 = vector.broadcast %cst_38 : f32 to vector<16x512xf32>
    %240 = arith.mulf %239, %238 : vector<16x512xf32>
    %241 = math.tanh %240 : vector<16x512xf32>
    %cst_39 = arith.constant 1.000000e+00 : f32
    %242 = vector.broadcast %cst_39 : f32 to vector<16x512xf32>
    %243 = arith.addf %242, %241 : vector<16x512xf32>
    %244 = arith.mulf %233, %243 : vector<16x512xf32>
    %245 = vector.extract_strided_slice %0 {offsets = [0, 19], sizes = [16, 1], strides = [1, 1]} : vector<16x39xf32> to vector<16x1xf32>
    %246 = vector.extract_strided_slice %0 {offsets = [0, 20], sizes = [16, 1], strides = [1, 1]} : vector<16x39xf32> to vector<16x1xf32>
    %247 = vector.extract_strided_slice %244 {offsets = [0, 0], sizes = [16, 256], strides = [1, 1]} : vector<16x512xf32> to vector<16x256xf32>
    %cst_40 = arith.constant dense<0.000000e+00> : vector<16xf32>
    %248 = vector.multi_reduction <add>, %247, %cst_40 [1] : vector<16x256xf32> to vector<16xf32>
    %249 = vector.shape_cast %248 : vector<16xf32> to vector<16x1xf32>
    %cst_41 = arith.constant 3.906250e-03 : f32
    %250 = vector.broadcast %cst_41 : f32 to vector<16x1xf32>
    %251 = arith.mulf %249, %250 : vector<16x1xf32>
    %252 = arith.mulf %251, %245 : vector<16x1xf32>
    %cst_42 = arith.constant dense<0.000000e+00> : vector<1xf32>
    %253 = vector.multi_reduction <add>, %252, %cst_42 [0] : vector<16x1xf32> to vector<1xf32>
    %254 = vector.shape_cast %253 : vector<1xf32> to vector<1x1xf32>
    %cst_43 = arith.constant 5.000000e-01 : f32
    %255 = vector.broadcast %cst_43 : f32 to vector<1x1xf32>
    %256 = arith.mulf %255, %254 : vector<1x1xf32>
    %257 = arith.mulf %254, %254 : vector<1x1xf32>
    %258 = arith.mulf %257, %254 : vector<1x1xf32>
    %cst_44 = arith.constant 4.471500e-02 : f32
    %259 = vector.broadcast %cst_44 : f32 to vector<1x1xf32>
    %260 = arith.mulf %259, %258 : vector<1x1xf32>
    %261 = arith.addf %254, %260 : vector<1x1xf32>
    %cst_45 = arith.constant 0.797884583 : f32
    %262 = vector.broadcast %cst_45 : f32 to vector<1x1xf32>
    %263 = arith.mulf %262, %261 : vector<1x1xf32>
    %264 = math.tanh %263 : vector<1x1xf32>
    %cst_46 = arith.constant 1.000000e+00 : f32
    %265 = vector.broadcast %cst_46 : f32 to vector<1x1xf32>
    %266 = arith.addf %265, %264 : vector<1x1xf32>
    %267 = arith.mulf %256, %266 : vector<1x1xf32>
    %268 = vector.broadcast %267 : vector<1x1xf32> to vector<16x1xf32>
    %269 = arith.mulf %268, %246 : vector<16x1xf32>
    %270 = arith.negf %269 : vector<16x1xf32>
    %271 = math.exp %270 : vector<16x1xf32>
    %cst_47 = arith.constant 1.000000e+00 : f32
    %272 = vector.broadcast %cst_47 : f32 to vector<16x1xf32>
    %273 = arith.addf %272, %271 : vector<16x1xf32>
    %274 = arith.divf %272, %273 : vector<16x1xf32>
    %275 = vector.broadcast %274 : vector<16x1xf32> to vector<16x256xf32>
    %276 = arith.mulf %247, %275 : vector<16x256xf32>
    %277 = vector.extract_strided_slice %244 {offsets = [0, 256], sizes = [16, 256], strides = [1, 1]} : vector<16x512xf32> to vector<16x256xf32>
    %cst_48 = arith.constant dense<0.000000e+00> : vector<16xf32>
    %278 = vector.multi_reduction <add>, %277, %cst_48 [1] : vector<16x256xf32> to vector<16xf32>
    %279 = vector.shape_cast %278 : vector<16xf32> to vector<16x1xf32>
    %cst_49 = arith.constant 3.906250e-03 : f32
    %280 = vector.broadcast %cst_49 : f32 to vector<16x1xf32>
    %281 = arith.mulf %279, %280 : vector<16x1xf32>
    %282 = arith.mulf %281, %245 : vector<16x1xf32>
    %cst_50 = arith.constant dense<0.000000e+00> : vector<1xf32>
    %283 = vector.multi_reduction <add>, %282, %cst_50 [0] : vector<16x1xf32> to vector<1xf32>
    %284 = vector.shape_cast %283 : vector<1xf32> to vector<1x1xf32>
    %cst_51 = arith.constant 5.000000e-01 : f32
    %285 = vector.broadcast %cst_51 : f32 to vector<1x1xf32>
    %286 = arith.mulf %285, %284 : vector<1x1xf32>
    %287 = arith.mulf %284, %284 : vector<1x1xf32>
    %288 = arith.mulf %287, %284 : vector<1x1xf32>
    %cst_52 = arith.constant 4.471500e-02 : f32
    %289 = vector.broadcast %cst_52 : f32 to vector<1x1xf32>
    %290 = arith.mulf %289, %288 : vector<1x1xf32>
    %291 = arith.addf %284, %290 : vector<1x1xf32>
    %cst_53 = arith.constant 0.797884583 : f32
    %292 = vector.broadcast %cst_53 : f32 to vector<1x1xf32>
    %293 = arith.mulf %292, %291 : vector<1x1xf32>
    %294 = math.tanh %293 : vector<1x1xf32>
    %cst_54 = arith.constant 1.000000e+00 : f32
    %295 = vector.broadcast %cst_54 : f32 to vector<1x1xf32>
    %296 = arith.addf %295, %294 : vector<1x1xf32>
    %297 = arith.mulf %286, %296 : vector<1x1xf32>
    %298 = vector.broadcast %297 : vector<1x1xf32> to vector<16x1xf32>
    %299 = arith.mulf %298, %246 : vector<16x1xf32>
    %300 = arith.negf %299 : vector<16x1xf32>
    %301 = math.exp %300 : vector<16x1xf32>
    %cst_55 = arith.constant 1.000000e+00 : f32
    %302 = vector.broadcast %cst_55 : f32 to vector<16x1xf32>
    %303 = arith.addf %302, %301 : vector<16x1xf32>
    %304 = arith.divf %302, %303 : vector<16x1xf32>
    %305 = vector.broadcast %304 : vector<16x1xf32> to vector<16x256xf32>
    %306 = arith.mulf %277, %305 : vector<16x256xf32>
    %307 = tpu.concatenate %276, %306 in 1 : vector<16x256xf32>, vector<16x256xf32> -> vector<16x512xf32>
    %308 = vector.extract_strided_slice %0 {offsets = [0, 21], sizes = [4, 1], strides = [1, 1]} : vector<16x39xf32> to vector<4x1xf32>
    %309 = vector.extract_strided_slice %307 {offsets = [0, 0], sizes = [1, 512], strides = [1, 1]} : vector<16x512xf32> to vector<1x512xf32>
    %310 = vector.broadcast %309 : vector<1x512xf32> to vector<4x512xf32>
    %311 = vector.broadcast %308 : vector<4x1xf32> to vector<4x512xf32>
    %312 = arith.mulf %310, %311 : vector<4x512xf32>
    %313 = vector.extract_strided_slice %0 {offsets = [0, 22], sizes = [4, 1], strides = [1, 1]} : vector<16x39xf32> to vector<4x1xf32>
    %314 = vector.extract_strided_slice %307 {offsets = [1, 0], sizes = [1, 512], strides = [1, 1]} : vector<16x512xf32> to vector<1x512xf32>
    %315 = vector.broadcast %314 : vector<1x512xf32> to vector<4x512xf32>
    %316 = vector.broadcast %313 : vector<4x1xf32> to vector<4x512xf32>
    %317 = arith.mulf %315, %316 : vector<4x512xf32>
    %318 = vector.extract_strided_slice %0 {offsets = [0, 23], sizes = [4, 1], strides = [1, 1]} : vector<16x39xf32> to vector<4x1xf32>
    %319 = vector.extract_strided_slice %307 {offsets = [2, 0], sizes = [1, 512], strides = [1, 1]} : vector<16x512xf32> to vector<1x512xf32>
    %320 = vector.broadcast %319 : vector<1x512xf32> to vector<4x512xf32>
    %321 = vector.broadcast %318 : vector<4x1xf32> to vector<4x512xf32>
    %322 = arith.mulf %320, %321 : vector<4x512xf32>
    %323 = arith.addf %312, %322 : vector<4x512xf32>
    %324 = vector.extract_strided_slice %0 {offsets = [0, 24], sizes = [4, 1], strides = [1, 1]} : vector<16x39xf32> to vector<4x1xf32>
    %325 = vector.extract_strided_slice %307 {offsets = [3, 0], sizes = [1, 512], strides = [1, 1]} : vector<16x512xf32> to vector<1x512xf32>
    %326 = vector.broadcast %325 : vector<1x512xf32> to vector<4x512xf32>
    %327 = vector.broadcast %324 : vector<4x1xf32> to vector<4x512xf32>
    %328 = arith.mulf %326, %327 : vector<4x512xf32>
    %329 = arith.addf %317, %328 : vector<4x512xf32>
    %330 = vector.extract_strided_slice %0 {offsets = [0, 25], sizes = [4, 1], strides = [1, 1]} : vector<16x39xf32> to vector<4x1xf32>
    %331 = vector.extract_strided_slice %307 {offsets = [4, 0], sizes = [1, 512], strides = [1, 1]} : vector<16x512xf32> to vector<1x512xf32>
    %332 = vector.broadcast %331 : vector<1x512xf32> to vector<4x512xf32>
    %333 = vector.broadcast %330 : vector<4x1xf32> to vector<4x512xf32>
    %334 = arith.mulf %332, %333 : vector<4x512xf32>
    %335 = arith.addf %323, %334 : vector<4x512xf32>
    %336 = vector.extract_strided_slice %0 {offsets = [0, 26], sizes = [4, 1], strides = [1, 1]} : vector<16x39xf32> to vector<4x1xf32>
    %337 = vector.extract_strided_slice %307 {offsets = [5, 0], sizes = [1, 512], strides = [1, 1]} : vector<16x512xf32> to vector<1x512xf32>
    %338 = vector.broadcast %337 : vector<1x512xf32> to vector<4x512xf32>
    %339 = vector.broadcast %336 : vector<4x1xf32> to vector<4x512xf32>
    %340 = arith.mulf %338, %339 : vector<4x512xf32>
    %341 = arith.addf %329, %340 : vector<4x512xf32>
    %342 = vector.extract_strided_slice %0 {offsets = [0, 27], sizes = [4, 1], strides = [1, 1]} : vector<16x39xf32> to vector<4x1xf32>
    %343 = vector.extract_strided_slice %307 {offsets = [6, 0], sizes = [1, 512], strides = [1, 1]} : vector<16x512xf32> to vector<1x512xf32>
    %344 = vector.broadcast %343 : vector<1x512xf32> to vector<4x512xf32>
    %345 = vector.broadcast %342 : vector<4x1xf32> to vector<4x512xf32>
    %346 = arith.mulf %344, %345 : vector<4x512xf32>
    %347 = arith.addf %335, %346 : vector<4x512xf32>
    %348 = vector.extract_strided_slice %0 {offsets = [0, 28], sizes = [4, 1], strides = [1, 1]} : vector<16x39xf32> to vector<4x1xf32>
    %349 = vector.extract_strided_slice %307 {offsets = [7, 0], sizes = [1, 512], strides = [1, 1]} : vector<16x512xf32> to vector<1x512xf32>
    %350 = vector.broadcast %349 : vector<1x512xf32> to vector<4x512xf32>
    %351 = vector.broadcast %348 : vector<4x1xf32> to vector<4x512xf32>
    %352 = arith.mulf %350, %351 : vector<4x512xf32>
    %353 = arith.addf %341, %352 : vector<4x512xf32>
    %354 = vector.extract_strided_slice %0 {offsets = [0, 29], sizes = [4, 1], strides = [1, 1]} : vector<16x39xf32> to vector<4x1xf32>
    %355 = vector.extract_strided_slice %307 {offsets = [8, 0], sizes = [1, 512], strides = [1, 1]} : vector<16x512xf32> to vector<1x512xf32>
    %356 = vector.broadcast %355 : vector<1x512xf32> to vector<4x512xf32>
    %357 = vector.broadcast %354 : vector<4x1xf32> to vector<4x512xf32>
    %358 = arith.mulf %356, %357 : vector<4x512xf32>
    %359 = arith.addf %347, %358 : vector<4x512xf32>
    %360 = vector.extract_strided_slice %0 {offsets = [0, 30], sizes = [4, 1], strides = [1, 1]} : vector<16x39xf32> to vector<4x1xf32>
    %361 = vector.extract_strided_slice %307 {offsets = [9, 0], sizes = [1, 512], strides = [1, 1]} : vector<16x512xf32> to vector<1x512xf32>
    %362 = vector.broadcast %361 : vector<1x512xf32> to vector<4x512xf32>
    %363 = vector.broadcast %360 : vector<4x1xf32> to vector<4x512xf32>
    %364 = arith.mulf %362, %363 : vector<4x512xf32>
    %365 = arith.addf %353, %364 : vector<4x512xf32>
    %366 = vector.extract_strided_slice %0 {offsets = [0, 31], sizes = [4, 1], strides = [1, 1]} : vector<16x39xf32> to vector<4x1xf32>
    %367 = vector.extract_strided_slice %307 {offsets = [10, 0], sizes = [1, 512], strides = [1, 1]} : vector<16x512xf32> to vector<1x512xf32>
    %368 = vector.broadcast %367 : vector<1x512xf32> to vector<4x512xf32>
    %369 = vector.broadcast %366 : vector<4x1xf32> to vector<4x512xf32>
    %370 = arith.mulf %368, %369 : vector<4x512xf32>
    %371 = arith.addf %359, %370 : vector<4x512xf32>
    %372 = vector.extract_strided_slice %0 {offsets = [0, 32], sizes = [4, 1], strides = [1, 1]} : vector<16x39xf32> to vector<4x1xf32>
    %373 = vector.extract_strided_slice %307 {offsets = [11, 0], sizes = [1, 512], strides = [1, 1]} : vector<16x512xf32> to vector<1x512xf32>
    %374 = vector.broadcast %373 : vector<1x512xf32> to vector<4x512xf32>
    %375 = vector.broadcast %372 : vector<4x1xf32> to vector<4x512xf32>
    %376 = arith.mulf %374, %375 : vector<4x512xf32>
    %377 = arith.addf %365, %376 : vector<4x512xf32>
    %378 = vector.extract_strided_slice %0 {offsets = [0, 33], sizes = [4, 1], strides = [1, 1]} : vector<16x39xf32> to vector<4x1xf32>
    %379 = vector.extract_strided_slice %307 {offsets = [12, 0], sizes = [1, 512], strides = [1, 1]} : vector<16x512xf32> to vector<1x512xf32>
    %380 = vector.broadcast %379 : vector<1x512xf32> to vector<4x512xf32>
    %381 = vector.broadcast %378 : vector<4x1xf32> to vector<4x512xf32>
    %382 = arith.mulf %380, %381 : vector<4x512xf32>
    %383 = arith.addf %371, %382 : vector<4x512xf32>
    %384 = vector.extract_strided_slice %0 {offsets = [0, 34], sizes = [4, 1], strides = [1, 1]} : vector<16x39xf32> to vector<4x1xf32>
    %385 = vector.extract_strided_slice %307 {offsets = [13, 0], sizes = [1, 512], strides = [1, 1]} : vector<16x512xf32> to vector<1x512xf32>
    %386 = vector.broadcast %385 : vector<1x512xf32> to vector<4x512xf32>
    %387 = vector.broadcast %384 : vector<4x1xf32> to vector<4x512xf32>
    %388 = arith.mulf %386, %387 : vector<4x512xf32>
    %389 = arith.addf %377, %388 : vector<4x512xf32>
    %390 = vector.extract_strided_slice %0 {offsets = [0, 35], sizes = [4, 1], strides = [1, 1]} : vector<16x39xf32> to vector<4x1xf32>
    %391 = vector.extract_strided_slice %307 {offsets = [14, 0], sizes = [1, 512], strides = [1, 1]} : vector<16x512xf32> to vector<1x512xf32>
    %392 = vector.broadcast %391 : vector<1x512xf32> to vector<4x512xf32>
    %393 = vector.broadcast %390 : vector<4x1xf32> to vector<4x512xf32>
    %394 = arith.mulf %392, %393 : vector<4x512xf32>
    %395 = arith.addf %383, %394 : vector<4x512xf32>
    %396 = vector.extract_strided_slice %0 {offsets = [0, 36], sizes = [4, 1], strides = [1, 1]} : vector<16x39xf32> to vector<4x1xf32>
    %397 = vector.extract_strided_slice %307 {offsets = [15, 0], sizes = [1, 512], strides = [1, 1]} : vector<16x512xf32> to vector<1x512xf32>
    %398 = vector.broadcast %397 : vector<1x512xf32> to vector<4x512xf32>
    %399 = vector.broadcast %396 : vector<4x1xf32> to vector<4x512xf32>
    %400 = arith.mulf %398, %399 : vector<4x512xf32>
    %401 = arith.addf %389, %400 : vector<4x512xf32>
    %402 = arith.addf %395, %401 : vector<4x512xf32>
    %403 = vector.extract_strided_slice %0 {offsets = [0, 37], sizes = [4, 1], strides = [1, 1]} : vector<16x39xf32> to vector<4x1xf32>
    %404 = vector.extract_strided_slice %0 {offsets = [0, 38], sizes = [4, 1], strides = [1, 1]} : vector<16x39xf32> to vector<4x1xf32>
    %cst_56 = arith.constant dense<0.000000e+00> : vector<4xf32>
    %405 = vector.multi_reduction <add>, %402, %cst_56 [1] : vector<4x512xf32> to vector<4xf32>
    %406 = vector.shape_cast %405 : vector<4xf32> to vector<4x1xf32>
    %407 = arith.mulf %402, %402 : vector<4x512xf32>
    %cst_57 = arith.constant dense<0.000000e+00> : vector<4xf32>
    %408 = vector.multi_reduction <add>, %407, %cst_57 [1] : vector<4x512xf32> to vector<4xf32>
    %409 = vector.shape_cast %408 : vector<4xf32> to vector<4x1xf32>
    %cst_58 = arith.constant 5.120000e+02 : f32
    %410 = vector.broadcast %cst_58 : f32 to vector<4x1xf32>
    %411 = arith.divf %406, %410 : vector<4x1xf32>
    %cst_59 = arith.constant 5.120000e+02 : f32
    %412 = vector.broadcast %cst_59 : f32 to vector<4x1xf32>
    %413 = arith.divf %409, %412 : vector<4x1xf32>
    %414 = arith.mulf %411, %411 : vector<4x1xf32>
    %415 = arith.subf %413, %414 : vector<4x1xf32>
    %cst_60 = arith.constant 0.000000e+00 : f32
    %416 = vector.broadcast %cst_60 : f32 to vector<4x1xf32>
    %417 = arith.maximumf %415, %416 : vector<4x1xf32>
    %cst_61 = arith.constant 9.99999974E-6 : f32
    %418 = vector.broadcast %cst_61 : f32 to vector<4x1xf32>
    %419 = arith.addf %417, %418 : vector<4x1xf32>
    %420 = math.rsqrt %419 : vector<4x1xf32>
    %421 = arith.mulf %403, %420 : vector<4x1xf32>
    %422 = arith.mulf %411, %421 : vector<4x1xf32>
    %423 = arith.subf %404, %422 : vector<4x1xf32>
    %424 = vector.broadcast %421 : vector<4x1xf32> to vector<4x512xf32>
    %425 = arith.mulf %402, %424 : vector<4x512xf32>
    %426 = vector.broadcast %423 : vector<4x1xf32> to vector<4x512xf32>
    %427 = arith.addf %425, %426 : vector<4x512xf32>
    %c0_62 = arith.constant 0 : index
    %c0_63 = arith.constant 0 : index
    %428 = vector.load %arg0[%c0_62, %c0_63] : memref<4x512xf32, #tpu.memory_space<vmem>>, vector<4x512xf32>
    %429 = arith.addf %428, %427 : vector<4x512xf32>
    %c0_64 = arith.constant 0 : index
    %c0_65 = arith.constant 0 : index
    %430 = vector.load %arg2[%c0_64, %c0_65] : memref<4x512xf32, #tpu.memory_space<vmem>>, vector<4x512xf32>
    tpu.vector_store %arg2[%c0_64, %c0_65], %429 {strides = array<i32>} : memref<4x512xf32, #tpu.memory_space<vmem>>, vector<4x512xf32>,
    return
  }
}

</mosaic_0001>

<bundles_post_ra>
// kernel: tpu_custom_call.1
= control target key start
LH: loop header
LB: loop body
LE: loop exit
PB: predicated region body
PF: predicated region fallthrough
CT: control target
= control target key end

     0   :  { %7 = vsyncpa [#allocation3], 0  ;;  %s3827_s0 = inlined_call_operand.hbm [shape: f32[4,512], index: 0, kind: input, shape index: {}, may-alias: {0,2}]   ;;  %s3828_s1 = inlined_call_operand.vmem [shape: f32[16,39], index: 1, kind: input, shape index: {}]   ;;  %s3829_s2 = inlined_call_operand.hbm [shape: f32[4,512], index: 2, kind: output, shape index: {}, may-alias: {0,2}]  }
   0x1   :  { %8 = vsyncpa [#allocation4], 0  ;;  %s2230_s9 = smov [#allocation2]   ;;  %s2182_s13 = scalar_lea.hbm %s3827_s0, 256 }
   0x2   :  { %s15_s10 = sshll.u32 %s2230_s9, 4  ;;  %p2183_p0 = scmp.ne.s32.totalorder %s3827_s0, %s2182_s13  ;;  %s16_s10 = int_to_ptr.vmem [resolvable:$true] %s15_s10 }
   0x3   :  { %p2186_p1 = scmp.lt.u32.totalorder %s2182_s13, %s3827_s0 }
   0x5   :  { %p2188_p2 = pnand %p2186_p1, %p2183_p0 }
   0x7   :  { %2191 = shalt.err (!%p2188_p2)
}
   0x8   :  { %s2192_s18 = scalar_lea.vmem %s16_s10, 256  ;;  %p2197_p4 = scmp.lt.s32.totalorder %s16_s10, %s16_s10 }
   0x9   :  { %p2193_p3 = scmp.ne.s32.totalorder %s16_s10, %s2192_s18  ;;  %p2198_p5 = scmp.lt.s32.totalorder %s2192_s18, %s2192_s18 }
   0xb   :  { %p2199_p6 = por %p2198_p5, %p2197_p4 }
   0xd   :  { %p2200_p7 = pnand %p2199_p6, %p2193_p3 }
   0xf   :  { %2203 = shalt.err (!%p2200_p7)
}
  0x10   :  { %18 = dma.hbm_to_vmem [thread:$0]  %s3827_s0, 256, %s16_s10, [#allocation3]  }
  0x11   :  { %2226 = dma.done.wait [#allocation3], 256  }
  0x12   :  { %2227 = vsyncadd [#allocation3], 4294967040  ;;  %vm3850_vm0 = vcmask 1043456   ;;  %v2308_v0 = vld [vmem:[#allocation2] sm:$0xff]  ;;  %v2310_v1 = vld [vmem:[#allocation2 + $0x8] sm:$0xff]  ;;  %s2231_s22 = smov 1   ;;  %v3830_v34 = vlaneseq }
  0x13   :  { %v30_v2 = vcombine.high %v2308_v0, %v2308_v0  ;;  %v35_v3 = vsel %vm3850_vm0, %v2308_v0, 0.0  ;;  %v44_v4 = vmul.f32 %v2308_v0, %v2308_v0  ;;  %v31_v5 = vcombine.high %v2310_v1, %v2310_v1  ;;  %v2333_v30 = vld [vmem:[%s3828_s1] sm:$0xff]  ;;  %s2232_s23 = smov 4   ;;  %s2233_s24 = smov 2   ;;  %v2358_v48 = vld [vmem:[%s3828_s1 + $0x8] sm:$0xff] }
  0x14   :  { %v45_v6 = vmul.f32 %v2310_v1, %v2310_v1  ;;  %v38_v8 = vsel %vm3850_vm0, %v2310_v1, 0.0  ;;  %v2338_v35 = vshrl.u32 %v3830_v34, 7  ;;  %s2234_s25 = smov 3   ;;  %s2235_s26 = smov 5   ;;  %v2236_v45 = vmov 2  }
  0x15   :  { %v36_v7 = vsel %vm3850_vm0, %v30_v2, 0.0  ;;  %v48_v9 = vcombine.high %v44_v4, %v44_v4  ;;  %v52_v10 = vsel %vm3850_vm0, %v44_v4, 0.0  ;;  %v40_v13 = vsel %vm3850_vm0, %v31_v5, 0.0  ;;  %2059 = vset.pattern.permute.xlu1 %v2236_v45  ;;  %2058 = vset.pattern.permute.xlu0 %v2236_v45  ;;  %s2237_s29 = smov 126   ;;  %s2238_s30 = smov 127  }
  0x16   :  { %v37_v11 = vadd.f32 %v36_v7, %v35_v3  ;;  %v49_v12 = vcombine.high %v45_v6, %v45_v6  ;;  %v55_v15 = vsel %vm3850_vm0, %v45_v6, 0.0  ;;  %v2342_v38 = vsub.s32 3, %v2338_v35  ;;  %s2253_s3 = smov 17   ;;  %s2254_s4 = smov 16  }
  0x17   :  { %v53_v14 = vsel %vm3850_vm0, %v48_v9, 0.0  ;;  %v2345_v39 = vsub.s32 1, %v2338_v35  ;;  %v2350_v42 = vsub.s32 2, %v2338_v35  ;;  %v2363_v52 = vsub.s32 0, %v2338_v35  ;;  %s2255_s5 = smov 15   ;;  %s2256_s6 = smov 113  }
  0x18   :  { %v39_v16 = vadd.f32 %v38_v8, %v37_v11  ;;  %v54_v17 = vadd.f32 %v53_v14, %v52_v10  ;;  %v57_v18 = vsel %vm3850_vm0, %v49_v12, 0.0  ;;  %3866 = vst [vmem:[#allocation8_spill] sm:$0xff] %v2342_v38  ;;  %v2239_v9 = vmov 3   ;;  %s2257_s7 = smov 112   ;;  %s2258_s8 = smov 111  }
  0x19   :  { %3867 = vst [vmem:[#allocation9_spill] sm:$0xff] %v2345_v39  ;;  %3868 = vst [vmem:[#allocation10_spill] sm:$0xff] %v2350_v42  ;;  %v2240_v14 = vmov 5  }
  0x1a   :  { %v41_v19 = vadd.f32 %v40_v13, %v39_v16  ;;  %v56_v20 = vadd.f32 %v55_v15, %v54_v17  ;;  %3869 = vst [vmem:[#allocation11_spill] sm:$0xff] %v2363_v52  ;;  %v2241_v15 = vmov 4  }
  0x1c   :  { %42 = vadd.xlane.f32.xlu0 %v41_v19  ;;  %v58_v21 = vadd.f32 %v57_v18, %v56_v20 }
  0x20   :  { %59 = vadd.xlane.f32.xlu0 %v58_v21 }
  0xa9   :  { %v43_v22 = vpop.xlane.xlu0 %42 }
  0xaa   :  { %v62_v23 = vmul.f32 0.001953125, %v43_v22 }
  0xac   :  { %v64_v25 = vmul.f32 %v62_v23, %v62_v23 }
  0xad   :  { %v60_v24 = vpop.xlane.xlu0 %59 }
  0xae   :  { %v63_v26 = vmul.f32 0.001953125, %v60_v24 }
  0xb0   :  { %v65_v27 = vsub.f32 %v63_v26, %v64_v25 }
  0xb2   :  { %v66_v28 = vmax.f32 %v65_v27, 0.0 }
  0xb4   :  { %v67_v29 = vadd.f32 1e-05, %v66_v28 }
  0xb6   :  { %2113 = vrsqrt.f32 %v67_v29  ;;  %v2242_v29 = vmov 12  }
  0xc0   :  { %v2114_v31 = vpop.eup %2113 }
  0xc1   :  { %v69_v32 = vmul.f32 %v2114_v31, %v2333_v30 }
  0xc3   :  { %v70_v33 = vmul.f32 %v69_v32, %v62_v23  ;;  %v319_v44 = vrot.slane %v69_v32, %v2342_v38  ;;  %v79_v53 = vrot.slane %v69_v32, %v2363_v52  ;;  %v153_v54 = vrot.slane %v69_v32, %v2345_v39 }
  0xc4   :  { %v227_v55 = vrot.slane %v69_v32, %v2350_v42 }
  0xc5   :  { %72 = vrot.lane.b32.xlu1 %v70_v33, %s2231_s22 }
 0x137   :  { %v73_v36 = vpop.permute.xlu1 %72 }
 0x138   :  { %v75_v37 = vsub.f32 %v2333_v30, %v73_v36  ;;  %v2390_v36 = vsub.s32 4, %v2338_v35 }
 0x13a   :  { %v383_v40 = vrot.slane %v75_v37, %v2342_v38  ;;  %v217_v41 = vrot.slane %v75_v37, %v2345_v39  ;;  %v291_v43 = vrot.slane %v75_v37, %v2350_v42  ;;  %v143_v56 = vrot.slane %v75_v37, %v2363_v52  ;;  %3870 = vst [vmem:[#allocation12_spill] sm:$0xff] %v2390_v36 }
 0x13b   :  { %v2393_v37 = vsub.s32 5, %v2338_v35 }
 0x13c   :  { %385 = vrot.lane.b32.xlu1 %v383_v40, %s2232_s23  ;;  %219 = vrot.lane.b32.xlu0 %v217_v41, %s2233_s24  ;;  %v2396_v40 = vsub.s32 7, %v2338_v35  ;;  %v2399_v41 = vsub.s32 6, %v2338_v35 }
 0x13d   :  { %3871 = vst [vmem:[#allocation13_spill] sm:$0xff] %v2393_v37  ;;  %v167_v35 = vrot.slane %v2308_v0, %v2393_v37 }
 0x13e   :  { %3872 = vst [vmem:[#allocation14_spill] sm:$0xff] %v2396_v40  ;;  %3873 = vst [vmem:[#allocation15_spill] sm:$0xff] %v2399_v41 }
 0x140   :  { %293 = vrot.lane.b32.xlu1 %v291_v43, %s2234_s25  ;;  %321 = vrot.lane.b32.xlu0 %v319_v44, %s2235_s26  ;;  %v89_v44 = vrot.slane %v2308_v0, %v2363_v52 }
 0x1ae   :  { %v386_v46 = vpop.permute.xlu1 %385  ;;  %v220_v58 = vpop.permute.xlu0 %219 }
 0x1af   :  { %v388_v47 = vmul.f32 %v386_v46, %v2333_v30  ;;  %v389_v50 = vmul.f32 %v386_v46, %v2358_v48  ;;  %v222_v59 = vmul.f32 %v220_v58, %v2333_v30  ;;  %v223_v62 = vmul.f32 %v220_v58, %v2358_v48 }
 0x1b0   :  { %v97_v46 = vrot.slane %v2310_v1, %v2363_v52  ;;  %v337_v58 = vrot.slane %v2310_v1, %v2342_v38 }
 0x1b1   :  { %400 = vrot.lane.b32.xlu1 %v388_v47, %s2237_s29  ;;  %v101_v47 = vrot.slane %v2310_v1, %v2390_v36 }
 0x1b2   :  { %v294_v49 = vpop.permute.xlu1 %293  ;;  %v322_v10 = vpop.permute.xlu0 %321 }
 0x1b3   :  { %v296_v51 = vmul.f32 %v294_v49, %v2333_v30  ;;  %v297_v57 = vmul.f32 %v294_v49, %v2358_v48  ;;  %v324_v12 = vmul.f32 %v322_v10, %v2333_v30  ;;  %v325_v17 = vmul.f32 %v322_v10, %v2358_v48 }
 0x1b5   :  { %402 = vrot.lane.b32.xlu1 %v389_v50, %s2237_s29  ;;  %308 = vrot.lane.b32.xlu0 %v296_v51, %s2237_s29  ;;  %v163_v50 = vrot.slane %v2308_v0, %v2345_v39  ;;  %v171_v51 = vrot.slane %v2310_v1, %v2345_v39 }
 0x1b9   :  { %81 = vrot.lane.b32.xlu1 %v79_v53, %s2233_s24  ;;  %v329_v53 = vrot.slane %v2308_v0, %v2342_v38 }
 0x1bd   :  { %155 = vrot.lane.b32.xlu1 %v153_v54, %s2234_s25  ;;  %v175_v54 = vrot.slane %v2310_v1, %v2393_v37 }
 0x1c1   :  { %229 = vrot.lane.b32.xlu1 %v227_v55, %s2232_s23  ;;  %v333_v55 = vrot.slane %v2308_v0, %v2396_v40 }
 0x1c5   :  { %145 = vrot.lane.b32.xlu1 %v143_v56, %s2231_s22  ;;  %v237_v56 = vrot.slane %v2308_v0, %v2350_v42 }
 0x1c7   :  { %v257_v10 = vrot.slane %v237_v56, %v2350_v42 }
 0x1c9   :  { %310 = vrot.lane.b32.xlu1 %v297_v57, %s2237_s29  ;;  %v241_v57 = vrot.slane %v2308_v0, %v2399_v41 }
 0x223   :  { %v401_v60 = vpop.permute.xlu1 %400 }
 0x224   :  { %v406_v61 = vadd.f32 %v401_v60, %v222_v59  ;;  %v341_v59 = vrot.slane %v2310_v1, %v2396_v40  ;;  %v245_v60 = vrot.slane %v2310_v1, %v2350_v42 }
 0x226   :  { %418 = vrot.lane.b32.xlu0 %v406_v61, %s2238_s30  ;;  %v249_v61 = vrot.slane %v2310_v1, %v2399_v41  ;;  %v353_v1 = vrot.slane %v333_v55, %v2342_v38 }
 0x227   :  { %v403_v63 = vpop.permute.xlu1 %402  ;;  %v309_v20 = vpop.permute.xlu0 %308 }
 0x228   :  { %v407_v2 = vadd.f32 %v403_v63, %v223_v62  ;;  %v109_v62 = vrot.slane %v89_v44, %v2363_v52 }
 0x22a   :  { %420 = vrot.lane.b32.xlu1 %v407_v2, %s2238_s30  ;;  %v117_v2 = vrot.slane %v97_v46, %v2363_v52 }
 0x22b   :  { %v82_v3 = vpop.permute.xlu1 %81 }
 0x22c   :  { %v84_v4 = vmul.f32 %v82_v3, %v2333_v30  ;;  %v85_v5 = vmul.f32 %v82_v3, %v2358_v48 }
 0x22e   :  { %124 = vperm.xlu0 %2058, %v84_v4   ;;  %129 = vperm.xlu1 %2059, %v85_v5   ;;  %v183_v4 = vrot.slane %v163_v50, %v2345_v39  ;;  %v187_v5 = vrot.slane %v167_v35, %v2345_v39 }
 0x22f   :  { %v156_v6 = vpop.permute.xlu1 %155 }
 0x230   :  { %v158_v7 = vmul.f32 %v156_v6, %v2333_v30  ;;  %v159_v8 = vmul.f32 %v156_v6, %v2358_v48  ;;  %v191_v6 = vrot.slane %v171_v51, %v2345_v39 }
 0x232   :  { %2061 = vset.pattern.permute.xlu0 %v2239_v9  ;;  %2060 = vset.pattern.permute.xlu1 %v2239_v9 }
 0x233   :  { %v230_v11 = vpop.permute.xlu1 %229  ;;  %203 = vperm.xlu0 %2061, %v159_v8   ;;  %198 = vperm.xlu1 %2060, %v158_v7   ;;  %v349_v7 = vrot.slane %v329_v53, %v2342_v38  ;;  %v195_v8 = vrot.slane %v175_v54, %v2345_v39 }
 0x234   :  { %v232_v13 = vmul.f32 %v230_v11, %v2333_v30  ;;  %v233_v16 = vmul.f32 %v230_v11, %v2358_v48  ;;  %v261_v11 = vrot.slane %v241_v57, %v2350_v42 }
 0x237   :  { %2063 = vset.pattern.permute.xlu0 %v2240_v14  ;;  %2062 = vset.pattern.permute.xlu1 %v2241_v15  ;;  %v146_v18 = vpop.permute.xlu1 %145  ;;  %v269_v15 = vrot.slane %v249_v61, %v2350_v42 }
 0x238   :  { %364 = vperm.xlu0 %2063, %v324_v12   ;;  %272 = vperm.xlu1 %2062, %v232_v13   ;;  %v148_v19 = vmul.f32 %v146_v18, %v2333_v30  ;;  %v149_v24 = vmul.f32 %v146_v18, %v2358_v48  ;;  %v357_v12 = vrot.slane %v337_v58, %v2342_v38 }
 0x239   :  { %v361_v13 = vrot.slane %v341_v59, %v2342_v38 }
 0x23a   :  { %v314_v21 = vadd.f32 %v309_v20, %v148_v19 }
 0x23b   :  { %v311_v22 = vpop.permute.xlu1 %310 }
 0x23c   :  { %277 = vperm.xlu1 %2062, %v233_v16   ;;  %2066 = vset.pattern.permute.xlu0 %v2236_v45  ;;  %v315_v26 = vadd.f32 %v311_v22, %v149_v24 }
 0x240   :  { %2064 = vset.pattern.permute.xlu1 %v2240_v14  ;;  %v265_v14 = vrot.slane %v245_v60, %v2350_v42 }
 0x241   :  { %369 = vperm.xlu1 %2064, %v325_v17  }
 0x245   :  { %2065 = vset.pattern.permute.xlu1 %v2236_v45  ;;  %v93_v45 = vrot.slane %v2308_v0, %v2390_v36  ;;  %v121_v0 = vrot.slane %v101_v47, %v2363_v52 }
 0x247   :  { %v113_v63 = vrot.slane %v93_v45, %v2363_v52 }
 0x298   :  { %v419_v23 = vpop.permute.xlu0 %418 }
 0x299   :  { %v424_v25 = vadd.f32 %v419_v23, %v314_v21 }
 0x29b   :  { %428 = vperm.xlu1 %2065, %v424_v25  }
 0x29c   :  { %v421_v27 = vpop.permute.xlu1 %420 }
 0x29d   :  { %v425_v28 = vadd.f32 %v421_v27, %v315_v26 }
 0x29f   :  { %433 = vperm.xlu0 %2066, %v425_v28   ;;  %2067 = vset.pattern.permute.xlu1 %v2242_v29 }
 0x2a3   :  { %2068 = vset.pattern.permute.xlu0 %v2242_v29 }
 0x2ad   :  { %v2385_v31 = vpop.permute.xlu1 %129  ;;  %v125_v33 = vpop.permute.xlu0 %124 }
 0x2ae   :  { %v132_v16 = vmul.f32 %v125_v33, %v109_v62  ;;  %v133_v17 = vmul.f32 %v125_v33, %v113_v63  ;;  %v134_v18 = vmul.f32 %v125_v33, %v117_v2  ;;  %v135_v19 = vmul.f32 %v125_v33, %v121_v0 }
 0x2af   :  { %v136_v20 = vmul.f32 %v2385_v31, %v109_v62  ;;  %v137_v21 = vmul.f32 %v2385_v31, %v113_v63  ;;  %v138_v22 = vmul.f32 %v2385_v31, %v117_v2 }
 0x2b2   :  { %v2387_v32 = vpop.permute.xlu1 %198  ;;  %v2409_v49 = vpop.permute.xlu0 %203 }
 0x2b3   :  { %v210_v24 = vmul.f32 %v2409_v49, %v183_v4  ;;  %v211_v29 = vmul.f32 %v2409_v49, %v187_v5  ;;  %v206_v44 = vmul.f32 %v2387_v32, %v183_v4  ;;  %v207_v33 = vmul.f32 %v2387_v32, %v187_v5 }
 0x2b4   :  { %v208_v47 = vmul.f32 %v2387_v32, %v191_v6  ;;  %v209_v51 = vmul.f32 %v2387_v32, %v195_v8  ;;  %v212_v2 = vmul.f32 %v2409_v49, %v191_v6 }
 0x2b7   :  { %v273_v43 = vpop.permute.xlu1 %272  ;;  %v365_v9 = vpop.permute.xlu0 %364 }
 0x2b8   :  { %v372_v23 = vmul.f32 %v365_v9, %v349_v7  ;;  %v373_v25 = vmul.f32 %v365_v9, %v353_v1  ;;  %v280_v26 = vmul.f32 %v273_v43, %v257_v10  ;;  %v281_v27 = vmul.f32 %v273_v43, %v261_v11 }
 0x2b9   :  { %v374_v45 = vmul.f32 %v365_v9, %v357_v12  ;;  %v282_v46 = vmul.f32 %v273_v43, %v265_v14  ;;  %v375_v50 = vmul.f32 %v365_v9, %v361_v13  ;;  %v283_v35 = vmul.f32 %v273_v43, %v269_v15 }
 0x2ba   :  { %v390_v53 = vadd.f32 %v372_v23, %v206_v44  ;;  %v391_v56 = vadd.f32 %v373_v25, %v207_v33  ;;  %v298_v57 = vadd.f32 %v280_v26, %v132_v16  ;;  %v299_v58 = vadd.f32 %v281_v27, %v133_v17 }
 0x2bb   :  { %v278_v3 = vpop.permute.xlu1 %277  ;;  %v392_v60 = vadd.f32 %v374_v45, %v208_v47  ;;  %v300_v61 = vadd.f32 %v282_v46, %v134_v18  ;;  %v301_v5 = vadd.f32 %v283_v35, %v135_v19  ;;  %v393_v34 = vadd.f32 %v375_v50, %v209_v51 }
 0x2bc   :  { %v284_v62 = vmul.f32 %v278_v3, %v257_v10  ;;  %v285_v63 = vmul.f32 %v278_v3, %v261_v11  ;;  %v286_v4 = vmul.f32 %v278_v3, %v265_v14  ;;  %v139_v43 = vmul.f32 %v2385_v31, %v121_v0 }
 0x2bd   :  { %v408_v16 = vadd.f32 %v390_v53, %v298_v57  ;;  %v409_v17 = vadd.f32 %v391_v56, %v299_v58  ;;  %v410_v11 = vadd.f32 %v392_v60, %v300_v61  ;;  %v411_v19 = vadd.f32 %v393_v34, %v301_v5 }
 0x2be   :  { %v302_v25 = vadd.f32 %v284_v62, %v136_v20  ;;  %v303_v18 = vadd.f32 %v285_v63, %v137_v21  ;;  %v304_v26 = vadd.f32 %v286_v4, %v138_v22  ;;  %v2243_v63 = vmov 8  }
 0x2bf   :  { %v2245_v4 = vmov 10   ;;  %v2246_v5 = vmov 11  }
 0x2c0   :  { %v370_v28 = vpop.permute.xlu1 %369 }
 0x2c1   :  { %v376_v54 = vmul.f32 %v370_v28, %v349_v7  ;;  %v377_v55 = vmul.f32 %v370_v28, %v353_v1  ;;  %v378_v59 = vmul.f32 %v370_v28, %v357_v12  ;;  %v379_v9 = vmul.f32 %v370_v28, %v361_v13 }
 0x2c2   :  { %v213_v7 = vmul.f32 %v2409_v49, %v195_v8  ;;  %v287_v12 = vmul.f32 %v278_v3, %v269_v15 }
 0x2c3   :  { %v394_v32 = vadd.f32 %v376_v54, %v210_v24  ;;  %v395_v23 = vadd.f32 %v377_v55, %v211_v29  ;;  %v396_v1 = vadd.f32 %v378_v59, %v212_v2  ;;  %v2244_v2 = vmov 9  }
 0x2c4   :  { %v397_v24 = vadd.f32 %v379_v9, %v213_v7  ;;  %v305_v22 = vadd.f32 %v287_v12, %v139_v43  ;;  %v2247_v43 = vmov 6   ;;  %v2248_v9 = vmov 13  }
 0x2c5   :  { %v412_v31 = vadd.f32 %v394_v32, %v302_v25  ;;  %v413_v0 = vadd.f32 %v395_v23, %v303_v18  ;;  %v414_v8 = vadd.f32 %v396_v1, %v304_v26 }
 0x2c6   :  { %v415_v44 = vadd.f32 %v397_v24, %v305_v22 }
 0x31a   :  { %v429_v10 = vpop.permute.xlu1 %428 }
 0x31b   :  { %v2463_v6 = vadd.f32 %v429_v10, %v408_v16  ;;  %v2465_v14 = vadd.f32 %v429_v10, %v409_v17  ;;  %v2467_v13 = vadd.f32 %v429_v10, %v410_v11  ;;  %v2475_v21 = vadd.f32 %v429_v10, %v411_v19 }
 0x31d   :  { %v444_v49 = vadd.f32 %v2465_v14, %v2463_v6  ;;  %v454_v3 = vmul.f32 %v2463_v6, %v2463_v6  ;;  %v455_v15 = vmul.f32 %v2465_v14, %v2465_v14  ;;  %v456_v45 = vmul.f32 %v2467_v13, %v2467_v13 }
 0x31e   :  { %v434_v20 = vpop.permute.xlu0 %433  ;;  %v457_v51 = vmul.f32 %v2475_v21, %v2475_v21 }
 0x31f   :  { %v2477_v34 = vadd.f32 %v434_v20, %v412_v31  ;;  %v2479_v27 = vadd.f32 %v434_v20, %v413_v0  ;;  %v445_v28 = vadd.f32 %v444_v49, %v2467_v13  ;;  %v2482_v29 = vadd.f32 %v434_v20, %v414_v8 }
 0x320   :  { %v462_v46 = vadd.f32 %v455_v15, %v454_v3  ;;  %v2495_v54 = vadd.f32 %v434_v20, %v415_v44  ;;  %v2250_v44 = vmov 15  }
 0x321   :  { %v446_v33 = vadd.f32 %v445_v28, %v2475_v21  ;;  %v449_v47 = vadd.f32 %v2479_v27, %v2477_v34  ;;  %v458_v50 = vmul.f32 %v2477_v34, %v2477_v34  ;;  %v459_v35 = vmul.f32 %v2479_v27, %v2479_v27 }
 0x322   :  { %v463_v53 = vadd.f32 %v462_v46, %v456_v45  ;;  %v460_v56 = vmul.f32 %v2482_v29, %v2482_v29  ;;  %v461_v61 = vmul.f32 %v2495_v54, %v2495_v54  ;;  %v2249_v28 = vmov 14  }
 0x323   :  { %447 = vadd.xlane.f32.xlu1 %v446_v33  ;;  %v450_v55 = vadd.f32 %v449_v47, %v2482_v29  ;;  %v467_v57 = vadd.f32 %v459_v35, %v458_v50  ;;  %v2251_v45 = vmov 16   ;;  %v2252_v46 = vmov 7  }
 0x324   :  { %v464_v59 = vadd.f32 %v463_v53, %v457_v51 }
 0x325   :  { %v451_v58 = vadd.f32 %v450_v55, %v2495_v54  ;;  %v468_v60 = vadd.f32 %v467_v57, %v460_v56 }
 0x327   :  { %452 = vadd.xlane.f32.xlu0 %v451_v58  ;;  %465 = vadd.xlane.f32.xlu1 %v464_v59  ;;  %v469_v62 = vadd.f32 %v468_v60, %v461_v61 }
 0x32b   :  { %470 = vadd.xlane.f32.xlu0 %v469_v62 }
 0x338   :  { %643 = vperm.xlu1 %2067, %v2333_v30  }
 0x33c   :  { %2069 = vset.pattern.permute.xlu1 %v2243_v63 }
 0x33d   :  { %705 = vperm.xlu1 %2069, %v2333_v30  }
 0x341   :  { %709 = vperm.xlu1 %2069, %v2358_v48   ;;  %648 = vperm.xlu0 %2068, %v2358_v48  }
 0x345   :  { %2070 = vset.pattern.permute.xlu0 %v2244_v2  ;;  %2071 = vset.pattern.permute.xlu1 %v2244_v2 }
 0x346   :  { %770 = vperm.xlu0 %2070, %v2333_v30   ;;  %774 = vperm.xlu1 %2071, %v2358_v48  }
 0x34a   :  { %2073 = vset.pattern.permute.xlu0 %v2245_v4  ;;  %2072 = vset.pattern.permute.xlu1 %v2245_v4 }
 0x34b   :  { %835 = vperm.xlu0 %2073, %v2358_v48   ;;  %831 = vperm.xlu1 %2072, %v2333_v30  }
 0x34f   :  { %2074 = vset.pattern.permute.xlu1 %v2246_v5  ;;  %2077 = vset.pattern.permute.xlu0 %v2248_v9 }
 0x350   :  { %896 = vperm.xlu1 %2074, %v2333_v30  }
 0x354   :  { %2075 = vset.pattern.permute.xlu1 %v2247_v43 }
 0x3b0   :  { %v448_v32 = vpop.xlane.xlu1 %447 }
 0x3b1   :  { %v472_v23 = vmul.f32 0.001953125, %v448_v32 }
 0x3b3   :  { %v476_v16 = vmul.f32 %v472_v23, %v472_v23 }
 0x3b4   :  { %v453_v7 = vpop.xlane.xlu0 %452  ;;  %v466_v1 = vpop.xlane.xlu1 %465 }
 0x3b5   :  { %v473_v17 = vmul.f32 0.001953125, %v453_v7  ;;  %v474_v12 = vmul.f32 0.001953125, %v466_v1 }
 0x3b7   :  { %v478_v25 = vsub.f32 %v474_v12, %v476_v16  ;;  %v477_v10 = vmul.f32 %v473_v17, %v473_v17 }
 0x3b8   :  { %v471_v18 = vpop.xlane.xlu0 %470  ;;  %v2525_v33 = vpop.permute.xlu1 %643 }
 0x3b9   :  { %v480_v11 = vmax.f32 %v478_v25, 0.0  ;;  %v475_v26 = vmul.f32 0.001953125, %v471_v18 }
 0x3bb   :  { %v482_v19 = vadd.f32 1e-05, %v480_v11  ;;  %v479_v31 = vsub.f32 %v475_v26, %v477_v10 }
 0x3bc   :  { %v2527_v47 = vpop.permute.xlu1 %705 }
 0x3bd   :  { %2115 = vrsqrt.f32 %v482_v19  ;;  %v481_v0 = vmax.f32 %v479_v31, 0.0 }
 0x3bf   :  { %v483_v24 = vadd.f32 1e-05, %v481_v0 }
 0x3c0   :  { %v2529_v50 = vpop.permute.xlu0 %648  ;;  %v2531_v35 = vpop.permute.xlu1 %709 }
 0x3c1   :  { %2117 = vrsqrt.f32 %v483_v24 }
 0x3c5   :  { %v2533_v51 = vpop.permute.xlu0 %770  ;;  %v2535_v53 = vpop.permute.xlu1 %774 }
 0x3c7   :  { %v2116_v49 = vpop.eup %2115 }
 0x3c8   :  { %v486_v8 = vmul.f32 %v2116_v49, %v2333_v30 }
 0x3ca   :  { %502 = vperm.xlu1 %2075, %v486_v8   ;;  %v488_v22 = vmul.f32 %v486_v8, %v472_v23  ;;  %v2537_v55 = vpop.permute.xlu0 %835  ;;  %v2539_v56 = vpop.permute.xlu1 %831 }
 0x3cb   :  { %v2118_v3 = vpop.eup %2117 }
 0x3cc   :  { %v487_v15 = vmul.f32 %v2118_v3, %v2358_v48 }
 0x3ce   :  { %507 = vperm.xlu1 %2075, %v487_v15   ;;  %v489_v20 = vmul.f32 %v487_v15, %v473_v17 }
 0x3cf   :  { %v2542_v59 = vpop.permute.xlu1 %896 }
 0x3d0   :  { %494 = vrot.lane.b32.xlu0 %v489_v20, %s2231_s22 }
 0x3d2   :  { %492 = vrot.lane.b32.xlu1 %v488_v22, %s2231_s22 }
 0x3d3   :  { %2076 = vset.pattern.permute.xlu1 %v2246_v5 }
 0x3d4   :  { %961 = vperm.xlu0 %2077, %v2333_v30  }
 0x3d6   :  { %900 = vperm.xlu1 %2076, %v2358_v48  }
 0x3d8   :  { %2080 = vset.pattern.permute.xlu0 %v2249_v28 }
 0x3d9   :  { %1034 = vperm.xlu0 %2080, %v2358_v48  }
 0x3da   :  { %2078 = vset.pattern.permute.xlu1 %v2248_v9 }
 0x3db   :  { %965 = vperm.xlu1 %2078, %v2358_v48  }
 0x3dd   :  { %2081 = vset.pattern.permute.xlu0 %v2250_v44 }
 0x3de   :  { %1095 = vperm.xlu0 %2081, %v2333_v30  }
 0x3df   :  { %2079 = vset.pattern.permute.xlu1 %v2249_v28 }
 0x3e0   :  { %1030 = vperm.xlu1 %2079, %v2333_v30  }
 0x3e2   :  { %2084 = vset.pattern.permute.xlu0 %v2251_v45 }
 0x3e3   :  { %1168 = vperm.xlu0 %2084, %v2358_v48  }
 0x3e4   :  { %2082 = vset.pattern.permute.xlu1 %v2250_v44 }
 0x3e5   :  { %1099 = vperm.xlu1 %2082, %v2358_v48  }
 0x3e7   :  { %2085 = vset.pattern.permute.xlu0 %v2252_v46 }
 0x3e9   :  { %2083 = vset.pattern.permute.xlu1 %v2251_v45 }
 0x3ea   :  { %1164 = vperm.xlu1 %2083, %v2333_v30  }
 0x3ee   :  { %2086 = vset.pattern.permute.xlu1 %v2252_v46 }
 0x442   :  { %v495_v57 = vpop.permute.xlu0 %494 }
 0x443   :  { %v499_v58 = vsub.f32 %v2358_v48, %v495_v57 }
 0x445   :  { %525 = vperm.xlu1 %2086, %v499_v58  }
 0x449   :  { %v503_v60 = vpop.permute.xlu1 %502 }
 0x44a   :  { %v511_v19 = vmul.f32 %v503_v60, %v2465_v14  ;;  %v513_v0 = vmul.f32 %v503_v60, %v2475_v21 }
 0x44d   :  { %v508_v61 = vpop.permute.xlu1 %507 }
 0x44e   :  { %v514_v7 = vmul.f32 %v508_v61, %v2477_v34  ;;  %v515_v16 = vmul.f32 %v508_v61, %v2479_v27  ;;  %v517_v12 = vmul.f32 %v508_v61, %v2495_v54  ;;  %v510_v27 = vmul.f32 %v503_v60, %v2463_v6 }
 0x44f   :  { %v512_v54 = vmul.f32 %v503_v60, %v2467_v13  ;;  %v516_v20 = vmul.f32 %v508_v61, %v2482_v29 }
 0x451   :  { %v493_v62 = vpop.permute.xlu1 %492 }
 0x452   :  { %v498_v63 = vsub.f32 %v2333_v30, %v493_v62 }
 0x453   :  { %v2553_v9 = vpop.permute.xlu0 %961 }
 0x454   :  { %520 = vperm.xlu0 %2085, %v498_v63  }
 0x455   :  { %v2545_v2 = vpop.permute.xlu1 %900 }
 0x458   :  { %v2557_v32 = vpop.permute.xlu0 %1034 }
 0x459   :  { %3877 = vst [vmem:[#allocation19_spill] sm:$0xff] %v2557_v32 }
 0x45a   :  { %v2547_v4 = vpop.permute.xlu1 %965 }
 0x45b   :  { %3874 = vst [vmem:[#allocation16_spill] sm:$0xff] %v2547_v4 }
 0x45d   :  { %v2562_v30 = vpop.permute.xlu0 %1095 }
 0x45e   :  { %3878 = vst [vmem:[#allocation20_spill] sm:$0xff] %v2562_v30 }
 0x45f   :  { %v2549_v5 = vpop.permute.xlu1 %1030 }
 0x462   :  { %v2570_v18 = vpop.permute.xlu0 %1168 }
 0x463   :  { %3879 = vst [vmem:[#allocation21_spill] sm:$0xff] %v2570_v18 }
 0x464   :  { %v2551_v43 = vpop.permute.xlu1 %1099 }
 0x465   :  { %3875 = vst [vmem:[#allocation17_spill] sm:$0xff] %v2551_v43 }
 0x469   :  { %v2555_v48 = vpop.permute.xlu1 %1164 }
 0x46a   :  { %3876 = vst [vmem:[#allocation18_spill] sm:$0xff] %v2555_v48 }
 0x4c4   :  { %v526_v23 = vpop.permute.xlu1 %525 }
 0x4c5   :  { %v2560_v1 = vadd.f32 %v526_v23, %v514_v7  ;;  %v2568_v25 = vadd.f32 %v526_v23, %v515_v16  ;;  %v2572_v10 = vadd.f32 %v526_v23, %v517_v12  ;;  %v2588_v44 = vadd.f32 %v526_v23, %v516_v20 }
 0x4c7   :  { %v548_v17 = vmul.f32 %v2560_v1, %v2560_v1  ;;  %v549_v34 = vmul.f32 %v2568_v25, %v2568_v25  ;;  %v551_v26 = vmul.f32 %v2572_v10, %v2572_v10  ;;  %v550_v29 = vmul.f32 %v2588_v44, %v2588_v44 }
 0x4c9   :  { %v556_v11 = vmul.f32 %v548_v17, %v2560_v1  ;;  %v557_v49 = vmul.f32 %v549_v34, %v2568_v25  ;;  %v559_v28 = vmul.f32 %v551_v26, %v2572_v10 }
 0x4cb   :  { %v564_v31 = vmul.f32 0.044715, %v556_v11  ;;  %v565_v21 = vmul.f32 0.044715, %v557_v49  ;;  %v567_v62 = vmul.f32 0.044715, %v559_v28 }
 0x4cd   :  { %v572_v14 = vadd.f32 %v564_v31, %v2560_v1  ;;  %v573_v16 = vadd.f32 %v565_v21, %v2568_v25 }
 0x4cf   :  { %v580_v61 = vmul.f32 0.7978846, %v572_v14  ;;  %v581_v31 = vmul.f32 0.7978846, %v573_v16 }
 0x4d1   :  { %2119 = vtanh.f32 %v580_v61 }
 0x4d3   :  { %v521_v24 = vpop.permute.xlu0 %520 }
 0x4d4   :  { %v528_v8 = vadd.f32 %v521_v24, %v510_v27  ;;  %v529_v3 = vadd.f32 %v521_v24, %v511_v19  ;;  %v2584_v15 = vadd.f32 %v521_v24, %v512_v54  ;;  %v531_v22 = vadd.f32 %v521_v24, %v513_v0 }
 0x4d5   :  { %v558_v27 = vmul.f32 %v550_v29, %v2588_v44  ;;  %v575_v19 = vadd.f32 %v567_v62, %v2572_v10 }
 0x4d6   :  { %v544_v6 = vmul.f32 %v528_v8, %v528_v8  ;;  %v545_v13 = vmul.f32 %v529_v3, %v529_v3  ;;  %v547_v45 = vmul.f32 %v531_v22, %v531_v22  ;;  %v546_v46 = vmul.f32 %v2584_v15, %v2584_v15 }
 0x4d7   :  { %v566_v49 = vmul.f32 0.044715, %v558_v27  ;;  %v583_v20 = vmul.f32 0.7978846, %v575_v19  ;;  %v543_v19 = vmul.f32 0.5, %v2572_v10 }
 0x4d8   :  { %v552_v57 = vmul.f32 %v544_v6, %v528_v8  ;;  %v553_v58 = vmul.f32 %v545_v13, %v529_v3  ;;  %v555_v60 = vmul.f32 %v547_v45, %v531_v22  ;;  %v554_v17 = vmul.f32 %v546_v46, %v2584_v15 }
 0x4d9   :  { %v574_v6 = vadd.f32 %v566_v49, %v2588_v44  ;;  %v536_v46 = vmul.f32 0.5, %v528_v8  ;;  %v542_v49 = vmul.f32 0.5, %v2588_v44 }
 0x4da   :  { %v560_v63 = vmul.f32 0.044715, %v552_v57  ;;  %v561_v7 = vmul.f32 0.044715, %v553_v58  ;;  %v563_v23 = vmul.f32 0.044715, %v555_v60 }
 0x4db   :  { %v562_v0 = vmul.f32 0.044715, %v554_v17  ;;  %v2120_v13 = vpop.eup %2119  ;;  %v582_v58 = vmul.f32 0.7978846, %v574_v6  ;;  %v537_v60 = vmul.f32 0.5, %v529_v3  ;;  %v540_v17 = vmul.f32 0.5, %v2560_v1 }
 0x4dc   :  { %v568_v12 = vadd.f32 %v560_v63, %v528_v8  ;;  %v569_v11 = vadd.f32 %v561_v7, %v529_v3  ;;  %v571_v34 = vadd.f32 %v563_v23, %v531_v22  ;;  %v596_v29 = vadd.f32 1.0, %v2120_v13 }
 0x4dd   :  { %v570_v28 = vadd.f32 %v562_v0, %v2584_v15  ;;  %v539_v8 = vmul.f32 0.5, %v531_v22  ;;  %v538_v0 = vmul.f32 0.5, %v2584_v15  ;;  %v3880_v15 = vlaneseq }
 0x4de   :  { %v576_v26 = vmul.f32 0.7978846, %v568_v12  ;;  %v577_v54 = vmul.f32 0.7978846, %v569_v11  ;;  %v579_v24 = vmul.f32 0.7978846, %v571_v34  ;;  %v2610_v12 = vmul.f32 %v596_v29, %v540_v17 }
 0x4df   :  { %v578_v14 = vmul.f32 0.7978846, %v570_v28  ;;  %v2723_v44 = vand.u32 127, %v3880_v15 }
 0x4e0   :  { %2121 = vtanh.f32 %v576_v26  ;;  %v541_v26 = vmul.f32 0.5, %v2568_v25 }
 0x4e1   :  { %2123 = vtanh.f32 %v577_v54  ;;  %vm744_vm1 = vcmp.lt.s32.totalorder %v2723_v44, 16  ;;  %vm3860_vm2 = vcmp.lt.s32.totalorder %v2723_v44, 17  ;;  %vm801_vm10 = vcmp.lt.s32.totalorder %v2723_v44, 15 }
 0x4e2   :  { %2125 = vtanh.f32 %v579_v24  ;;  %vm870_vm14 = vcmp.lt.s32.totalorder %v2723_v44, 1 }
 0x4e3   :  { %2127 = vtanh.f32 %v581_v31 }
 0x4e4   :  { %2129 = vtanh.f32 %v583_v20 }
 0x4e5   :  { %2131 = vtanh.f32 %v578_v14  ;;  %v610_v14 = vadd.s32 128, %v2723_v44 }
 0x4e6   :  { %2133 = vtanh.f32 %v582_v58 }
 0x4ea   :  { %v2122_v45 = vpop.eup %2121 }
 0x4eb   :  { %v2124_v21 = vpop.eup %2123  ;;  %v592_v57 = vadd.f32 1.0, %v2122_v45 }
 0x4ec   :  { %v593_v62 = vadd.f32 1.0, %v2124_v21  ;;  %v2126_v63 = vpop.eup %2125  ;;  %v614_v21 = vand.u32 255, %v610_v14 }
 0x4ed   :  { %v2601_v61 = vmul.f32 %v592_v57, %v536_v46  ;;  %v2128_v7 = vpop.eup %2127  ;;  %v595_v23 = vadd.f32 1.0, %v2126_v63 }
 0x4ee   :  { %v2603_v16 = vmul.f32 %v593_v62, %v537_v60  ;;  %v597_v3 = vadd.f32 1.0, %v2128_v7  ;;  %v2130_v11 = vpop.eup %2129  ;;  %v2742_v58 = vand.u32 15, %v614_v21  ;;  %v2744_v60 = vshra.s32 %v614_v21, 4 }
 0x4ef   :  { %659 = vrot.lane.b32.xlu1 %v2601_v61, %s2253_s3  ;;  %v2612_v34 = vmul.f32 %v595_v23, %v539_v8  ;;  %v599_v1 = vadd.f32 1.0, %v2130_v11  ;;  %v2132_v22 = vpop.eup %2131  ;;  %v613_v62 = vand.u32 255, %v2723_v44  ;;  %v651_v41 = vmul.f32 %v2525_v33, %v2601_v61 }
 0x4f0   :  { %663 = vrot.lane.b32.xlu0 %v2603_v16, %s2253_s3  ;;  %v2619_v27 = vmul.f32 %v597_v3, %v541_v26  ;;  %v594_v54 = vadd.f32 1.0, %v2132_v22  ;;  %v2134_v31 = vpop.eup %2133  ;;  %vm3853_vm3 = vcmp.ge.s32.totalorder %v2744_v60, 1  ;;  %vm3854_vm4 = vcmp.ge.s32.totalorder %v2742_v58, 1 }
 0x4f1   :  { %v2626_v25 = vmul.f32 %v599_v1, %v543_v19  ;;  %v598_v10 = vadd.f32 1.0, %v2134_v31  ;;  %v2760_v23 = vand.u32 15, %v613_v62  ;;  %v2762_v17 = vshra.s32 %v613_v62, 4  ;;  %vm2772_vm5 = vmand %vm3853_vm3, %vm3854_vm4 }
 0x4f2   :  { %v2633_v24 = vmul.f32 %v594_v54, %v538_v0  ;;  %vm3851_vm8 = vcmp.le.s32.totalorder %v2742_v58, 14 }
 0x4f3   :  { %661 = vrot.lane.b32.xlu1 %v2610_v12, %s2253_s3  ;;  %v2640_v20 = vmul.f32 %v598_v10, %v542_v49  ;;  %vm3858_vm6 = vcmp.ge.s32.totalorder %v2762_v17, 1  ;;  %vm3859_vm7 = vcmp.ge.s32.totalorder %v2760_v23, 1  ;;  %vm2808_vm11 = vmand %vm3853_vm3, %vm3851_vm8  ;;  %vm3852_vm12 = vcmp.le.s32.totalorder %v2760_v23, 14 }
 0x4f4   :  { %671 = vrot.lane.b32.xlu0 %v2612_v34, %s2253_s3  ;;  %vm2795_vm9 = vmand %vm3858_vm6, %vm3859_vm7  ;;  %v658_v31 = vmul.f32 %v2529_v50, %v2626_v25 }
 0x4f5   :  { %vm2834_vm13 = vmand %vm3858_vm6, %vm3852_vm12 }
 0x4f7   :  { %665 = vrot.lane.b32.xlu1 %v2619_v27, %s2253_s3 }
 0x4f8   :  { %728 = vrot.lane.b32.xlu0 %v2601_v61, %s2254_s4 }
 0x4fb   :  { %673 = vrot.lane.b32.xlu1 %v2626_v25, %s2253_s3 }
 0x4fc   :  { %732 = vrot.lane.b32.xlu0 %v2603_v16, %s2254_s4 }
 0x4ff   :  { %667 = vrot.lane.b32.xlu1 %v2633_v24, %s2253_s3 }
 0x500   :  { %740 = vrot.lane.b32.xlu0 %v2612_v34, %s2254_s4 }
 0x503   :  { %669 = vrot.lane.b32.xlu1 %v2640_v20, %s2253_s3 }
 0x504   :  { %785 = vrot.lane.b32.xlu0 %v2601_v61, %s2255_s5 }
 0x507   :  { %730 = vrot.lane.b32.xlu1 %v2610_v12, %s2254_s4 }
 0x508   :  { %789 = vrot.lane.b32.xlu0 %v2603_v16, %s2255_s5 }
 0x50b   :  { %734 = vrot.lane.b32.xlu1 %v2619_v27, %s2254_s4 }
 0x50c   :  { %797 = vrot.lane.b32.xlu0 %v2612_v34, %s2255_s5 }
 0x50f   :  { %742 = vrot.lane.b32.xlu1 %v2626_v25, %s2254_s4 }
 0x510   :  { %854 = vrot.lane.b32.xlu0 %v2601_v61, %s2231_s22 }
 0x513   :  { %787 = vrot.lane.b32.xlu1 %v2610_v12, %s2255_s5 }
 0x514   :  { %858 = vrot.lane.b32.xlu0 %v2603_v16, %s2231_s22 }
 0x517   :  { %791 = vrot.lane.b32.xlu1 %v2619_v27, %s2255_s5 }
 0x518   :  { %866 = vrot.lane.b32.xlu0 %v2612_v34, %s2231_s22 }
 0x51b   :  { %799 = vrot.lane.b32.xlu1 %v2626_v25, %s2255_s5 }
 0x51c   :  { %736 = vrot.lane.b32.xlu0 %v2633_v24, %s2254_s4 }
 0x51f   :  { %856 = vrot.lane.b32.xlu1 %v2610_v12, %s2231_s22 }
 0x520   :  { %793 = vrot.lane.b32.xlu0 %v2633_v24, %s2255_s5 }
 0x523   :  { %860 = vrot.lane.b32.xlu1 %v2619_v27, %s2231_s22 }
 0x524   :  { %862 = vrot.lane.b32.xlu0 %v2633_v24, %s2231_s22 }
 0x527   :  { %868 = vrot.lane.b32.xlu1 %v2626_v25, %s2231_s22 }
 0x528   :  { %919 = vrot.lane.b32.xlu0 %v2601_v61, %s2238_s30 }
 0x52b   :  { %738 = vrot.lane.b32.xlu1 %v2640_v20, %s2254_s4 }
 0x52c   :  { %923 = vrot.lane.b32.xlu0 %v2603_v16, %s2238_s30 }
 0x52f   :  { %795 = vrot.lane.b32.xlu1 %v2640_v20, %s2255_s5 }
 0x530   :  { %927 = vrot.lane.b32.xlu0 %v2633_v24, %s2238_s30 }
 0x533   :  { %864 = vrot.lane.b32.xlu1 %v2640_v20, %s2231_s22 }
 0x534   :  { %984 = vrot.lane.b32.xlu0 %v2601_v61, %s2256_s6 }
 0x537   :  { %921 = vrot.lane.b32.xlu1 %v2610_v12, %s2238_s30 }
 0x538   :  { %988 = vrot.lane.b32.xlu0 %v2603_v16, %s2256_s6 }
 0x53b   :  { %925 = vrot.lane.b32.xlu1 %v2619_v27, %s2238_s30 }
 0x53c   :  { %992 = vrot.lane.b32.xlu0 %v2633_v24, %s2256_s6 }
 0x53f   :  { %929 = vrot.lane.b32.xlu1 %v2640_v20, %s2238_s30 }
 0x540   :  { %931 = vrot.lane.b32.xlu0 %v2612_v34, %s2238_s30 }
 0x543   :  { %986 = vrot.lane.b32.xlu1 %v2610_v12, %s2256_s6 }
 0x544   :  { %996 = vrot.lane.b32.xlu0 %v2612_v34, %s2256_s6 }
 0x547   :  { %990 = vrot.lane.b32.xlu1 %v2619_v27, %s2256_s6 }
 0x548   :  { %1053 = vrot.lane.b32.xlu0 %v2601_v61, %s2257_s7 }
 0x54b   :  { %994 = vrot.lane.b32.xlu1 %v2640_v20, %s2256_s6 }
 0x54c   :  { %1057 = vrot.lane.b32.xlu0 %v2603_v16, %s2257_s7 }
 0x54f   :  { %933 = vrot.lane.b32.xlu1 %v2626_v25, %s2238_s30 }
 0x550   :  { %1061 = vrot.lane.b32.xlu0 %v2633_v24, %s2257_s7 }
 0x553   :  { %998 = vrot.lane.b32.xlu1 %v2626_v25, %s2256_s6 }
 0x554   :  { %1118 = vrot.lane.b32.xlu0 %v2601_v61, %s2258_s8 }
 0x557   :  { %1055 = vrot.lane.b32.xlu1 %v2610_v12, %s2257_s7 }
 0x558   :  { %1122 = vrot.lane.b32.xlu0 %v2603_v16, %s2258_s8 }
 0x55b   :  { %1059 = vrot.lane.b32.xlu1 %v2619_v27, %s2257_s7 }
 0x55c   :  { %1126 = vrot.lane.b32.xlu0 %v2633_v24, %s2258_s8 }
 0x55f   :  { %1063 = vrot.lane.b32.xlu1 %v2640_v20, %s2257_s7 }
 0x560   :  { %1065 = vrot.lane.b32.xlu0 %v2612_v34, %s2257_s7 }
 0x561   :  { %v660_v28 = vpop.permute.xlu1 %659 }
 0x562   :  { %v2725_v6 = vpop.permute.xlu0 %663 }
 0x563   :  { %1120 = vrot.lane.b32.xlu1 %v2610_v12, %s2258_s8  ;;  %v680_v26 = vsel %vm3860_vm2, %v660_v28, %v2725_v6 }
 0x564   :  { %1130 = vrot.lane.b32.xlu0 %v2612_v34, %s2258_s8  ;;  %v697_v19 = vsel %vm2772_vm5, %v680_v26, 0.0  ;;  %v612_v26 = vadd.s32 384, %v2723_v44 }
 0x565   :  { %v2732_v13 = vpop.permute.xlu1 %661  ;;  %v713_v10 = vmul.f32 %v2527_v47, %v697_v19 }
 0x566   :  { %v2734_v45 = vpop.permute.xlu0 %671 }
 0x567   :  { %1124 = vrot.lane.b32.xlu1 %v2619_v27, %s2258_s8  ;;  %v682_v0 = vsel %vm3860_vm2, %v2734_v45, %v660_v28  ;;  %v652_v28 = vmul.f32 %v2525_v33, %v2603_v16 }
 0x568   :  { %v696_v14 = vsel %vm2795_vm9, %v682_v0, 0.0 }
 0x569   :  { %v2738_v46 = vpop.permute.xlu1 %665  ;;  %v721_v40 = vadd.f32 %v713_v10, %v652_v28  ;;  %v712_v0 = vmul.f32 %v2527_v47, %v696_v14  ;;  %v616_v28 = vand.u32 255, %v612_v26 }
 0x56a   :  { %v729_v57 = vpop.permute.xlu0 %728 }
 0x56b   :  { %1128 = vrot.lane.b32.xlu1 %v2640_v20, %s2258_s8  ;;  %v720_v36 = vadd.f32 %v712_v0, %v651_v41 }
 0x56d   :  { %v2748_v63 = vpop.permute.xlu1 %673 }
 0x56e   :  { %v2750_v29 = vpop.permute.xlu0 %732 }
 0x56f   :  { %v749_v7 = vsel %vm744_vm1, %v729_v57, %v2750_v29  ;;  %1067 = vrot.lane.b32.xlu1 %v2626_v25, %s2257_s7 }
 0x570   :  { %v762_v41 = vsel %vm3853_vm3, %v749_v7, 0.0 }
 0x571   :  { %v2764_v8 = vpop.permute.xlu1 %667 }
 0x572   :  { %v2766_v3 = vpop.permute.xlu0 %740 }
 0x573   :  { %v751_v1 = vsel %vm744_vm1, %v2766_v3, %v729_v57  ;;  %1132 = vrot.lane.b32.xlu1 %v2626_v25, %s2258_s8  ;;  %v611_v57 = vadd.s32 256, %v2723_v44 }
 0x575   :  { %v2786_v22 = vpop.permute.xlu1 %669 }
 0x576   :  { %v786_v54 = vpop.permute.xlu0 %785 }
 0x579   :  { %v2812_v15 = vpop.permute.xlu1 %730 }
 0x57a   :  { %v2816_v21 = vpop.permute.xlu0 %789 }
 0x57b   :  { %v806_v62 = vsel %vm801_vm10, %v786_v54, %v2816_v21 }
 0x57c   :  { %v823_v19 = vsel %vm2808_vm11, %v806_v62, 0.0  ;;  %v615_v62 = vand.u32 255, %v611_v57 }
 0x57d   :  { %v839_v37 = vmul.f32 %v2539_v56, %v823_v19  ;;  %v2838_v38 = vpop.permute.xlu1 %734 }
 0x57e   :  { %v798_v39 = vpop.permute.xlu0 %797  ;;  %v2851_v43 = vand.u32 15, %v615_v62  ;;  %v2853_v32 = vshra.s32 %v615_v62, 4  ;;  %v761_v62 = vsel %vm3858_vm6, %v751_v1, 0.0 }
 0x57f   :  { %v2842_v10 = vadd.f32 %v839_v37, %v721_v40  ;;  %v808_v14 = vsel %vm801_vm10, %v798_v39, %v786_v54  ;;  %v2857_v37 = vand.u32 15, %v616_v28  ;;  %v2859_v40 = vshra.s32 %v616_v28, 4 }
 0x580   :  { %v822_v19 = vsel %vm2834_vm13, %v808_v14, 0.0  ;;  %vm627_vm15 = vcmp.ge.s32.totalorder %v2853_v32, 1  ;;  %vm635_vm0 = vcmp.ge.s32.totalorder %v2851_v43, 1  ;;  %v777_v30 = vmul.f32 %v2533_v51, %v761_v62 }
 0x581   :  { %3889 = vst [vmem:[#allocation22_spill] sm:$0xff] %v2842_v10  ;;  %v838_v42 = vmul.f32 %v2539_v56, %v822_v19  ;;  %v2849_v52 = vpop.permute.xlu1 %742  ;;  %vm628_vm8 = vcmp.ge.s32.totalorder %v2859_v40, 1  ;;  %vm3861_vm12 = vcmp.ge.s32.totalorder %v2857_v37, 1  ;;  %vm2882_vm3 = vmand %vm627_vm15, %vm635_vm0  ;;  %vm3863_vm6 = vcmp.le.s32.totalorder %v2851_v43, 14 }
 0x582   :  { %v855_v18 = vpop.permute.xlu0 %854  ;;  %v653_v62 = vmul.f32 %v2525_v33, %v2633_v24 }
 0x583   :  { %v2855_v61 = vadd.f32 %v838_v42, %v720_v36  ;;  %v778_v36 = vmul.f32 %v2533_v51, %v762_v41  ;;  %v676_v41 = vsel %vm3860_vm2, %v2764_v8, %v2734_v45 }
 0x585   :  { %3890 = vst [vmem:[#allocation23_spill] sm:$0xff] %v2855_v61  ;;  %v788_v54 = vpop.permute.xlu1 %787 }
 0x586   :  { %v859_v57 = vpop.permute.xlu0 %858 }
 0x587   :  { %v875_v26 = vsel %vm870_vm14, %v855_v18, %v859_v57 }
 0x588   :  { %v888_v42 = vsel %vm3854_vm4, %v875_v26, 0.0  ;;  %vm2895_vm4 = vmand %vm628_vm8, %vm3861_vm12  ;;  %v678_v26 = vsel %vm3860_vm2, %v2725_v6, %v2764_v8 }
 0x589   :  { %v904_v0 = vmul.f32 %v2542_v59, %v888_v42  ;;  %v2874_v7 = vpop.permute.xlu1 %791  ;;  %v698_v45 = vsel %vm2882_vm3, %v678_v26, 0.0  ;;  %v699_v6 = vsel %vm2895_vm4, %v676_v41, 0.0  ;;  %vm2937_vm2 = vmand %vm627_vm15, %vm3863_vm6  ;;  %v654_v41 = vmul.f32 %v2525_v33, %v2612_v34 }
 0x58a   :  { %v867_v28 = vpop.permute.xlu0 %866  ;;  %v2889_v19 = vsel %vm801_vm10, %v788_v54, %v2874_v7  ;;  %vm1134_vm6 = vcmp.lt.s32.totalorder %v2723_v44, 111 }
 0x58b   :  { %v2907_v42 = vadd.f32 %v904_v0, %v778_v36  ;;  %v877_v48 = vsel %vm870_vm14, %v867_v28, %v855_v18 }
 0x58c   :  { %v887_v4 = vsel %vm3859_vm7, %v877_v48, 0.0  ;;  %vm3862_vm7 = vcmp.le.s32.totalorder %v2857_v37, 14 }
 0x58d   :  { %3895 = vst [vmem:[#allocation24_spill] sm:$0xff] %v2907_v42  ;;  %v903_v10 = vmul.f32 %v2542_v59, %v887_v4  ;;  %v800_v61 = vpop.permute.xlu1 %799  ;;  %vm2947_vm12 = vmand %vm628_vm8, %vm3862_vm7  ;;  %vm3901_vm7 = vcmp.ge.s32.totalorder %v2857_v37, 1 }
 0x58e   :  { %v737_v8 = vpop.permute.xlu0 %736  ;;  %v2922_v18 = vsel %vm801_vm10, %v800_v61, %v788_v54  ;;  %v714_v54 = vmul.f32 %v2527_v47, %v698_v45 }
 0x58f   :  { %v2925_v48 = vadd.f32 %v903_v10, %v777_v30  ;;  %v745_v4 = vsel %vm744_vm1, %v737_v8, %v2766_v3  ;;  %v747_v36 = vsel %vm744_vm1, %v2750_v29, %v737_v8  ;;  %v715_v30 = vmul.f32 %v2527_v47, %v699_v6 }
 0x590   :  { %v722_v8 = vadd.f32 %v714_v54, %v653_v62  ;;  %v764_v34 = vsel %vm628_vm8, %v745_v4, 0.0  ;;  %v826_v49 = vsel %vm2834_vm13, %v2922_v18, 0.0  ;;  %vm3914_vm13 = vcmp.ge.s32.totalorder %v2744_v60, 1 }
 0x591   :  { %3896 = vst [vmem:[#allocation25_spill] sm:$0xff] %v2925_v48  ;;  %v857_v29 = vpop.permute.xlu1 %856  ;;  %v723_v42 = vadd.f32 %v715_v30, %v654_v41  ;;  %v780_v41 = vmul.f32 %v2533_v51, %v764_v34 }
 0x592   :  { %v794_v10 = vpop.permute.xlu0 %793 }
 0x593   :  { %v802_v26 = vsel %vm801_vm10, %v794_v10, %v798_v39  ;;  %v804_v47 = vsel %vm801_vm10, %v2816_v21, %v794_v10  ;;  %v763_v39 = vsel %vm627_vm15, %v747_v36, 0.0 }
 0x594   :  { %v824_v45 = vsel %vm2937_vm2, %v804_v47, 0.0  ;;  %v825_v6 = vsel %vm2947_vm12, %v802_v26, 0.0  ;;  %v779_v62 = vmul.f32 %v2533_v51, %v763_v39 }
 0x595   :  { %v840_v24 = vmul.f32 %v2539_v56, %v824_v45  ;;  %v841_v48 = vmul.f32 %v2539_v56, %v825_v6  ;;  %v861_v33 = vpop.permute.xlu1 %860 }
 0x596   :  { %v863_v21 = vpop.permute.xlu0 %862  ;;  %v2972_v10 = vsel %vm870_vm14, %v857_v29, %v861_v33 }
 0x597   :  { %v2974_v47 = vadd.f32 %v840_v24, %v722_v8  ;;  %v2976_v54 = vadd.f32 %v841_v48, %v723_v42  ;;  %v871_v30 = vsel %vm870_vm14, %v863_v21, %v867_v28  ;;  %v873_v56 = vsel %vm870_vm14, %v859_v57, %v863_v21 }
 0x598   :  { %v889_v36 = vsel %vm635_vm0, %v873_v56, 0.0  ;;  %v890_v4 = vsel %vm3901_vm7, %v871_v30, 0.0 }
 0x599   :  { %v905_v26 = vmul.f32 %v2542_v59, %v889_v36  ;;  %v906_v42 = vmul.f32 %v2542_v59, %v890_v4  ;;  %v869_v48 = vpop.permute.xlu1 %868 }
 0x59a   :  { %v2990_v45 = vpop.permute.xlu0 %919  ;;  %v2994_v57 = vsel %vm870_vm14, %v869_v48, %v857_v29 }
 0x59b   :  { %v2996_v28 = vadd.f32 %v905_v26, %v779_v62  ;;  %v2998_v6 = vadd.f32 %v906_v42, %v780_v41 }
 0x59d   :  { %v739_v8 = vpop.permute.xlu1 %738 }
 0x59e   :  { %v924_v24 = vpop.permute.xlu0 %923  ;;  %v746_v51 = vsel %vm744_vm1, %v739_v8, %v2849_v52  ;;  %v748_v59 = vsel %vm744_vm1, %v2838_v38, %v739_v8 }
 0x59f   :  { %v767_v30 = vsel %vm627_vm15, %v748_v59, 0.0  ;;  %v768_v56 = vsel %vm628_vm8, %v746_v51, 0.0  ;;  %vm3904_vm8 = vcmp.lt.s32.totalorder %v2723_v44, 17  ;;  %vm3865_vm15 = vcmp.lt.s32.totalorder %v2723_v44, 127 }
 0x5a0   :  { %v783_v26 = vmul.f32 %v2535_v53, %v767_v30  ;;  %v784_v42 = vmul.f32 %v2535_v53, %v768_v56  ;;  %v681_v56 = vsel %vm3904_vm8, %v2732_v13, %v2738_v46 }
 0x5a1   :  { %v796_v39 = vpop.permute.xlu1 %795 }
 0x5a2   :  { %v3006_v34 = vpop.permute.xlu0 %927  ;;  %v3010_v29 = vsel %vm801_vm10, %v796_v39, %v800_v61  ;;  %v3015_v21 = vsel %vm801_vm10, %v2874_v7, %v796_v39  ;;  %vm3905_vm10 = vmmov %vm3904_vm8 }
 0x5a3   :  { %v938_v1 = vsel %vm3865_vm15, %v924_v24, %v3006_v34  ;;  %v829_v0 = vsel %vm2947_vm12, %v3010_v29, 0.0 }
 0x5a5   :  { %v865_v36 = vpop.permute.xlu1 %864 }
 0x5a6   :  { %v3021_v4 = vpop.permute.xlu0 %984  ;;  %v872_v62 = vsel %vm870_vm14, %v865_v36, %v869_v48  ;;  %v874_v61 = vsel %vm870_vm14, %v861_v33, %v865_v36  ;;  %vm3906_vm14 = vmmov %vm3904_vm8 }
 0x5a7   :  { %v893_v41 = vsel %vm635_vm0, %v874_v61, 0.0  ;;  %v894_v7 = vsel %vm3901_vm7, %v872_v62, 0.0  ;;  %vm1000_vm7 = vcmp.lt.s32.totalorder %v2723_v44, 113 }
 0x5a8   :  { %v909_v8 = vmul.f32 %v2545_v2, %v893_v41  ;;  %v910_v39 = vmul.f32 %v2545_v2, %v894_v7 }
 0x5a9   :  { %v3035_v51 = vpop.permute.xlu1 %921 }
 0x5aa   :  { %v3037_v48 = vadd.f32 %v909_v8, %v783_v26  ;;  %v3039_v59 = vadd.f32 %v910_v39, %v784_v42  ;;  %v989_v33 = vpop.permute.xlu0 %988  ;;  %v701_v26 = vsel %vm2772_vm5, %v681_v56, 0.0  ;;  %v683_v42 = vsel %vm3905_vm10, %v2748_v63, %v2732_v13  ;;  %vm3907_vm5 = vmmov %vm3904_vm8 }
 0x5ab   :  { %v679_v8 = vsel %vm3906_vm14, %v2738_v46, %v2786_v22  ;;  %v656_v56 = vmul.f32 %v2529_v50, %v2619_v27  ;;  %v655_v13 = vmul.f32 %v2529_v50, %v2610_v12  ;;  %v657_v46 = vmul.f32 %v2529_v50, %v2640_v20 }
 0x5ac   :  { %3902 = vst [vmem:[#allocation26_spill] sm:$0xff] %v3037_v48  ;;  %3903 = vst [vmem:[#allocation27_spill] sm:$0xff] %v3039_v59  ;;  %v717_v59 = vmul.f32 %v2531_v35, %v701_v26  ;;  %v700_v48 = vsel %vm2795_vm9, %v683_v42, 0.0  ;;  %v677_v26 = vsel %vm3907_vm5, %v2786_v22, %v2748_v63  ;;  %v702_v42 = vsel %vm2882_vm3, %v679_v8, 0.0 }
 0x5ad   :  { %v3041_v36 = vpop.permute.xlu1 %925  ;;  %vm629_vm9 = vcmp.le.s32.totalorder %v2762_v17, 14  ;;  %v716_v12 = vmul.f32 %v2531_v35, %v700_v48  ;;  %v940_v27 = vsel %vm3865_vm15, %v2990_v45, %v924_v24  ;;  %vm630_vm8 = vcmp.le.s32.totalorder %v2744_v60, 14 }
 0x5ae   :  { %v3043_v61 = vpop.permute.xlu0 %992  ;;  %vm1069_vm10 = vcmp.lt.s32.totalorder %v2723_v44, 112  ;;  %v725_v50 = vadd.f32 %v717_v59, %v656_v56  ;;  %v703_v25 = vsel %vm2895_vm4, %v677_v26, 0.0  ;;  %v750_v63 = vsel %vm744_vm1, %v2812_v15, %v2838_v38 }
 0x5af   :  { %v752_v22 = vsel %vm744_vm1, %v2849_v52, %v2812_v15  ;;  %v718_v48 = vmul.f32 %v2531_v35, %v702_v42  ;;  %v827_v59 = vsel %vm2808_vm11, %v2889_v19, 0.0  ;;  %vm3908_vm3 = vcmp.ge.s32.totalorder %v2760_v23, 1 }
 0x5b0   :  { %vm3120_vm4 = vmand %vm629_vm9, %vm3908_vm3  ;;  %v1005_v52 = vsel %vm1000_vm7, %v3021_v4, %v989_v33  ;;  %vm3911_vm11 = vcmp.ge.s32.totalorder %v2742_v58, 1  ;;  %vm3913_vm5 = vcmp.le.s32.totalorder %v2760_v23, 14  ;;  %v724_v8 = vadd.f32 %v716_v12, %v655_v13 }
 0x5b1   :  { %v3045_v62 = vpop.permute.xlu1 %929  ;;  %v892_v15 = vsel %vm3911_vm11, %v2972_v10, 0.0  ;;  %vm3912_vm14 = vmmov %vm3908_vm3  ;;  %v952_v24 = vsel %vm3913_vm5, %v940_v27, 0.0  ;;  %vm632_vm3 = vcmp.le.s32.totalorder %v2859_v40, 14  ;;  %v719_v56 = vmul.f32 %v2531_v35, %v703_v25 }
 0x5b2   :  { %v3047_v30 = vpop.permute.xlu0 %931  ;;  %v891_v19 = vsel %vm3912_vm14, %v2994_v57, 0.0  ;;  %v766_v16 = vsel %vm3914_vm13, %v750_v63, 0.0  ;;  %vm3915_vm1 = vcmp.ge.s32.totalorder %v2762_v17, 1  ;;  %v843_v57 = vmul.f32 %v2537_v55, %v827_v59 }
 0x5b3   :  { %v765_v18 = vsel %vm3915_vm1, %v752_v22, 0.0  ;;  %vm3917_vm11 = vcmp.le.s32.totalorder %v2742_v58, 14  ;;  %v1021_v42 = vsel %vm3120_vm4, %v1005_v52, 0.0  ;;  %vm3918_vm14 = vcmp.ge.s32.totalorder %v2742_v58, 1 }
 0x5b4   :  { %v953_v26 = vsel %vm3917_vm11, %v938_v1, 0.0  ;;  %vm3157_vm5 = vmand %vm630_vm8, %vm3918_vm14  ;;  %v1003_v13 = vsel %vm1000_vm7, %v989_v33, %v3043_v61  ;;  %v842_v27 = vmul.f32 %v2537_v55, %v826_v49  ;;  %v908_v25 = vmul.f32 %v2545_v2, %v892_v15 }
 0x5b5   :  { %v3053_v41 = vpop.permute.xlu1 %986  ;;  %v907_v63 = vmul.f32 %v2545_v2, %v891_v19  ;;  %v968_v22 = vmul.f32 %v2553_v9, %v952_v24  ;;  %v3170_v59 = vadd.f32 %v718_v48, %v657_v46  ;;  %v782_v1 = vmul.f32 %v2535_v53, %v766_v16 }
 0x5b6   :  { %v3055_v7 = vpop.permute.xlu0 %996  ;;  %v781_v52 = vmul.f32 %v2535_v53, %v765_v18  ;;  %v828_v33 = vsel %vm2937_vm2, %v3015_v21, 0.0  ;;  %v1037_v49 = vmul.f32 %v2549_v5, %v1021_v42  ;;  %v1022_v15 = vsel %vm3157_vm5, %v1003_v13, 0.0  ;;  %v3925_v13 = vld [vmem:[#allocation25_spill] sm:$0xff] }
 0x5b7   :  { %v3186_v48 = vadd.f32 %v719_v56, %v658_v31  ;;  %v3188_v53 = vadd.f32 %v843_v57, %v725_v50  ;;  %v941_v21 = vsel %vm3865_vm15, %v3035_v51, %v3041_v36  ;;  %v850_v24 = vadd.f32 %v842_v27, %v724_v8  ;;  %v3922_v31 = vld [vmem:[#allocation23_spill] sm:$0xff] }
 0x5b8   :  { %v3199_v16 = vadd.f32 %v908_v25, %v782_v1  ;;  %v3201_v18 = vadd.f32 %v907_v63, %v781_v52  ;;  %v976_v56 = vadd.f32 %v968_v22, %v3922_v31  ;;  %v3205_v50 = vmul.f32 %v2537_v55, %v828_v33 }
 0x5b9   :  { %v3067_v39 = vpop.permute.xlu1 %990  ;;  %3921 = vst [vmem:[#allocation29_spill] sm:$0xff] %v3186_v48  ;;  %v1038_v3 = vmul.f32 %v2549_v5, %v1022_v15  ;;  %v3215_v42 = vmul.f32 %v2537_v55, %v829_v0  ;;  %v1045_v27 = vadd.f32 %v1037_v49, %v3925_v13  ;;  %vm3926_vm2 = vcmp.le.s32.totalorder %v2760_v23, 14  ;;  %v3937_v49 = vld [vmem:[#allocation24_spill] sm:$0xff] }
 0x5ba   :  { %v3073_v11 = vpop.permute.xlu0 %1053  ;;  %v956_v25 = vsel %vm3926_vm2, %v941_v21, 0.0  ;;  %vm3927_vm12 = vmmov %vm3926_vm2  ;;  %v936_v55 = vsel %vm3865_vm15, %v3006_v34, %v3047_v30  ;;  %v939_v23 = vsel %vm3865_vm15, %v3041_v36, %v3045_v62  ;;  %vm3930_vm13 = vcmp.le.s32.totalorder %v2853_v32, 14 }
 0x5bb   :  { %3924 = vst [vmem:[#allocation23_spill] sm:$0xff] %v3215_v42  ;;  %vm3224_vm1 = vmand %vm629_vm9, %vm3927_vm12  ;;  %v1001_v34 = vsel %vm1000_vm7, %v3043_v61, %v3055_v7  ;;  %vm3933_vm14 = vcmp.ge.s32.totalorder %v2857_v37, 1  ;;  %v1007_v36 = vsel %vm1000_vm7, %v3055_v7, %v3021_v4  ;;  %v1046_v15 = vadd.f32 %v1038_v3, %v3937_v49  ;;  %v3942_v3 = vld [vmem:[#allocation18_spill] sm:$0xff] }
 0x5bc   :  { %vm3246_vm11 = vmand %vm3930_vm13, %vm635_vm0  ;;  %v1006_v21 = vsel %vm1000_vm7, %v3053_v41, %v3067_v39  ;;  %vm3939_vm0 = vcmp.le.s32.totalorder %v2851_v43, 14  ;;  %vm3940_vm12 = vcmp.le.s32.totalorder %v2857_v37, 14  ;;  %vm3941_vm13 = vcmp.le.s32.totalorder %v2742_v58, 14 }
 0x5bd   :  { %v3097_v20 = vpop.permute.xlu1 %994  ;;  %vm3258_vm2 = vmand %vm632_vm3, %vm3933_vm14  ;;  %v954_v7 = vsel %vm3939_vm0, %v936_v55, 0.0 }
 0x5be   :  { %v1058_v14 = vpop.permute.xlu0 %1057  ;;  %vm3943_vm14 = vmmov %vm3941_vm13  ;;  %v1024_v55 = vsel %vm3258_vm2, %v1007_v36, 0.0 }
 0x5bf   :  { %v1074_v2 = vsel %vm1069_vm10, %v3073_v11, %v1058_v14 }
 0x5c0   :  { %v1086_v29 = vsel %vm629_vm9, %v1074_v2, 0.0  ;;  %v3938_v2 = vld [vmem:[#allocation16_spill] sm:$0xff] }
 0x5c1   :  { %v3146_v10 = vpop.permute.xlu1 %933  ;;  %v972_v0 = vmul.f32 %v3938_v2, %v956_v25  ;;  %v1023_v25 = vsel %vm3246_vm11, %v1001_v34, 0.0  ;;  %v970_v34 = vmul.f32 %v2553_v9, %v954_v7 }
 0x5c2   :  { %3916 = vst [vmem:[#allocation28_spill] sm:$0xff] %v3146_v10  ;;  %v3164_v12 = vpop.permute.xlu0 %1061  ;;  %v969_v10 = vmul.f32 %v2553_v9, %v953_v26  ;;  %v3923_v26 = vld [vmem:[#allocation22_spill] sm:$0xff] }
 0x5c3   :  { %v1072_v57 = vsel %vm1069_vm10, %v1058_v14, %v3164_v12  ;;  %v942_v14 = vsel %vm3865_vm15, %v3047_v30, %v2990_v45  ;;  %v3936_v30 = vld [vmem:[#allocation20_spill] sm:$0xff]  ;;  %vm3291_vm15 = vmand %vm630_vm8, %vm3943_vm14 }
 0x5c4   :  { %v977_v8 = vadd.f32 %v969_v10, %v3923_v26  ;;  %v1102_v52 = vmul.f32 %v3936_v30, %v1086_v29  ;;  %v1087_v33 = vsel %vm630_vm8, %v1072_v57, 0.0  ;;  %v955_v31 = vsel %vm3940_vm12, %v942_v14, 0.0 }
 0x5c5   :  { %v3184_v46 = vpop.permute.xlu1 %998  ;;  %v957_v29 = vsel %vm3941_vm13, %v939_v23, 0.0  ;;  %v1004_v14 = vsel %vm1000_vm7, %v3067_v39, %v3097_v20  ;;  %v1103_v58 = vmul.f32 %v3936_v30, %v1087_v33  ;;  %v971_v36 = vmul.f32 %v2553_v9, %v955_v31  ;;  %v3946_v9 = vld [vmem:[#allocation19_spill] sm:$0xff] }
 0x5c6   :  { %v3197_v19 = vpop.permute.xlu0 %1118  ;;  %v1110_v49 = vadd.f32 %v1102_v52, %v976_v56  ;;  %v973_v48 = vmul.f32 %v3938_v2, %v957_v29  ;;  %v1039_v33 = vmul.f32 %v2549_v5, %v1023_v25  ;;  %v1026_v38 = vsel %vm3157_vm5, %v1004_v14, 0.0  ;;  %vm3948_vm5 = vmmov %vm3939_vm0 }
 0x5c7   :  { %v1040_v52 = vmul.f32 %v2549_v5, %v1024_v55  ;;  %v1111_v31 = vadd.f32 %v1103_v58, %v977_v8  ;;  %v1042_v5 = vmul.f32 %v3946_v9, %v1026_v38  ;;  %vm3952_vm13 = vcmp.le.s32.totalorder %v2857_v37, 14 }
 0x5c8   :  { %vm3357_vm14 = vmand %vm632_vm3, %vm3952_vm13  ;;  %v1002_v60 = vsel %vm1000_vm7, %v3097_v20, %v3184_v46 }
 0x5c9   :  { %v3228_v22 = vpop.permute.xlu1 %1055  ;;  %v1048_v58 = vadd.f32 %v1040_v52, %v2998_v6  ;;  %v1050_v17 = vadd.f32 %v1042_v5, %v3199_v16 }
 0x5ca   :  { %v1123_v1 = vpop.permute.xlu0 %1122 }
 0x5cb   :  { %v1139_v61 = vsel %vm1134_vm6, %v3197_v19, %v1123_v1 }
 0x5cc   :  { %v1155_v4 = vsel %vm3224_vm1, %v1139_v61, 0.0  ;;  %v1025_v61 = vsel %vm3120_vm4, %v1006_v21, 0.0  ;;  %vm3947_vm4 = vcmp.le.s32.totalorder %v2853_v32, 14 }
 0x5cd   :  { %v1171_v57 = vmul.f32 %v3942_v3, %v1155_v4  ;;  %v1060_v13 = vpop.permute.xlu1 %1059  ;;  %v1041_v7 = vmul.f32 %v3946_v9, %v1025_v61  ;;  %vm3949_vm0 = vmmov %vm3947_vm4 }
 0x5ce   :  { %v1127_v23 = vpop.permute.xlu0 %1126  ;;  %vm3344_vm12 = vmand %vm3949_vm0, %vm3948_vm5 }
 0x5cf   :  { %v1179_v4 = vadd.f32 %v1171_v57, %v1045_v27  ;;  %v1137_v42 = vsel %vm1134_vm6, %v1123_v1, %v1127_v23  ;;  %v980_v1 = vadd.f32 %v972_v0, %v850_v24  ;;  %v3333_v24 = vadd.f32 %v973_v48, %v3188_v53 }
 0x5d0   :  { %v1156_v39 = vsel %vm3291_vm15, %v1137_v42, 0.0  ;;  %v1075_v42 = vsel %vm1069_vm10, %v3228_v22, %v1060_v13  ;;  %v979_v48 = vadd.f32 %v971_v36, %v2976_v54  ;;  %v1047_v53 = vadd.f32 %v1039_v33, %v2996_v28  ;;  %v3955_v36 = vld [vmem:[#allocation28_spill] sm:$0xff] }
 0x5d1   :  { %v3316_v21 = vadd.f32 %v1179_v4, %v1110_v49  ;;  %v1172_v56 = vmul.f32 %v3942_v3, %v1156_v39  ;;  %v3319_v27 = vpop.permute.xlu1 %1063  ;;  %v1049_v49 = vadd.f32 %v1041_v7, %v3201_v18  ;;  %v3958_v39 = vld [vmem:[#allocation17_spill] sm:$0xff] }
 0x5d2   :  { %v1066_v29 = vpop.permute.xlu0 %1065  ;;  %v1073_v4 = vsel %vm1069_vm10, %v1060_v13, %v3319_v27 }
 0x5d3   :  { %v1180_v57 = vadd.f32 %v1172_v56, %v1046_v15  ;;  %v1070_v35 = vsel %vm1069_vm10, %v3164_v12, %v1066_v29  ;;  %v1076_v25 = vsel %vm1069_vm10, %v1066_v29, %v3073_v11  ;;  %v978_v11 = vadd.f32 %v970_v34, %v2974_v47 }
 0x5d4   :  { %v1088_v8 = vsel %vm3947_vm4, %v1070_v35, 0.0  ;;  %v1089_v15 = vsel %vm632_vm3, %v1076_v25, 0.0  ;;  %v1090_v47 = vsel %vm629_vm9, %v1075_v42, 0.0  ;;  %vm3956_vm9 = vcmp.lt.s32.totalorder %v2723_v44, 127  ;;  %v3959_v35 = vld [vmem:[#allocation21_spill] sm:$0xff] }
 0x5d5   :  { %v3351_v0 = vadd.f32 %v1180_v57, %v1111_v31  ;;  %v3361_v14 = vpop.permute.xlu1 %1120  ;;  %v1104_v54 = vmul.f32 %v3936_v30, %v1088_v8  ;;  %v1105_v28 = vmul.f32 %v3936_v30, %v1089_v15  ;;  %v937_v30 = vsel %vm3956_vm9, %v3045_v62, %v3955_v36  ;;  %vm3957_vm4 = vmmov %vm3956_vm9 }
 0x5d6   :  { %v1131_v61 = vpop.permute.xlu0 %1130  ;;  %v1091_v52 = vsel %vm630_vm8, %v1073_v4, 0.0  ;;  %v1008_v42 = vsel %vm1000_vm7, %v3184_v46, %v3053_v41  ;;  %v1205_v15 = vmul.f32 %v3316_v21, %v3316_v21  ;;  %vm3960_vm7 = vmmov %vm3952_vm13  ;;  %vm3974_vm8 = vcmask 1043456  }
 0x5d7   :  { %v1135_v34 = vsel %vm1134_vm6, %v1127_v23, %v1131_v61  ;;  %v1141_v6 = vsel %vm1134_vm6, %v1131_v61, %v3197_v19  ;;  %v943_v23 = vsel %vm3957_vm4, %v3955_v36, %v3035_v51  ;;  %v1106_v19 = vmul.f32 %v3958_v39, %v1090_v47 }
 0x5d8   :  { %v1157_v18 = vsel %vm3344_vm12, %v1135_v34, 0.0  ;;  %v1158_v13 = vsel %vm3357_vm14, %v1141_v6, 0.0  ;;  %v1112_v56 = vadd.f32 %v1104_v54, %v978_v11  ;;  %v1113_v62 = vadd.f32 %v1105_v28, %v979_v48 }
 0x5d9   :  { %v1173_v16 = vmul.f32 %v3942_v3, %v1157_v18  ;;  %v1174_v33 = vmul.f32 %v3942_v3, %v1158_v13  ;;  %v1125_v38 = vpop.permute.xlu1 %1124  ;;  %v1206_v57 = vmul.f32 %v3351_v0, %v3351_v0  ;;  %v958_v3 = vsel %vm3948_vm5, %v937_v30, 0.0 }
 0x5da   :  { %v1140_v7 = vsel %vm1134_vm6, %v3361_v14, %v1125_v38  ;;  %v1195_v43 = vadd.f32 %v3351_v0, %v3316_v21  ;;  %v1114_v11 = vadd.f32 %v1106_v19, %v980_v1  ;;  %v1107_v20 = vmul.f32 %v3958_v39, %v1091_v52  ;;  %v3963_v19 = vld [vmem:[#allocation23_spill] sm:$0xff] }
 0x5db   :  { %v1181_v31 = vadd.f32 %v1173_v16, %v1047_v53  ;;  %v1182_v29 = vadd.f32 %v1174_v33, %v1048_v58  ;;  %v1159_v51 = vsel %vm3224_vm1, %v1140_v7, 0.0  ;;  %v1213_v47 = vadd.f32 %v1206_v57, %v1205_v15  ;;  %v3964_v7 = vld [vmem:[#allocation26_spill] sm:$0xff] }
 0x5dc   :  { %v1175_v25 = vmul.f32 %v3959_v35, %v1159_v51  ;;  %v959_v54 = vsel %vm3960_vm7, %v943_v23, 0.0  ;;  %v974_v1 = vmul.f32 %v3938_v2, %v958_v3  ;;  %v1028_v26 = vsel %vm3258_vm2, %v1008_v42, 0.0 }
 0x5dd   :  { %v3413_v63 = vadd.f32 %v1181_v31, %v1112_v56  ;;  %v3415_v5 = vadd.f32 %v1182_v29, %v1113_v62  ;;  %v1129_v8 = vpop.permute.xlu1 %1128  ;;  %v1115_v36 = vadd.f32 %v1107_v20, %v3333_v24  ;;  %v975_v10 = vmul.f32 %v3938_v2, %v959_v54  ;;  %v3962_v2 = vld [vmem:[#allocation29_spill] sm:$0xff]  ;;  %v3965_v29 = vld [vmem:[#allocation27_spill] sm:$0xff] }
 0x5de   :  { %v1183_v48 = vadd.f32 %v1175_v25, %v1049_v49  ;;  %v1138_v41 = vsel %vm1134_vm6, %v1125_v38, %v1129_v8  ;;  %v1027_v49 = vsel %vm3246_vm11, %v1002_v60, 0.0  ;;  %v853_v32 = vadd.f32 %v3963_v19, %v3962_v2  ;;  %v3503_v2 = vld [vmem:[%s3828_s1 + $0x8] sm:$0xff] }
 0x5df   :  { %v1160_v46 = vsel %vm3291_vm15, %v1138_v41, 0.0  ;;  %v1196_v53 = vadd.f32 %v1195_v43, %v3413_v63  ;;  %v1207_v58 = vmul.f32 %v3413_v63, %v3413_v63  ;;  %vm3961_vm15 = vmmov %vm3949_vm0  ;;  %v1208_v24 = vmul.f32 %v3415_v5, %v3415_v5 }
 0x5e0   :  { %v3432_v28 = vadd.f32 %v1183_v48, %v1114_v11  ;;  %v1176_v61 = vmul.f32 %v3959_v35, %v1160_v46  ;;  %v983_v52 = vadd.f32 %v975_v10, %v853_v32  ;;  %v2259_v46 = vmov 17  }
 0x5e1   :  { %v1068_v4 = vpop.permute.xlu1 %1067  ;;  %v1197_v34 = vadd.f32 %v1196_v53, %v3415_v5  ;;  %v1214_v6 = vadd.f32 %v1213_v47, %v1207_v58  ;;  %2087 = vset.pattern.permute.xlu1 %v2259_v46 }
 0x5e2   :  { %v1184_v37 = vadd.f32 %v1176_v61, %v1050_v17  ;;  %v1071_v30 = vsel %vm1069_vm10, %v3319_v27, %v1068_v4  ;;  %v1077_v18 = vsel %vm1069_vm10, %v1068_v4, %v3228_v22  ;;  %v1043_v17 = vmul.f32 %v3946_v9, %v1027_v49  ;;  %vm3975_vm10 = vmmov %vm3974_vm8 }
 0x5e3   :  { %v1092_v45 = vsel %vm3961_vm15, %v1071_v30, 0.0  ;;  %v1093_v13 = vsel %vm632_vm3, %v1077_v18, 0.0  ;;  %1198 = vadd.xlane.f32.xlu0 %v1197_v34  ;;  %v1044_v27 = vmul.f32 %v3946_v9, %v1028_v26  ;;  %v852_v22 = vadd.f32 %v3205_v50, %v3170_v59  ;;  %vm3976_vm3 = vmmov %vm3974_vm8 }
 0x5e4   :  { %v3456_v23 = vadd.f32 %v1184_v37, %v1115_v36  ;;  %v1108_v16 = vmul.f32 %v3958_v39, %v1092_v45  ;;  %v1215_v33 = vadd.f32 %v1214_v6, %v1208_v24  ;;  %v1109_v38 = vmul.f32 %v3958_v39, %v1093_v13  ;;  %v3496_v24 = vld [vmem:[%s3828_s1] sm:$0xff]  ;;  %vm3977_vm1 = vmmov %vm3976_vm3 }
 0x5e5   :  { %v1133_v40 = vpop.permute.xlu1 %1132  ;;  %v982_v62 = vadd.f32 %v974_v1, %v852_v22  ;;  %v1051_v31 = vadd.f32 %v1043_v17, %v3964_v7  ;;  %v1052_v39 = vadd.f32 %v1044_v27, %v3965_v29  ;;  %v2260_v6 = vmov 18   ;;  %vm3978_vm11 = vmmov %vm3977_vm1 }
 0x5e6   :  { %v1136_v56 = vsel %vm1134_vm6, %v1129_v8, %v1133_v40  ;;  %v1142_v9 = vsel %vm1134_vm6, %v1133_v40, %v3361_v14  ;;  %v1117_v44 = vadd.f32 %v1109_v38, %v983_v52  ;;  %v1210_v12 = vmul.f32 %v3456_v23, %v3456_v23  ;;  %2088 = vset.pattern.permute.xlu0 %v2260_v6  ;;  %vm3979_vm2 = vmmov %vm3977_vm1 }
 0x5e7   :  { %v1161_v59 = vsel %vm3344_vm12, %v1136_v56, 0.0  ;;  %v1162_v50 = vsel %vm3357_vm14, %v1142_v9, 0.0  ;;  %1216 = vadd.xlane.f32.xlu0 %v1215_v33  ;;  %v1116_v3 = vadd.f32 %v1108_v16, %v982_v62  ;;  %v1200_v25 = vadd.f32 %v3456_v23, %v3432_v28  ;;  %vm3980_vm0 = vmmov %vm3977_vm1 }
 0x5e8   :  { %v1177_v51 = vmul.f32 %v3959_v35, %v1161_v59  ;;  %v1178_v57 = vmul.f32 %v3959_v35, %v1162_v50  ;;  %v1209_v8 = vmul.f32 %v3432_v28, %v3432_v28  ;;  %vm1369_vm6 = vcmask 162968   ;;  %vm3981_vm12 = vmmov %vm3980_vm0 }
 0x5ea   :  { %v1185_v14 = vadd.f32 %v1177_v51, %v1051_v31  ;;  %v1186_v60 = vadd.f32 %v1178_v57, %v1052_v39  ;;  %v1218_v15 = vadd.f32 %v1210_v12, %v1209_v8 }
 0x5ec   :  { %v3479_v42 = vadd.f32 %v1185_v14, %v1116_v3  ;;  %v3481_v55 = vadd.f32 %v1186_v60, %v1117_v44 }
 0x5ee   :  { %v1201_v43 = vadd.f32 %v1200_v25, %v3479_v42  ;;  %v1211_v35 = vmul.f32 %v3479_v42, %v3479_v42  ;;  %v1212_v20 = vmul.f32 %v3481_v55, %v3481_v55 }
 0x5f0   :  { %v1202_v11 = vadd.f32 %v1201_v43, %v3481_v55  ;;  %v1219_v48 = vadd.f32 %v1218_v15, %v1211_v35 }
 0x5f2   :  { %1203 = vadd.xlane.f32.xlu1 %v1202_v11  ;;  %v1220_v41 = vadd.f32 %v1219_v48, %v1212_v20 }
 0x5f4   :  { %1221 = vadd.xlane.f32.xlu0 %v1220_v41 }
 0x670   :  { %v1199_v53 = vpop.xlane.xlu0 %1198 }
 0x671   :  { %v1223_v58 = vmul.f32 0.001953125, %v1199_v53 }
 0x673   :  { %v1227_v54 = vmul.f32 %v1223_v58, %v1223_v58 }
 0x674   :  { %v1217_v47 = vpop.xlane.xlu0 %1216 }
 0x675   :  { %v1225_v1 = vmul.f32 0.001953125, %v1217_v47 }
 0x677   :  { %v1229_v61 = vsub.f32 %v1225_v1, %v1227_v54 }
 0x679   :  { %v1231_v49 = vmax.f32 %v1229_v61, 0.0 }
 0x67b   :  { %v1233_v26 = vadd.f32 1e-05, %v1231_v49 }
 0x67d   :  { %2135 = vrsqrt.f32 %v1233_v26 }
 0x67f   :  { %v1204_v4 = vpop.xlane.xlu1 %1203 }
 0x680   :  { %v1224_v34 = vmul.f32 0.001953125, %v1204_v4 }
 0x681   :  { %v1222_v36 = vpop.xlane.xlu0 %1221 }
 0x682   :  { %v1228_v37 = vmul.f32 %v1224_v34, %v1224_v34  ;;  %v1226_v30 = vmul.f32 0.001953125, %v1222_v36 }
 0x684   :  { %v1230_v18 = vsub.f32 %v1226_v30, %v1228_v37 }
 0x686   :  { %v1232_v10 = vmax.f32 %v1230_v18, 0.0 }
 0x687   :  { %v2136_v45 = vpop.eup %2135 }
 0x688   :  { %v1234_v13 = vadd.f32 1e-05, %v1232_v10  ;;  %v1237_v17 = vmul.f32 %v3496_v24, %v2136_v45 }
 0x68a   :  { %2137 = vrsqrt.f32 %v1234_v13  ;;  %v1239_v27 = vmul.f32 %v1237_v17, %v1223_v58 }
 0x68c   :  { %1243 = vrot.lane.b32.xlu1 %v1239_v27, %s2231_s22 }
 0x690   :  { %1253 = vperm.xlu1 %2087, %v1237_v17  }
 0x694   :  { %v2138_v22 = vpop.eup %2137 }
 0x695   :  { %v1238_v19 = vmul.f32 %v3503_v2, %v2138_v22 }
 0x697   :  { %1258 = vperm.xlu1 %2087, %v1238_v19   ;;  %v1240_v32 = vmul.f32 %v1238_v19, %v1224_v34 }
 0x699   :  { %1245 = vrot.lane.b32.xlu0 %v1240_v32, %s2231_s22 }
 0x69b   :  { %2089 = vset.pattern.permute.xlu1 %v2260_v6 }
 0x6fe   :  { %v1244_v16 = vpop.permute.xlu1 %1243 }
 0x6ff   :  { %v1249_v40 = vsub.f32 %v3496_v24, %v1244_v16 }
 0x701   :  { %1271 = vperm.xlu0 %2088, %v1249_v40  }
 0x70b   :  { %v1246_v33 = vpop.permute.xlu0 %1245 }
 0x70c   :  { %v1250_v38 = vsub.f32 %v3503_v2, %v1246_v33 }
 0x70e   :  { %1276 = vperm.xlu1 %2089, %v1250_v38  }
 0x70f   :  { %v1254_v56 = vpop.permute.xlu1 %1253 }
 0x710   :  { %v1261_v9 = vmul.f32 %v1254_v56, %v3316_v21  ;;  %v1262_v62 = vmul.f32 %v1254_v56, %v3351_v0  ;;  %v1263_v52 = vmul.f32 %v1254_v56, %v3413_v63  ;;  %v1264_v59 = vmul.f32 %v1254_v56, %v3415_v5 }
 0x716   :  { %v1259_v60 = vpop.permute.xlu1 %1258 }
 0x717   :  { %v1265_v11 = vmul.f32 %v1259_v60, %v3432_v28  ;;  %v1266_v20 = vmul.f32 %v1259_v60, %v3456_v23  ;;  %v1267_v48 = vmul.f32 %v1259_v60, %v3479_v42  ;;  %v1268_v41 = vmul.f32 %v1259_v60, %v3481_v55 }
 0x780   :  { %v1272_v50 = vpop.permute.xlu0 %1271 }
 0x781   :  { %v1279_v7 = vadd.f32 %v1272_v50, %v1261_v9  ;;  %v1280_v31 = vadd.f32 %v1272_v50, %v1262_v62  ;;  %v3513_v29 = vadd.f32 %v1272_v50, %v1263_v52  ;;  %v3515_v39 = vadd.f32 %v1272_v50, %v1264_v59 }
 0x783   :  { %v1295_v51 = vmul.f32 %v1279_v7, %v1279_v7  ;;  %v1296_v57 = vmul.f32 %v1280_v31, %v1280_v31  ;;  %v1297_v3 = vmul.f32 %v3513_v29, %v3513_v29  ;;  %v1298_v21 = vmul.f32 %v3515_v39, %v3515_v39 }
 0x784   :  { %v1287_v19 = vmul.f32 0.5, %v1279_v7  ;;  %v1288_v62 = vmul.f32 0.5, %v1280_v31 }
 0x785   :  { %v1303_v0 = vmul.f32 %v1295_v51, %v1279_v7  ;;  %v1304_v44 = vmul.f32 %v1296_v57, %v1280_v31  ;;  %v1305_v63 = vmul.f32 %v1297_v3, %v3513_v29  ;;  %v1306_v12 = vmul.f32 %v1298_v21, %v3515_v39 }
 0x787   :  { %v1311_v5 = vmul.f32 0.044715, %v1303_v0  ;;  %v1312_v14 = vmul.f32 0.044715, %v1304_v44  ;;  %v1313_v15 = vmul.f32 0.044715, %v1305_v63 }
 0x788   :  { %v1314_v53 = vmul.f32 0.044715, %v1306_v12 }
 0x789   :  { %v1319_v25 = vadd.f32 %v1311_v5, %v1279_v7  ;;  %v1320_v8 = vadd.f32 %v1312_v14, %v1280_v31  ;;  %v1321_v61 = vadd.f32 %v1313_v15, %v3513_v29 }
 0x78a   :  { %v1322_v23 = vadd.f32 %v1314_v53, %v3515_v39  ;;  %v1290_v53 = vmul.f32 0.5, %v3515_v39  ;;  %v2262_v39 = vmov 22  }
 0x78b   :  { %v1327_v43 = vmul.f32 0.7978846, %v1319_v25  ;;  %v1328_v35 = vmul.f32 0.7978846, %v1320_v8  ;;  %v1329_v36 = vmul.f32 0.7978846, %v1321_v61 }
 0x78c   :  { %v1330_v45 = vmul.f32 0.7978846, %v1322_v23  ;;  %v2263_v61 = vmov 24   ;;  %v2268_v23 = vmov 25  }
 0x78d   :  { %v1277_v46 = vpop.permute.xlu1 %1276  ;;  %2139 = vtanh.f32 %v1327_v43 }
 0x78e   :  { %v1283_v58 = vadd.f32 %v1277_v46, %v1265_v11  ;;  %v1284_v47 = vadd.f32 %v1277_v46, %v1266_v20  ;;  %v1285_v54 = vadd.f32 %v1277_v46, %v1267_v48  ;;  %v1286_v1 = vadd.f32 %v1277_v46, %v1268_v41 }
 0x78f   :  { %2141 = vtanh.f32 %v1328_v35  ;;  %v1289_v46 = vmul.f32 0.5, %v3513_v29  ;;  %v2261_v29 = vmov 21  }
 0x790   :  { %v1299_v49 = vmul.f32 %v1283_v58, %v1283_v58  ;;  %v1300_v26 = vmul.f32 %v1284_v47, %v1284_v47  ;;  %v1301_v4 = vmul.f32 %v1285_v54, %v1285_v54  ;;  %v1302_v28 = vmul.f32 %v1286_v1, %v1286_v1  ;;  %2090 = vset.pattern.permute.xlu1 %v2261_v29 }
 0x791   :  { %2143 = vtanh.f32 %v1329_v36  ;;  %v1293_v0 = vmul.f32 0.5, %v1285_v54  ;;  %v1294_v63 = vmul.f32 0.5, %v1286_v1  ;;  %v1291_v12 = vmul.f32 0.5, %v1283_v58 }
 0x792   :  { %v1307_v34 = vmul.f32 %v1299_v49, %v1283_v58  ;;  %v1308_v42 = vmul.f32 %v1300_v26, %v1284_v47  ;;  %v1309_v6 = vmul.f32 %v1301_v4, %v1285_v54  ;;  %v1310_v55 = vmul.f32 %v1302_v28, %v1286_v1 }
 0x793   :  { %2145 = vtanh.f32 %v1330_v45  ;;  %v1292_v25 = vmul.f32 0.5, %v1284_v47  ;;  %v2264_v49 = vmov 26   ;;  %v2265_v26 = vmov 28  }
 0x794   :  { %v1317_v37 = vmul.f32 0.044715, %v1309_v6  ;;  %v1318_v30 = vmul.f32 0.044715, %v1310_v55  ;;  %v1315_v18 = vmul.f32 0.044715, %v1307_v34 }
 0x795   :  { %v1316_v10 = vmul.f32 0.044715, %v1308_v42  ;;  %v2266_v4 = vmov 23   ;;  %v2267_v28 = vmov 29   ;;  %v2269_v34 = vmov 31  }
 0x796   :  { %v1325_v13 = vadd.f32 %v1317_v37, %v1285_v54  ;;  %v1326_v17 = vadd.f32 %v1318_v30, %v1286_v1  ;;  %v1323_v27 = vadd.f32 %v1315_v18, %v1283_v58  ;;  %2092 = vset.pattern.permute.xlu0 %v2266_v4  ;;  %v2270_v42 = vmov 27  }
 0x797   :  { %v2140_v22 = vpop.eup %2139  ;;  %v1324_v32 = vadd.f32 %v1316_v10, %v1284_v47  ;;  %v2271_v6 = vmov 32   ;;  %v2272_v55 = vmov 30   ;;  %v2273_v36 = vmov 19  }
 0x798   :  { %v1343_v16 = vadd.f32 1.0, %v2140_v22  ;;  %v1333_v40 = vmul.f32 0.7978846, %v1325_v13  ;;  %v1334_v33 = vmul.f32 0.7978846, %v1326_v17 }
 0x799   :  { %v2142_v38 = vpop.eup %2141  ;;  %v1331_v56 = vmul.f32 0.7978846, %v1323_v27  ;;  %v1332_v9 = vmul.f32 0.7978846, %v1324_v32 }
 0x79a   :  { %v1344_v52 = vadd.f32 1.0, %v2142_v38  ;;  %v3529_v59 = vmul.f32 %v1343_v16, %v1287_v19  ;;  %2147 = vtanh.f32 %v1333_v40 }
 0x79b   :  { %2149 = vtanh.f32 %v1334_v33  ;;  %v2144_v51 = vpop.eup %2143 }
 0x79c   :  { %v3531_v50 = vmul.f32 %v1344_v52, %v1288_v62  ;;  %2151 = vtanh.f32 %v1331_v56  ;;  %v1345_v15 = vadd.f32 1.0, %v2144_v51 }
 0x79d   :  { %2153 = vtanh.f32 %v1332_v9  ;;  %v2146_v57 = vpop.eup %2145 }
 0x79e   :  { %v1359_v7 = vadd.f32 %v3531_v50, %v3529_v59  ;;  %v1346_v11 = vadd.f32 1.0, %v2146_v57  ;;  %v3549_v47 = vmul.f32 %v1345_v15, %v1289_v46 }
 0x7a0   :  { %1360 = vadd.xlane.f32.xlu1 %v1359_v7  ;;  %v3551_v54 = vmul.f32 %v1346_v11, %v1290_v53 }
 0x7a2   :  { %v1422_v1 = vadd.f32 %v3551_v54, %v3549_v47 }
 0x7a4   :  { %v2148_v3 = vpop.eup %2147 }
 0x7a5   :  { %v2150_v21 = vpop.eup %2149  ;;  %v1349_v44 = vadd.f32 1.0, %v2148_v3 }
 0x7a6   :  { %v2152_v31 = vpop.eup %2151  ;;  %v1350_v5 = vadd.f32 1.0, %v2150_v21 }
 0x7a7   :  { %v2154_v14 = vpop.eup %2153  ;;  %v3535_v60 = vmul.f32 %v1349_v44, %v1293_v0  ;;  %v1347_v8 = vadd.f32 1.0, %v2152_v31 }
 0x7a8   :  { %v3537_v43 = vmul.f32 %v1350_v5, %v1294_v63  ;;  %v1348_v35 = vadd.f32 1.0, %v2154_v14 }
 0x7a9   :  { %v3539_v20 = vmul.f32 %v1347_v8, %v1291_v12 }
 0x7aa   :  { %v1425_v48 = vadd.f32 %v3537_v43, %v3535_v60  ;;  %v3543_v41 = vmul.f32 %v1348_v35, %v1292_v25 }
 0x7ac   :  { %1426 = vadd.xlane.f32.xlu1 %v1425_v48  ;;  %v1362_v58 = vadd.f32 %v3543_v41, %v3539_v20 }
 0x7ae   :  { %1363 = vadd.xlane.f32.xlu0 %v1362_v58 }
 0x7b2   :  { %1423 = vadd.xlane.f32.xlu0 %v1422_v1 }
 0x7bd   :  { %1390 = vrot.lane.b32.xlu1 %v3503_v2, %s2238_s30 }
 0x7c1   :  { %1495 = vperm.xlu1 %2090, %v3496_v24  }
 0x7c5   :  { %2091 = vset.pattern.permute.xlu1 %v2262_v39 }
 0x7c6   :  { %1519 = vperm.xlu1 %2091, %v3496_v24  }
 0x7c8   :  { %1388 = vrot.lane.b32.xlu0 %v3496_v24, %s2238_s30 }
 0x7ca   :  { %2093 = vset.pattern.permute.xlu1 %v2263_v61 }
 0x7cb   :  { %1571 = vperm.xlu1 %2093, %v3496_v24  }
 0x7cc   :  { %1543 = vperm.xlu0 %2092, %v3496_v24  }
 0x7cf   :  { %2095 = vset.pattern.permute.xlu1 %v2264_v49 }
 0x7d0   :  { %1627 = vperm.xlu1 %2095, %v3496_v24   ;;  %2094 = vset.pattern.permute.xlu0 %v2268_v23 }
 0x7d1   :  { %1599 = vperm.xlu0 %2094, %v3496_v24  }
 0x7d4   :  { %2097 = vset.pattern.permute.xlu1 %v2265_v26 }
 0x7d5   :  { %1683 = vperm.xlu1 %2097, %v3496_v24   ;;  %2096 = vset.pattern.permute.xlu0 %v2270_v42 }
 0x7d6   :  { %1655 = vperm.xlu0 %2096, %v3496_v24  }
 0x7d9   :  { %2098 = vset.pattern.permute.xlu1 %v2267_v28 }
 0x7da   :  { %1711 = vperm.xlu1 %2098, %v3496_v24   ;;  %2099 = vset.pattern.permute.xlu0 %v2272_v55 }
 0x7db   :  { %1739 = vperm.xlu0 %2099, %v3496_v24  }
 0x7de   :  { %2100 = vset.pattern.permute.xlu1 %v2269_v34 }
 0x7df   :  { %1767 = vperm.xlu1 %2100, %v3496_v24   ;;  %2103 = vset.pattern.permute.xlu0 %v2273_v36 }
 0x7e3   :  { %2101 = vset.pattern.permute.xlu1 %v2271_v6 }
 0x7e4   :  { %1795 = vperm.xlu1 %2101, %v3496_v24  }
 0x7e8   :  { %2102 = vset.pattern.permute.xlu1 %v2273_v36 }
 0x82d   :  { %v1361_v37 = vpop.xlane.xlu1 %1360 }
 0x82e   :  { %v1365_v30 = vmul.f32 0.00390625, %v1361_v37 }
 0x830   :  { %v1367_v45 = vmul.f32 %v3496_v24, %v1365_v30 }
 0x832   :  { %v1370_v19 = vsel %vm1369_vm6, %v1367_v45, 0.0 }
 0x839   :  { %v1427_v18 = vpop.xlane.xlu1 %1426 }
 0x83a   :  { %v1429_v17 = vmul.f32 0.00390625, %v1427_v18 }
 0x83b   :  { %v1364_v10 = vpop.xlane.xlu0 %1363 }
 0x83c   :  { %v1366_v13 = vmul.f32 0.00390625, %v1364_v10  ;;  %v1431_v16 = vmul.f32 %v3503_v2, %v1429_v17 }
 0x83d   :  { %v1391_v61 = vpop.permute.xlu1 %1390 }
 0x83e   :  { %v1368_v27 = vmul.f32 %v3503_v2, %v1366_v13  ;;  %v1433_v9 = vsel %vm1369_vm6, %v1431_v16, 0.0 }
 0x83f   :  { %v1424_v22 = vpop.xlane.xlu0 %1423 }
 0x840   :  { %v1371_v32 = vsel %vm1369_vm6, %v1368_v27, 0.0  ;;  %v1428_v40 = vmul.f32 0.00390625, %v1424_v22 }
 0x841   :  { %v1372_v33 = vadd.f32 %v1371_v32, %v1370_v19 }
 0x842   :  { %v1430_v38 = vmul.f32 %v3496_v24, %v1428_v40 }
 0x843   :  { %v1373_v56 = vrot.slane %v1372_v33, 4  ;;  %v1389_v39 = vpop.permute.xlu0 %1388 }
 0x844   :  { %v1432_v62 = vsel %vm1369_vm6, %v1430_v38, 0.0 }
 0x845   :  { %v1374_v52 = vadd.f32 %v1373_v56, %v1372_v33  ;;  %v1434_v7 = vadd.f32 %v1433_v9, %v1432_v62  ;;  %v2274_v56 = vmov 33   ;;  %v2275_v9 = vmov 34  }
 0x846   :  { %v2276_v62 = vmov 36  }
 0x847   :  { %v1375_v51 = vrot.slane %v1374_v52, 2  ;;  %v1435_v57 = vrot.slane %v1434_v7, 4 }
 0x849   :  { %v1376_v3 = vadd.f32 %v1375_v51, %v1374_v52  ;;  %v1436_v21 = vadd.f32 %v1435_v57, %v1434_v7  ;;  %v2277_v52 = vmov 35   ;;  %v1496_v7 = vpop.permute.xlu1 %1495 }
 0x84b   :  { %v1377_v0 = vrot.slane %v1376_v3, 1  ;;  %v1437_v44 = vrot.slane %v1436_v21, 2 }
 0x84d   :  { %v1378_v31 = vadd.f32 %v1377_v0, %v1376_v3  ;;  %v1438_v63 = vadd.f32 %v1437_v44, %v1436_v21  ;;  %v3579_v51 = vpop.permute.xlu1 %1519  ;;  %v1544_v0 = vpop.permute.xlu0 %1543 }
 0x84f   :  { %v1439_v5 = vrot.slane %v1438_v63, 1  ;;  %v1380_v14 = vmul.f32 %v1378_v31, %v1378_v31  ;;  %v1379_v1 = vmul.f32 0.5, %v1378_v31 }
 0x851   :  { %v1440_v2 = vadd.f32 %v1439_v5, %v1438_v63  ;;  %v1381_v12 = vmul.f32 %v1380_v14, %v1378_v31  ;;  %v3581_v57 = vpop.permute.xlu1 %1571 }
 0x853   :  { %v1382_v25 = vmul.f32 0.044715, %v1381_v12  ;;  %v1442_v8 = vmul.f32 %v1440_v2, %v1440_v2  ;;  %v1441_v28 = vmul.f32 0.5, %v1440_v2 }
 0x855   :  { %v1383_v35 = vadd.f32 %v1382_v25, %v1378_v31  ;;  %v1443_v15 = vmul.f32 %v1442_v8, %v1440_v2  ;;  %v3583_v3 = vpop.permute.xlu1 %1627  ;;  %v1600_v31 = vpop.permute.xlu0 %1599  ;;  %v3966_v8 = vld [vmem:[#allocation11_spill] sm:$0xff] }
 0x857   :  { %v1384_v11 = vmul.f32 0.7978846, %v1383_v35  ;;  %v1444_v48 = vmul.f32 0.044715, %v1443_v15 }
 0x859   :  { %2155 = vtanh.f32 %v1384_v11  ;;  %v1445_v46 = vadd.f32 %v1444_v48, %v1440_v2  ;;  %v3585_v21 = vpop.permute.xlu1 %1683  ;;  %v1656_v5 = vpop.permute.xlu0 %1655  ;;  %v3967_v11 = vld [vmem:[#allocation10_spill] sm:$0xff] }
 0x85b   :  { %v1446_v53 = vmul.f32 0.7978846, %v1445_v46 }
 0x85d   :  { %2157 = vtanh.f32 %v1446_v53  ;;  %v3587_v44 = vpop.permute.xlu1 %1711  ;;  %v3593_v2 = vpop.permute.xlu0 %1739 }
 0x861   :  { %v3589_v63 = vpop.permute.xlu1 %1767 }
 0x863   :  { %v2156_v58 = vpop.eup %2155 }
 0x864   :  { %v1386_v29 = vadd.f32 1.0, %v2156_v58 }
 0x865   :  { %v3591_v14 = vpop.permute.xlu1 %1795 }
 0x866   :  { %v1387_v49 = vmul.f32 %v1386_v29, %v1379_v1  ;;  %v3968_v1 = vld [vmem:[#allocation12_spill] sm:$0xff]  ;;  %v3969_v29 = vld [vmem:[#allocation15_spill] sm:$0xff] }
 0x867   :  { %v2158_v26 = vpop.eup %2157 }
 0x868   :  { %v1394_v4 = vmul.f32 %v1389_v39, %v1387_v49  ;;  %v1448_v23 = vadd.f32 1.0, %v2158_v26  ;;  %v1395_v34 = vmul.f32 %v1391_v61, %v1387_v49 }
 0x86a   :  { %v2003_v42 = vmul.f32 -1.442695, %v1394_v4  ;;  %v1449_v6 = vmul.f32 %v1448_v23, %v1441_v28  ;;  %v2004_v55 = vmul.f32 -1.442695, %v1395_v34 }
 0x86c   :  { %2159 = vpow2.f32 %v2003_v42  ;;  %v1450_v36 = vmul.f32 %v1449_v6, %v1389_v39  ;;  %v1451_v37 = vmul.f32 %v1449_v6, %v1391_v61 }
 0x86d   :  { %2161 = vpow2.f32 %v2004_v55 }
 0x86e   :  { %v2005_v30 = vmul.f32 -1.442695, %v1450_v36  ;;  %v2006_v18 = vmul.f32 -1.442695, %v1451_v37 }
 0x870   :  { %2163 = vpow2.f32 %v2005_v30 }
 0x871   :  { %2165 = vpow2.f32 %v2006_v18 }
 0x876   :  { %v2160_v10 = vpop.eup %2159 }
 0x877   :  { %v2162_v45 = vpop.eup %2161  ;;  %v1402_v13 = vadd.f32 1.0, %v2160_v10 }
 0x878   :  { %v1403_v17 = vadd.f32 1.0, %v2162_v45 }
 0x879   :  { %2167 = vrcp.f32 %v1402_v13 }
 0x87a   :  { %v2164_v27 = vpop.eup %2163  ;;  %2169 = vrcp.f32 %v1403_v17 }
 0x87b   :  { %v2166_v22 = vpop.eup %2165  ;;  %v1458_v19 = vadd.f32 1.0, %v2164_v27 }
 0x87c   :  { %v1459_v32 = vadd.f32 1.0, %v2166_v22 }
 0x87d   :  { %2171 = vrcp.f32 %v1458_v19 }
 0x87e   :  { %2173 = vrcp.f32 %v1459_v32 }
 0x883   :  { %v2168_v16 = vpop.eup %2167 }
 0x884   :  { %1410 = vperm.xlu1 %2102, %v2168_v16   ;;  %v2170_v40 = vpop.eup %2169 }
 0x887   :  { %v2172_v33 = vpop.eup %2171 }
 0x888   :  { %1466 = vperm.xlu0 %2103, %v2172_v33   ;;  %1415 = vperm.xlu1 %2102, %v2170_v40   ;;  %v2174_v38 = vpop.eup %2173 }
 0x88c   :  { %2104 = vset.pattern.permute.xlu0 %v2274_v56  ;;  %1471 = vperm.xlu1 %2102, %v2174_v38  }
 0x88d   :  { %1823 = vperm.xlu0 %2104, %v3496_v24  }
 0x890   :  { %2105 = vset.pattern.permute.xlu1 %v2275_v9 }
 0x891   :  { %2107 = vset.pattern.permute.xlu0 %v2276_v62  ;;  %1851 = vperm.xlu1 %2105, %v3496_v24  }
 0x892   :  { %1907 = vperm.xlu0 %2107, %v3496_v24  }
 0x895   :  { %2106 = vset.pattern.permute.xlu1 %v2277_v52 }
 0x896   :  { %1879 = vperm.xlu1 %2106, %v3496_v24  }
 0x903   :  { %v1411_v24 = vpop.permute.xlu1 %1410 }
 0x904   :  { %v3596_v12 = vmul.f32 %v1411_v24, %v3529_v59  ;;  %v3599_v25 = vmul.f32 %v1411_v24, %v3531_v50 }
 0x906   :  { %v1481_v35 = vrot.slane %v3596_v12, %v3966_v8  ;;  %v1485_v15 = vrot.slane %v3599_v25, %v3966_v8  ;;  %v1529_v48 = vrot.slane %v3596_v12, %v3967_v11  ;;  %v1533_v46 = vrot.slane %v3599_v25, %v3967_v11 }
 0x907   :  { %v1467_v53 = vpop.permute.xlu0 %1466  ;;  %v1416_v58 = vpop.permute.xlu1 %1415  ;;  %v1585_v59 = vrot.slane %v3596_v12, %v3968_v1  ;;  %v1589_v50 = vrot.slane %v3599_v25, %v3968_v1  ;;  %v1641_v39 = vrot.slane %v3596_v12, %v3969_v29  ;;  %v1645_v61 = vrot.slane %v3599_v25, %v3969_v29 }
 0x908   :  { %v3618_v49 = vmul.f32 %v1467_v53, %v3549_v47  ;;  %v3621_v26 = vmul.f32 %v1467_v53, %v3551_v54  ;;  %v3624_v4 = vmul.f32 %v1416_v58, %v3539_v20  ;;  %v3627_v28 = vmul.f32 %v1416_v58, %v3543_v41 }
 0x909   :  { %v1498_v23 = vmul.f32 %v1496_v7, %v1481_v35  ;;  %v1499_v34 = vmul.f32 %v1496_v7, %v1485_v15  ;;  %v1546_v42 = vmul.f32 %v1544_v0, %v1529_v48  ;;  %v1547_v6 = vmul.f32 %v1544_v0, %v1533_v46 }
 0x90a   :  { %v1489_v55 = vrot.slane %v3618_v49, %v3966_v8  ;;  %v1493_v47 = vrot.slane %v3621_v26, %v3966_v8  ;;  %v1537_v54 = vrot.slane %v3618_v49, %v3967_v11  ;;  %v1541_v20 = vrot.slane %v3621_v26, %v3967_v11 }
 0x90b   :  { %v1472_v36 = vpop.permute.xlu1 %1471  ;;  %v1593_v41 = vrot.slane %v3618_v49, %v3968_v1  ;;  %v1597_v37 = vrot.slane %v3621_v26, %v3968_v1  ;;  %v1649_v30 = vrot.slane %v3618_v49, %v3969_v29  ;;  %v1653_v18 = vrot.slane %v3621_v26, %v3969_v29 }
 0x90c   :  { %v3646_v10 = vmul.f32 %v1472_v36, %v3535_v60  ;;  %v3649_v45 = vmul.f32 %v1472_v36, %v3537_v43  ;;  %v1548_v13 = vmul.f32 %v1544_v0, %v1537_v54  ;;  %v1549_v17 = vmul.f32 %v1544_v0, %v1541_v20 }
 0x90d   :  { %v1604_v27 = vmul.f32 %v1600_v31, %v1593_v41  ;;  %v1605_v22 = vmul.f32 %v1600_v31, %v1597_v37  ;;  %v1660_v19 = vmul.f32 %v1656_v5, %v1649_v30  ;;  %v1661_v32 = vmul.f32 %v1656_v5, %v1653_v18  ;;  %v1824_v30 = vpop.permute.xlu0 %1823 }
 0x90e   :  { %v1500_v16 = vmul.f32 %v1496_v7, %v1489_v55  ;;  %v1501_v40 = vmul.f32 %v1496_v7, %v1493_v47  ;;  %v1550_v33 = vadd.f32 %v1546_v42, %v1498_v23  ;;  %v1551_v38 = vadd.f32 %v1547_v6, %v1499_v34 }
 0x90f   :  { %v1602_v56 = vmul.f32 %v1600_v31, %v1585_v59  ;;  %v1603_v9 = vmul.f32 %v1600_v31, %v1589_v50  ;;  %v1658_v62 = vmul.f32 %v1656_v5, %v1641_v39  ;;  %v1659_v52 = vmul.f32 %v1656_v5, %v1645_v61 }
 0x910   :  { %v1552_v24 = vadd.f32 %v1548_v13, %v1500_v16  ;;  %v1553_v60 = vadd.f32 %v1549_v17, %v1501_v40  ;;  %v1697_v43 = vrot.slane %v3624_v4, %v3966_v8  ;;  %v1701_v0 = vrot.slane %v3627_v28, %v3966_v8  ;;  %v3970_v16 = vld [vmem:[#allocation9_spill] sm:$0xff] }
 0x911   :  { %v1606_v35 = vadd.f32 %v1602_v56, %v1550_v33  ;;  %v1607_v15 = vadd.f32 %v1603_v9, %v1551_v38  ;;  %v1705_v48 = vrot.slane %v3646_v10, %v3966_v8  ;;  %v1709_v7 = vrot.slane %v3649_v45, %v3966_v8 }
 0x912   :  { %v1608_v46 = vadd.f32 %v1604_v27, %v1552_v24  ;;  %v1609_v31 = vadd.f32 %v1605_v22, %v1553_v60  ;;  %v1714_v5 = vmul.f32 %v3587_v44, %v1697_v43  ;;  %v1715_v53 = vmul.f32 %v3587_v44, %v1701_v0  ;;  %v3971_v0 = vld [vmem:[#allocation8_spill] sm:$0xff] }
 0x913   :  { %v1662_v58 = vadd.f32 %v1658_v62, %v1606_v35  ;;  %v1663_v59 = vadd.f32 %v1659_v52, %v1607_v15  ;;  %v1716_v50 = vmul.f32 %v3587_v44, %v1705_v48  ;;  %v1717_v39 = vmul.f32 %v3587_v44, %v1709_v7 }
 0x914   :  { %v1664_v61 = vadd.f32 %v1660_v19, %v1608_v46  ;;  %v1665_v23 = vadd.f32 %v1661_v32, %v1609_v31  ;;  %v1753_v34 = vrot.slane %v3624_v4, %v3967_v11  ;;  %v1757_v8 = vrot.slane %v3627_v28, %v3967_v11  ;;  %v3972_v46 = vld [vmem:[#allocation13_spill] sm:$0xff] }
 0x915   :  { %v1718_v42 = vadd.f32 %v1714_v5, %v1662_v58  ;;  %v1719_v6 = vadd.f32 %v1715_v53, %v1663_v59  ;;  %v1761_v55 = vrot.slane %v3646_v10, %v3967_v11  ;;  %v1765_v47 = vrot.slane %v3649_v45, %v3967_v11 }
 0x916   :  { %v1720_v54 = vadd.f32 %v1716_v50, %v1664_v61  ;;  %v1721_v20 = vadd.f32 %v1717_v39, %v1665_v23  ;;  %v1770_v44 = vmul.f32 %v3589_v63, %v1753_v34  ;;  %v1771_v36 = vmul.f32 %v3589_v63, %v1757_v8 }
 0x917   :  { %v1809_v41 = vrot.slane %v3624_v4, %v3968_v1  ;;  %v1813_v37 = vrot.slane %v3627_v28, %v3968_v1  ;;  %v1772_v18 = vmul.f32 %v3589_v63, %v1761_v55  ;;  %v1773_v13 = vmul.f32 %v3589_v63, %v1765_v47 }
 0x918   :  { %v1817_v11 = vrot.slane %v3646_v10, %v3968_v1  ;;  %v1821_v17 = vrot.slane %v3649_v45, %v3968_v1  ;;  %v3683_v27 = vadd.f32 %v1770_v44, %v1718_v42  ;;  %v3685_v22 = vadd.f32 %v1771_v36, %v1719_v6 }
 0x919   :  { %v3687_v19 = vadd.f32 %v1772_v18, %v1720_v54  ;;  %v3689_v32 = vadd.f32 %v1773_v13, %v1721_v20  ;;  %v1505_v40 = vrot.slane %v3596_v12, %v3970_v16  ;;  %v1509_v63 = vrot.slane %v3599_v25, %v3970_v16  ;;  %v3973_v54 = vld [vmem:[#allocation14_spill] sm:$0xff] }
 0x91a   :  { %v3695_v33 = vmul.f32 %v1824_v30, %v1809_v41  ;;  %v3697_v38 = vmul.f32 %v1824_v30, %v1813_v37  ;;  %v1513_v1 = vrot.slane %v3618_v49, %v3970_v16  ;;  %v1517_v56 = vrot.slane %v3621_v26, %v3970_v16 }
 0x91b   :  { %v3703_v9 = vmul.f32 %v1824_v30, %v1817_v11  ;;  %v3705_v62 = vmul.f32 %v1824_v30, %v1821_v17  ;;  %v1522_v52 = vmul.f32 %v3579_v51, %v1505_v40  ;;  %v1523_v24 = vmul.f32 %v3579_v51, %v1509_v63 }
 0x91c   :  { %v1524_v60 = vmul.f32 %v3579_v51, %v1513_v1  ;;  %v1525_v43 = vmul.f32 %v3579_v51, %v1517_v56  ;;  %v1557_v35 = vrot.slane %v3596_v12, %v3971_v0  ;;  %v1561_v15 = vrot.slane %v3599_v25, %v3971_v0 }
 0x91d   :  { %v1565_v48 = vrot.slane %v3618_v49, %v3971_v0  ;;  %v1569_v7 = vrot.slane %v3621_v26, %v3971_v0  ;;  %v1613_v31 = vrot.slane %v3596_v12, %v3972_v46  ;;  %v1617_v5 = vrot.slane %v3599_v25, %v3972_v46 }
 0x91e   :  { %v1574_v51 = vmul.f32 %v3581_v57, %v1557_v35  ;;  %v1575_v53 = vmul.f32 %v3581_v57, %v1561_v15  ;;  %v1621_v58 = vrot.slane %v3618_v49, %v3972_v46  ;;  %v1625_v59 = vrot.slane %v3621_v26, %v3972_v46 }
 0x91f   :  { %v1576_v50 = vmul.f32 %v3581_v57, %v1565_v48  ;;  %v1577_v39 = vmul.f32 %v3581_v57, %v1569_v7  ;;  %v1630_v61 = vmul.f32 %v3583_v3, %v1613_v31  ;;  %v1631_v23 = vmul.f32 %v3583_v3, %v1617_v5 }
 0x920   :  { %v1578_v34 = vadd.f32 %v1574_v51, %v1522_v52  ;;  %v1579_v8 = vadd.f32 %v1575_v53, %v1523_v24  ;;  %v1632_v42 = vmul.f32 %v3583_v3, %v1621_v58  ;;  %v1633_v6 = vmul.f32 %v3583_v3, %v1625_v59  ;;  %v1852_v53 = vpop.permute.xlu1 %1851 }
 0x921   :  { %v1580_v55 = vadd.f32 %v1576_v50, %v1524_v60  ;;  %v1581_v47 = vadd.f32 %v1577_v39, %v1525_v43  ;;  %v1669_v20 = vrot.slane %v3596_v12, %v3973_v54  ;;  %v1673_v44 = vrot.slane %v3599_v25, %v3973_v54 }
 0x922   :  { %v1634_v36 = vadd.f32 %v1630_v61, %v1578_v34  ;;  %v1635_v57 = vadd.f32 %v1631_v23, %v1579_v8  ;;  %v1677_v41 = vrot.slane %v3618_v49, %v3973_v54  ;;  %v1681_v37 = vrot.slane %v3621_v26, %v3973_v54 }
 0x923   :  { %v1636_v30 = vadd.f32 %v1632_v42, %v1580_v55  ;;  %v1637_v18 = vadd.f32 %v1633_v6, %v1581_v47  ;;  %v1686_v3 = vmul.f32 %v3585_v21, %v1669_v20  ;;  %v1687_v13 = vmul.f32 %v3585_v21, %v1673_v44 }
 0x924   :  { %v1688_v11 = vmul.f32 %v3585_v21, %v1677_v41  ;;  %v1689_v12 = vmul.f32 %v3585_v21, %v1681_v37  ;;  %v1725_v25 = vrot.slane %v3624_v4, %v3970_v16  ;;  %v1729_v17 = vrot.slane %v3627_v28, %v3970_v16  ;;  %v1908_v41 = vpop.permute.xlu0 %1907 }
 0x925   :  { %v1690_v49 = vadd.f32 %v1686_v3, %v1634_v36  ;;  %v1691_v40 = vadd.f32 %v1687_v13, %v1635_v57  ;;  %v1733_v26 = vrot.slane %v3646_v10, %v3970_v16  ;;  %v1737_v63 = vrot.slane %v3649_v45, %v3970_v16 }
 0x926   :  { %v1692_v1 = vadd.f32 %v1688_v11, %v1636_v30  ;;  %v1693_v56 = vadd.f32 %v1689_v12, %v1637_v18  ;;  %v1742_v52 = vmul.f32 %v3593_v2, %v1725_v25  ;;  %v1743_v21 = vmul.f32 %v3593_v2, %v1729_v17 }
 0x927   :  { %v1744_v24 = vmul.f32 %v3593_v2, %v1733_v26  ;;  %v1745_v60 = vmul.f32 %v3593_v2, %v1737_v63  ;;  %v1781_v43 = vrot.slane %v3624_v4, %v3971_v0  ;;  %v1785_v35 = vrot.slane %v3627_v28, %v3971_v0 }
 0x928   :  { %v1746_v15 = vadd.f32 %v1742_v52, %v1690_v49  ;;  %v1747_v48 = vadd.f32 %v1743_v21, %v1691_v40  ;;  %v1789_v16 = vrot.slane %v3646_v10, %v3971_v0  ;;  %v1793_v7 = vrot.slane %v3649_v45, %v3971_v0 }
 0x929   :  { %v1748_v31 = vadd.f32 %v1744_v24, %v1692_v1  ;;  %v1749_v5 = vadd.f32 %v1745_v60, %v1693_v56  ;;  %v1798_v51 = vmul.f32 %v3591_v14, %v1781_v43  ;;  %v1799_v2 = vmul.f32 %v3591_v14, %v1785_v35 }
 0x92a   :  { %v1800_v58 = vmul.f32 %v3591_v14, %v1789_v16  ;;  %v1801_v59 = vmul.f32 %v3591_v14, %v1793_v7  ;;  %v1837_v50 = vrot.slane %v3624_v4, %v3972_v46  ;;  %v1841_v39 = vrot.slane %v3627_v28, %v3972_v46 }
 0x92b   :  { %v1802_v61 = vadd.f32 %v1798_v51, %v1746_v15  ;;  %v1803_v23 = vadd.f32 %v1799_v2, %v1747_v48  ;;  %v1845_v0 = vrot.slane %v3646_v10, %v3972_v46  ;;  %v1849_v34 = vrot.slane %v3649_v45, %v3972_v46 }
 0x92c   :  { %v1804_v8 = vadd.f32 %v1800_v58, %v1748_v31  ;;  %v1805_v42 = vadd.f32 %v1801_v59, %v1749_v5  ;;  %v1854_v6 = vmul.f32 %v1852_v53, %v1837_v50  ;;  %v1855_v55 = vmul.f32 %v1852_v53, %v1841_v39 }
 0x92d   :  { %v1830_v14 = vadd.f32 %v3695_v33, %v3683_v27  ;;  %v1831_v47 = vadd.f32 %v3697_v38, %v3685_v22  ;;  %v1856_v20 = vmul.f32 %v1852_v53, %v1845_v0  ;;  %v1857_v44 = vmul.f32 %v1852_v53, %v1849_v34  ;;  %v1880_v38 = vpop.permute.xlu1 %1879 }
 0x92e   :  { %v1832_v36 = vadd.f32 %v3703_v9, %v3687_v19  ;;  %v1833_v57 = vadd.f32 %v3705_v62, %v3689_v32  ;;  %v1893_v46 = vrot.slane %v3624_v4, %v3973_v54  ;;  %v1897_v37 = vrot.slane %v3627_v28, %v3973_v54 }
 0x92f   :  { %v1860_v30 = vadd.f32 %v1856_v20, %v1804_v8  ;;  %v1861_v27 = vadd.f32 %v1857_v44, %v1805_v42  ;;  %v1901_v22 = vrot.slane %v3646_v10, %v3973_v54  ;;  %v1905_v33 = vrot.slane %v3649_v45, %v3973_v54 }
 0x930   :  { %v1858_v19 = vadd.f32 %v1854_v6, %v1802_v61  ;;  %v1859_v9 = vadd.f32 %v1855_v55, %v1803_v23  ;;  %v1865_v32 = vrot.slane %v3624_v4, %v3969_v29  ;;  %v1869_v62 = vrot.slane %v3627_v28, %v3969_v29 }
 0x931   :  { %v1912_v18 = vmul.f32 %v1908_v41, %v1901_v22  ;;  %v1913_v3 = vmul.f32 %v1908_v41, %v1905_v33  ;;  %v1873_v13 = vrot.slane %v3646_v10, %v3969_v29  ;;  %v1877_v11 = vrot.slane %v3649_v45, %v3969_v29 }
 0x932   :  { %v1910_v12 = vmul.f32 %v1908_v41, %v1893_v46  ;;  %v1911_v25 = vmul.f32 %v1908_v41, %v1897_v37  ;;  %v1882_v54 = vmul.f32 %v1880_v38, %v1865_v32  ;;  %v1883_v17 = vmul.f32 %v1880_v38, %v1869_v62 }
 0x933   :  { %v1916_v49 = vadd.f32 %v1912_v18, %v1860_v30  ;;  %v1917_v40 = vadd.f32 %v1913_v3, %v1861_v27  ;;  %v1884_v26 = vmul.f32 %v1880_v38, %v1873_v13  ;;  %v1885_v63 = vmul.f32 %v1880_v38, %v1877_v11 }
 0x934   :  { %v1914_v4 = vadd.f32 %v1910_v12, %v1858_v19  ;;  %v1915_v1 = vadd.f32 %v1911_v25, %v1859_v9  ;;  %v1886_v56 = vadd.f32 %v1882_v54, %v1830_v14  ;;  %v1887_v28 = vadd.f32 %v1883_v17, %v1831_v47  ;;  %v2180_v12 = vld [vmem:[#allocation2] sm:$0xff]  ;;  %v2181_v54 = vld [vmem:[#allocation2 + $0x8] sm:$0xff] }
 0x935   :  { %v1888_v52 = vadd.f32 %v1884_v26, %v1832_v36  ;;  %v1889_v21 = vadd.f32 %v1885_v63, %v1833_v57  ;;  %v2278_v0 = vmov 37   ;;  %v2279_v44 = vmov 38   ;;  %v2179_v57 = vld [vmem:[%s3828_s1] sm:$0xff]  ;;  %s2280_s1 = smov [#allocation5]  }
 0x936   :  { %v1918_v24 = vadd.f32 %v1914_v4, %v1886_v56  ;;  %v1919_v60 = vadd.f32 %v1915_v1, %v1887_v28  ;;  %2108 = vset.pattern.permute.xlu0 %v2278_v0  ;;  %2109 = vset.pattern.permute.xlu1 %v2279_v44  ;;  %s1994_s15 = sshll.u32 %s2280_s1, 4  ;;  %s1995_s15 = int_to_ptr.vmem [resolvable:$true] %s1994_s15 }
 0x937   :  { %v1920_v10 = vadd.f32 %v1916_v49, %v1888_v52  ;;  %v1921_v43 = vadd.f32 %v1917_v40, %v1889_v21  ;;  %s2204_s16 = scalar_lea.vmem %s1995_s15, 256  ;;  %p2209_p9 = scmp.lt.s32.totalorder %s1995_s15, %s1995_s15 }
 0x938   :  { %v1922_v29 = vsel %vm3974_vm8, %v1918_v24, 0.0  ;;  %v1923_v45 = vsel %vm3975_vm10, %v1919_v60, 0.0  ;;  %v1931_v35 = vmul.f32 %v1918_v24, %v1918_v24  ;;  %v1932_v15 = vmul.f32 %v1919_v60, %v1919_v60  ;;  %p2205_p8 = scmp.ne.s32.totalorder %s1995_s15, %s2204_s16  ;;  %p2210_p10 = scmp.lt.s32.totalorder %s2204_s16, %s2204_s16 }
 0x939   :  { %v1924_v48 = vadd.f32 %v1923_v45, %v1922_v29  ;;  %v1925_v16 = vsel %vm3976_vm3, %v1920_v10, 0.0  ;;  %v1933_v7 = vmul.f32 %v1920_v10, %v1920_v10  ;;  %v1934_v31 = vmul.f32 %v1921_v43, %v1921_v43 }
 0x93a   :  { %v1935_v5 = vsel %vm3977_vm1, %v1931_v35, 0.0  ;;  %v1936_v51 = vsel %vm3978_vm11, %v1932_v15, 0.0  ;;  %v1927_v59 = vsel %vm3980_vm0, %v1921_v43, 0.0  ;;  %p2211_p11 = por %p2210_p10, %p2209_p9 }
 0x93b   :  { %v1926_v2 = vadd.f32 %v1925_v16, %v1924_v48  ;;  %v1937_v53 = vadd.f32 %v1936_v51, %v1935_v5  ;;  %v1938_v58 = vsel %vm3979_vm2, %v1933_v7, 0.0  ;;  %v1940_v61 = vsel %vm3981_vm12, %v1934_v31, 0.0 }
 0x93c   :  { %p2212_p12 = pnand %p2211_p11, %p2205_p8 }
 0x93d   :  { %v1928_v50 = vadd.f32 %v1927_v59, %v1926_v2  ;;  %v1939_v39 = vadd.f32 %v1938_v58, %v1937_v53 }
 0x93f   :  { %1929 = vadd.xlane.f32.xlu1 %v1928_v50  ;;  %v1941_v23 = vadd.f32 %v1940_v61, %v1939_v39 }
 0x941   :  { %1942 = vadd.xlane.f32.xlu0 %v1941_v23 }
 0x9cc   :  { %v1930_v34 = vpop.xlane.xlu1 %1929 }
 0x9cd   :  { %v1944_v8 = vmul.f32 0.001953125, %v1930_v34 }
 0x9ce   :  { %v1943_v42 = vpop.xlane.xlu0 %1942 }
 0x9cf   :  { %v1946_v6 = vmul.f32 %v1944_v8, %v1944_v8  ;;  %v1945_v55 = vmul.f32 0.001953125, %v1943_v42 }
 0x9d1   :  { %v1947_v14 = vsub.f32 %v1945_v55, %v1946_v6 }
 0x9d3   :  { %v1948_v47 = vmax.f32 %v1947_v14, 0.0 }
 0x9d5   :  { %v1949_v20 = vadd.f32 1e-05, %v1948_v47 }
 0x9d7   :  { %2175 = vrsqrt.f32 %v1949_v20 }
 0x9e1   :  { %v2176_v36 = vpop.eup %2175 }
 0x9e2   :  { %v1951_v41 = vmul.f32 %v2179_v57, %v2176_v36 }
 0x9e4   :  { %1960 = vperm.xlu0 %2108, %v1951_v41   ;;  %v1952_v46 = vmul.f32 %v1951_v41, %v1944_v8 }
 0x9e6   :  { %1954 = vrot.lane.b32.xlu1 %v1952_v46, %s2231_s22 }
 0x9e8   :  { %2110 = vset.pattern.permute.xlu0 %v2279_v44 }
 0xa58   :  { %v1955_v37 = vpop.permute.xlu1 %1954 }
 0xa59   :  { %v1957_v30 = vsub.f32 %v2179_v57, %v1955_v37 }
 0xa5b   :  { %1969 = vperm.xlu1 %2109, %v1957_v30  }
 0xa63   :  { %v1961_v27 = vpop.permute.xlu0 %1960 }
 0xa64   :  { %v1963_v22 = vmul.f32 %v1961_v27, %v1918_v24  ;;  %v1964_v33 = vmul.f32 %v1961_v27, %v1919_v60  ;;  %v1965_v38 = vmul.f32 %v1961_v27, %v1920_v10  ;;  %v1966_v19 = vmul.f32 %v1961_v27, %v1921_v43 }
 0xada   :  { %v1970_v9 = vpop.permute.xlu1 %1969 }
 0xadb   :  { %v1972_v32 = vadd.f32 %v1970_v9, %v1963_v22  ;;  %v1973_v62 = vadd.f32 %v1970_v9, %v1964_v33  ;;  %v1974_v18 = vadd.f32 %v1970_v9, %v1965_v38  ;;  %v1975_v3 = vadd.f32 %v1970_v9, %v1966_v19 }
 0xadd   :  { %v1980_v13 = vcombine.low %v1972_v32, %v1973_v62  ;;  %v1981_v11 = vcombine.low %v1974_v18, %v1975_v3 }
 0xadf   :  { %v1984_v25 = vadd.f32 %v2180_v12, %v1980_v13  ;;  %v1985_v17 = vadd.f32 %v2181_v54, %v1981_v11 }
 0xae1   :  { %1986 = vst [vmem:[#allocation5] sm:$0xff] %v1984_v25  ;;  %1987 = vst [vmem:[#allocation5 + $0x8] sm:$0xff] %v1985_v17 }
 0xae2   :  { %2215 = shalt.err (!%p2212_p12)
}
 0xae3   :  { %s2216_s19 = scalar_lea.hbm %s3829_s2, 256 }
 0xae4   :  { %p2217_p13 = scmp.ne.s32.totalorder %s3829_s2, %s2216_s19  ;;  %p2220_p0 = scmp.lt.u32.totalorder %s2216_s19, %s3829_s2 }
 0xae6   :  { %p2222_p1 = pnand %p2220_p0, %p2217_p13 }
 0xae8   :  { %2225 = shalt.err (!%p2222_p1)
}
 0xae9   :  { %1997 = dma.vmem_to_hbm [thread:$0]  %s1995_s15, 256, %s3829_s2, [#allocation4]  }
 0xaea   :  { %2228 = dma.done.wait [#allocation4], 256  }
 0xaeb   :  { %2229 = vsyncadd [#allocation4], 4294967040 }
 0xaec   :  { %2001 = vsyncpa [#allocation3], 1 }
 0xaed   :  { %2002 = vsyncpa [#allocation4], 1 }

</bundles_post_ra>
